<compile_context>
chip_gen: v6e
topology: v6e:2x2x1
jax: 0.10.0
libtpu: 0.0.40
codegen_flags: <defaults>
</compile_context>

<pallas_src>
import functools

import jax
import jax.numpy as jnp
import numpy as np
from jax.experimental import pallas as pl
from jax.experimental.pallas import tpu as pltpu

E1, E2, E3 = 4, 3, 41            # embed dims of attention1/2/3
FC_IN = E1 + E2 + E3             # 48
FC_SIZES = [32, 16, 8, 4, 2]     # hidden sizes; final Linear(2 -> 1)


def _ceil8(n):
    return ((n + 7) // 8) * 8


# ----------------------------- packed-parameter slab layout ---------------------------

def _make_slab_layout():
    """Static layout: name -> (row offset, (rows, cols)); 8-aligned row offsets."""
    layout = {}
    row = 0

    def add(name, r, c):
        nonlocal row
        layout[name] = (row, (r, c))
        row += _ceil8(r)

    for i, e in enumerate((E1, E2, E3)):
        e8 = _ceil8(e)
        add(f"wqkv{i}", 3 * e8, e)      # fused in_proj weight, q|k|v 8-row aligned, q pre-scaled
        add(f"bqkv{i}", 3 * e8, 1)      # fused in_proj bias column, q pre-scaled, pads zero
        add(f"wx{i}", FC_SIZES[0], e)   # FC0 slice applied to the residual (x) path
        add(f"wc{i}", FC_SIZES[0], e8)  # FC0 slice composed with out_proj weight (pad cols 0)
    add("b0eff", FC_SIZES[0], 1)        # FC0 bias + FC0 @ out_proj biases, folded
    for j in range(1, 5):
        add(f"wfc{j}", FC_SIZES[j], FC_SIZES[j - 1])
        add(f"bfc{j}", FC_SIZES[j], 1)
    add("wlast", 1, 2)                  # final Linear(2 -> 1) weight
    return layout, row


_SLAB_LAYOUT, _SLAB_ROWS = _make_slab_layout()


def pack_params(raw):
    """Pack PyTorch-shaped params into (VMEM slab (rows,128) f32, SMEM scalars (8,) f32)."""
    slab = np.zeros((_SLAB_ROWS, 128), np.float32)

    def put(name, arr):
        arr = np.asarray(arr, np.float32)
        r, shape = _SLAB_LAYOUT[name]
        assert arr.shape == shape, (name, arr.shape, shape)
        slab[r:r + shape[0], :shape[1]] = arr

    w0 = np.asarray(raw["fc"][0][0], np.float32)              # (32, 48), PyTorch (out,in)
    w0_slices = [w0[:, :E1], w0[:, E1:E1 + E2], w0[:, E1 + E2:]]
    b0_eff = np.asarray(raw["fc"][0][1], np.float32).copy()   # (32,)

    for i, (e, (wi, bi, wo, bo)) in enumerate(zip((E1, E2, E3), raw["attn"])):
        e8 = _ceil8(e)
        wi = np.asarray(wi, np.float32)   # (3e, e) in_proj_weight
        bi = np.asarray(bi, np.float32)   # (3e,)  in_proj_bias
        wo = np.asarray(wo, np.float32)   # (e, e) out_proj.weight
        bo = np.asarray(bo, np.float32)   # (e,)   out_proj.bias
        s = float(e) ** -0.5
        wqkv = np.zeros((3 * e8, e), np.float32)
        bqkv = np.zeros((3 * e8, 1), np.float32)
        wqkv[0:e] = wi[0:e] * s                   # fold softmax 1/sqrt(E) into Wq / bq
        bqkv[0:e, 0] = bi[0:e] * s
        wqkv[e8:e8 + e] = wi[e:2 * e]
        bqkv[e8:e8 + e, 0] = bi[e:2 * e]
        wqkv[2 * e8:2 * e8 + e] = wi[2 * e:3 * e]
        bqkv[2 * e8:2 * e8 + e, 0] = bi[2 * e:3 * e]
        put(f"wqkv{i}", wqkv)
        put(f"bqkv{i}", bqkv)
        put(f"wx{i}", w0_slices[i])               # FC0 on the residual mean
        wc = np.zeros((FC_SIZES[0], e8), np.float32)
        wc[:, :e] = w0_slices[i] @ wo             # FC0 composed with out_proj
        put(f"wc{i}", wc)
        b0_eff += w0_slices[i] @ bo               # out_proj bias folded through FC0

    put("b0eff", b0_eff[:, None])
    for j in range(1, 5):
        put(f"wfc{j}", np.asarray(raw["fc"][j][0], np.float32))
        put(f"bfc{j}", np.asarray(raw["fc"][j][1], np.float32)[:, None])
    wl, bl = raw["last"]
    put("wlast", np.asarray(wl, np.float32))

    scal = np.zeros((8,), np.float32)
    for j in range(5):
        scal[j] = float(np.asarray(raw["fc"][j][2]))   # PReLU alphas
    scal[5] = float(np.asarray(bl).reshape(-1)[0])     # final bias
    return jnp.asarray(slab), jnp.asarray(scal)


# ----------------------------- Pallas kernel ------------------------------------------

def _rnaseq_kernel(x1_ref, x2_ref, x3_ref, w_ref, s_ref, o_ref, acc_ref,
                   *, b, tl, l_total):
    t = pl.program_id(0)

    def wv(name):
        r, (nr, nc) = _SLAB_LAYOUT[name]
        return w_ref[r:r + nr, 0:nc]          # static slice of the packed VMEM slab

    def mm(a, w):
        # default precision: single bf16 MXU pass with f32 accumulation
        return jnp.dot(a, w, preferred_element_type=jnp.float32)

    @pl.when(t == 0)
    def _init():
        acc_ref[...] = jnp.zeros_like(acc_ref)

    # lane one-hot rows used to place per-row column vectors side by side (avoids
    # unaligned minor-dim concatenation)
    onehots = [
        (jax.lax.broadcasted_iota(jnp.int32, (1, b), 1) == i).astype(jnp.float32)
        for i in range(b)
    ]

    def stream_accum(xs_ref, e, idx):
        """FC0-projected contribution of one attention stream for this L tile -> (32, b)."""
        e8 = _ceil8(e)
        wqkv = wv(f"wqkv{idx}")                                    # (3e8, e)
        bqkv = jnp.broadcast_to(wv(f"bqkv{idx}"), (3 * e8, tl))    # hoisted lane broadcast
        qs, ks, vs, xsums = [], [], [], []
        for i in range(b):                      # torch-batch row == attention position
            xi = xs_ref[i]                      # (e, tl): channel-first, L on lanes
            qkv = mm(wqkv, xi) + bqkv           # (3e8, tl); q pre-scaled; pad rows are 0
            qs.append(qkv[0:e8, :])             # 8-aligned sublane slices (no relayout)
            ks.append(qkv[e8:2 * e8, :])
            vs.append(qkv[2 * e8:3 * e8, :])
            xsums.append(jnp.sum(xi, axis=1, keepdims=True))       # (e, 1) residual sum
        osums = []
        for i in range(b):                                         # query position i
            rows = [jnp.sum(qs[i] * ks[j], axis=0, keepdims=True)  # (1, tl) each
                    for j in range(b)]
            smat = jnp.concatenate(rows, axis=0)                   # (b, tl) packed scores
            mx = jnp.max(smat, axis=0, keepdims=True)              # (1, tl)
            p = jnp.exp(smat - mx)                                 # one packed EUP exp
            den = jnp.sum(p, axis=0, keepdims=True)                # (1, tl)
            p = p * pl.reciprocal(den, approx=True)                # softmax weights (b, tl)
            o = p[0:1, :] * vs[0]
            for j in range(1, b):
                o = o + p[j:j + 1, :] * vs[j]                      # (e8, tl)
            osums.append(jnp.sum(o, axis=1, keepdims=True))        # (e8, 1) tile sum
        # place per-row columns side by side -> (e, b) / (e8, b)
        xsum = sum(xsums[i] * onehots[i] for i in range(b))
        osum = sum(osums[i] * onehots[i] for i in range(b))
        # sum_l(x + Wo @ o + bo) pushed through the FC0 slice; bo is folded into b0eff
        return mm(wv(f"wx{idx}"), xsum) + mm(wv(f"wc{idx}"), osum)  # (32, b)

    acc_ref[...] += (stream_accum(x1_ref, E1, 0)
                     + stream_accum(x2_ref, E2, 1)
                     + stream_accum(x3_ref, E3, 2))

    @pl.when(t == pl.num_programs(0) - 1)
    def _finish():
        h = acc_ref[...] * (1.0 / float(l_total)) + wv("b0eff")    # mean over L + biases
        h = jnp.where(h >= 0, h, s_ref[0] * h)                     # PReLU (dropout = id)
        for j in range(1, 5):
            h = mm(wv(f"wfc{j}"), h) + wv(f"bfc{j}")
            h = jnp.where(h >= 0, h, s_ref[j] * h)
        out = mm(wv("wlast"), h) + s_ref[5]                        # final Linear(2 -> 1)
        o_ref[...] = out.astype(o_ref.dtype)


def _default_block_l(L):
    if L <= 1024:
        return L
    for cand in range(1024, 0, -128):
        if L % cand == 0:
            return cand
    return L   # fallback: single tile (very large L may need vmem_limit_bytes)


def rnaseq_classifier_forward(x1, x2, x3, wslab, scal, *, block_l=None):
    """x_i: (B, C_i, L) float32, PyTorch channels-first layout. Returns (B, 1)."""
    B, c1, L = x1.shape
    assert c1 == E1 and x2.shape == (B, E2, L) and x3.shape == (B, E3, L)
    assert B <= 8, "attention mixes over the torch batch; kernel unrolls over it"
    tl = block_l if block_l is not None else _default_block_l(L)
    assert L % tl == 0, "L tile must divide L"
    assert tl % 128 == 0 or tl == L, "L tile must be a multiple of 128 (or equal L)"

    xs = [x.astype(jnp.float32) for x in (x1, x2, x3)]   # channel-first: no relayout
    grid = (L // tl,)

    # rough cost hint so XLA schedules the custom call sensibly
    flops = 2 * B * sum(di * do for di, do in zip([FC_IN] + FC_SIZES, FC_SIZES + [1]))
    for e in (E1, E2, E3):
        e8 = _ceil8(e)
        flops += 2 * B * (3 * e8) * e * L                      # QKV projections
        flops += 4 * B * B * e8 * L                            # scores + weighted sums
        flops += 4 * FC_SIZES[0] * (e + e8) * B * (L // tl)    # per-tile FC0 folds
    bytes_accessed = 4 * (B * L * (E1 + E2 + E3) + _SLAB_ROWS * 128 + 8 + B)

    kernel = functools.partial(_rnaseq_kernel, b=B, tl=tl, l_total=L)
    out = pl.pallas_call(
        kernel,
        out_shape=jax.ShapeDtypeStruct((1, B), jnp.float32),
        grid_spec=pltpu.PrefetchScalarGridSpec(
            num_scalar_prefetch=0,
            grid=grid,
            in_specs=[
                pl.BlockSpec((B, E1, tl), lambda t: (0, 0, t)),
                pl.BlockSpec((B, E2, tl), lambda t: (0, 0, t)),
                pl.BlockSpec((B, E3, tl), lambda t: (0, 0, t)),
                pl.BlockSpec((_SLAB_ROWS, 128), lambda t: (0, 0)),   # packed weight slab
                pl.BlockSpec(memory_space=pltpu.MemorySpace.SMEM),   # alphas + final bias
            ],
            out_specs=pl.BlockSpec((1, B), lambda t: (0, 0)),
            scratch_shapes=[pltpu.VMEM((FC_SIZES[0], B), jnp.float32)],
        ),
        compiler_params=pltpu.CompilerParams(
            dimension_semantics=("arbitrary",),      # L axis is a reduction
        ),
        cost_estimate=pl.CostEstimate(
            flops=int(flops),
            transcendentals=int(3 * B * B * L),
            bytes_accessed=int(bytes_accessed)),
    )(xs[0], xs[1], xs[2], wslab, scal)
    return out.T                                     # (B, 1) to match PyTorch


# ----------------------------- deterministic params + pure-JAX reference --------------

def init_raw_params(key):
    keys = iter(jax.random.split(key, 32))

    def rnd(shape, scale):
        return (scale * jax.random.normal(next(keys), shape)).astype(jnp.float32)

    attn = []
    for e in (E1, E2, E3):
        attn.append((rnd((3 * e, e), 0.2), rnd((3 * e,), 0.2),
                     rnd((e, e), 0.2), rnd((e,), 0.2)))
    fc = []
    dims = [FC_IN] + FC_SIZES
    for j in range(5):
        fc.append((rnd((dims[j + 1], dims[j]), 0.5), rnd((dims[j + 1],), 0.5),
                   jnp.array(0.25, jnp.float32)))     # PReLU init = 0.25
    last = (rnd((1, 2), 0.5), rnd((1,), 0.5))
    return {"attn": attn, "fc": fc, "last": last}


def _reference(x1, x2, x3, raw):
    """Pure-JAX forward following the PyTorch math (independent of the packed layout)."""
    ms = []
    for x, (wi, bi, wo, bo), e in zip((x1, x2, x3), raw["attn"], (E1, E2, E3)):
        xt = jnp.transpose(x, (0, 2, 1))              # (B, L, E): seq=B, batch=L
        wq, wk, wv_ = wi[:e], wi[e:2 * e], wi[2 * e:]
        bq, bk, bv = bi[:e], bi[e:2 * e], bi[2 * e:]
        q = (xt @ wq.T + bq) * (float(e) ** -0.5)
        k = xt @ wk.T + bk
        v = xt @ wv_.T + bv
        s = jnp.einsum('ale,ble->lab', q, k)
        p = jax.nn.softmax(s, axis=-1)
        o = jnp.einsum('lab,ble->ale', p, v)
        y = xt + (o @ wo.T + bo)                      # residual
        ms.append(jnp.mean(y, axis=1))                # mean over L -> (B, E)
    h = jnp.concatenate(ms, axis=1)                   # (B, 48)
    for w, b, a in raw["fc"]:
        h = h @ w.T + b
        h = jnp.where(h >= 0, h, a * h)
    wl, bl = raw["last"]
    return h @ wl.T + bl                              # (B, 1)


# ----------------------------- demo ----------------------------------------------------

if __name__ == "__main__":
    key = jax.random.PRNGKey(0)
    kx1, kx2, kx3, kp = jax.random.split(key, 4)

    B, L = 4, 256                                     # attention attends over the B axis
    x1 = jax.random.normal(kx1, (B, E1, L), jnp.float32)
    x2 = jax.random.normal(kx2, (B, E2, L), jnp.float32)
    x3 = jax.random.normal(kx3, (B, E3, L), jnp.float32)

    raw = init_raw_params(kp)
    wslab, scal = pack_params(raw)

    out = rnaseq_classifier_forward(x1, x2, x3, wslab, scal, block_l=128)  # 2-step L grid
    out = jax.block_until_ready(out)

    ref = _reference(x1, x2, x3, raw)

    assert out.shape == (B, 1), out.shape
    # tolerance covers default (bf16-pass) matmul precision in both paths and
    # pl.reciprocal(approx=True) in the softmax denominator
    assert bool(jnp.allclose(out, ref, atol=5e-2, rtol=5e-2)), (out, ref)
    print("KERNEL_OK")
</pallas_src>

<mosaic_0001>
module attributes {stable_mosaic.version = 11 : i64} {
  func.func @_rnaseq_kernel(%arg0: i32, %arg1: memref<4x4x128xf32, #tpu.memory_space<vmem>>, %arg2: memref<4x3x128xf32, #tpu.memory_space<vmem>>, %arg3: memref<4x41x128xf32, #tpu.memory_space<vmem>>, %arg4: memref<696x128xf32, #tpu.memory_space<vmem>>, %arg5: memref<8xf32, #tpu.memory_space<smem>>, %arg6: memref<1x4xf32, #tpu.memory_space<vmem>>, %arg7: memref<32x4xf32, #tpu.memory_space<vmem>>) attributes {dimension_semantics = [#tpu.dimension_semantics<arbitrary>], iteration_bounds = array<i64: 2>, scalar_prefetch = 0 : i64, scratch_operands = 1 : i64, tpu.core_type = #tpu.core_type<tc>, window_params = [{transform_indices = @transform_0, window_bounds = array<i64: 4, 4, 128>}, {transform_indices = @transform_1, window_bounds = array<i64: 4, 3, 128>}, {transform_indices = @transform_2, window_bounds = array<i64: 4, 41, 128>}, {pipeline_mode = #tpu.pipeline_mode<synchronous>, transform_indices = @transform_3, window_bounds = array<i64: 696, 128>}, {transform_indices = @transform_4, window_bounds = array<i64: 8>}, {pipeline_mode = #tpu.pipeline_mode<synchronous>, transform_indices = @transform_5, window_bounds = array<i64: 1, 4>}]} {
    %c0_i32 = arith.constant 0 : i32
    %0 = arith.cmpi eq, %arg0, %c0_i32 : i32
    %1 = arith.extui %0 : i1 to i32
    %c0_i32_0 = arith.constant 0 : i32
    %2 = arith.cmpi ne, %1, %c0_i32_0 : i32
    scf.if %2 {
      %cst_172 = arith.constant 0.000000e+00 : f32
      %748 = vector.broadcast %cst_172 : f32 to vector<32x4xf32>
      %c0_173 = arith.constant 0 : index
      %c0_174 = arith.constant 0 : index
      %749 = vector.load %arg7[%c0_173, %c0_174] : memref<32x4xf32, #tpu.memory_space<vmem>>, vector<32x4xf32>
      tpu.vector_store %arg7[%c0_173, %c0_174], %748 {strides = array<i32>} : memref<32x4xf32, #tpu.memory_space<vmem>>, vector<32x4xf32>,
    } else {
    }
    %3 = tpu.iota {dimensions = array<i32: 1>} : vector<1x4xi32>
    %c0_i32_1 = arith.constant 0 : i32
    %4 = vector.broadcast %c0_i32_1 : i32 to vector<1x4xi32>
    %5 = arith.cmpi eq, %3, %4 : vector<1x4xi32>
    %6 = arith.extui %5 : vector<1x4xi1> to vector<1x4xi32>
    %7 = arith.sitofp %6 : vector<1x4xi32> to vector<1x4xf32>
    %8 = tpu.iota {dimensions = array<i32: 1>} : vector<1x4xi32>
    %c1_i32 = arith.constant 1 : i32
    %9 = vector.broadcast %c1_i32 : i32 to vector<1x4xi32>
    %10 = arith.cmpi eq, %8, %9 : vector<1x4xi32>
    %11 = arith.extui %10 : vector<1x4xi1> to vector<1x4xi32>
    %12 = arith.sitofp %11 : vector<1x4xi32> to vector<1x4xf32>
    %13 = tpu.iota {dimensions = array<i32: 1>} : vector<1x4xi32>
    %c2_i32 = arith.constant 2 : i32
    %14 = vector.broadcast %c2_i32 : i32 to vector<1x4xi32>
    %15 = arith.cmpi eq, %13, %14 : vector<1x4xi32>
    %16 = arith.extui %15 : vector<1x4xi1> to vector<1x4xi32>
    %17 = arith.sitofp %16 : vector<1x4xi32> to vector<1x4xf32>
    %18 = tpu.iota {dimensions = array<i32: 1>} : vector<1x4xi32>
    %c3_i32 = arith.constant 3 : i32
    %19 = vector.broadcast %c3_i32 : i32 to vector<1x4xi32>
    %20 = arith.cmpi eq, %18, %19 : vector<1x4xi32>
    %21 = arith.extui %20 : vector<1x4xi1> to vector<1x4xi32>
    %22 = arith.sitofp %21 : vector<1x4xi32> to vector<1x4xf32>
    %c0 = arith.constant 0 : index
    %c0_2 = arith.constant 0 : index
    %23 = vector.load %arg7[%c0, %c0_2] : memref<32x4xf32, #tpu.memory_space<vmem>>, vector<32x4xf32>
    %c0_3 = arith.constant 0 : index
    %c0_4 = arith.constant 0 : index
    %24 = vector.load %arg4[%c0_3, %c0_4] : memref<696x128xf32, #tpu.memory_space<vmem>>, vector<24x4xf32>
    %c24 = arith.constant 24 : index
    %c0_5 = arith.constant 0 : index
    %25 = vector.load %arg4[%c24, %c0_5] : memref<696x128xf32, #tpu.memory_space<vmem>>, vector<24x1xf32>
    %26 = vector.shape_cast %25 : vector<24x1xf32> to vector<24x1xf32>
    %27 = vector.broadcast %26 : vector<24x1xf32> to vector<24x128xf32>
    %c0_6 = arith.constant 0 : index
    %c0_7 = arith.constant 0 : index
    %c0_8 = arith.constant 0 : index
    %28 = vector.load %arg1[%c0_6, %c0_7, %c0_8] : memref<4x4x128xf32, #tpu.memory_space<vmem>>, vector<1x4x128xf32>
    %29 = vector.shape_cast %28 : vector<1x4x128xf32> to vector<4x128xf32>
    %cst = arith.constant dense<0.000000e+00> : vector<24x128xf32>
    %30 = tpu.matmul %24, %29, %cst {dimension_numbers = #tpu.dot_dimension_numbers<[1], [0], [0], [1], [0, 0, 1, 1], [], []>} : vector<24x4xf32>, vector<4x128xf32>, vector<24x128xf32> -> vector<24x128xf32>
    %31 = arith.addf %30, %27 : vector<24x128xf32>
    %32 = vector.extract_strided_slice %31 {offsets = [0, 0], sizes = [8, 128], strides = [1, 1]} : vector<24x128xf32> to vector<8x128xf32>
    %33 = vector.extract_strided_slice %31 {offsets = [8, 0], sizes = [8, 128], strides = [1, 1]} : vector<24x128xf32> to vector<8x128xf32>
    %34 = vector.extract_strided_slice %31 {offsets = [16, 0], sizes = [8, 128], strides = [1, 1]} : vector<24x128xf32> to vector<8x128xf32>
    %cst_9 = arith.constant dense<0.000000e+00> : vector<4xf32>
    %35 = vector.multi_reduction <add>, %29, %cst_9 [1] : vector<4x128xf32> to vector<4xf32>
    %36 = vector.shape_cast %35 : vector<4xf32> to vector<4x1xf32>
    %c1 = arith.constant 1 : index
    %c0_10 = arith.constant 0 : index
    %c0_11 = arith.constant 0 : index
    %37 = vector.load %arg1[%c1, %c0_10, %c0_11] : memref<4x4x128xf32, #tpu.memory_space<vmem>>, vector<1x4x128xf32>
    %38 = vector.shape_cast %37 : vector<1x4x128xf32> to vector<4x128xf32>
    %cst_12 = arith.constant dense<0.000000e+00> : vector<24x128xf32>
    %39 = tpu.matmul %24, %38, %cst_12 {dimension_numbers = #tpu.dot_dimension_numbers<[1], [0], [0], [1], [0, 0, 1, 1], [], []>} : vector<24x4xf32>, vector<4x128xf32>, vector<24x128xf32> -> vector<24x128xf32>
    %40 = arith.addf %39, %27 : vector<24x128xf32>
    %41 = vector.extract_strided_slice %40 {offsets = [0, 0], sizes = [8, 128], strides = [1, 1]} : vector<24x128xf32> to vector<8x128xf32>
    %42 = vector.extract_strided_slice %40 {offsets = [8, 0], sizes = [8, 128], strides = [1, 1]} : vector<24x128xf32> to vector<8x128xf32>
    %43 = vector.extract_strided_slice %40 {offsets = [16, 0], sizes = [8, 128], strides = [1, 1]} : vector<24x128xf32> to vector<8x128xf32>
    %cst_13 = arith.constant dense<0.000000e+00> : vector<4xf32>
    %44 = vector.multi_reduction <add>, %38, %cst_13 [1] : vector<4x128xf32> to vector<4xf32>
    %45 = vector.shape_cast %44 : vector<4xf32> to vector<4x1xf32>
    %c2 = arith.constant 2 : index
    %c0_14 = arith.constant 0 : index
    %c0_15 = arith.constant 0 : index
    %46 = vector.load %arg1[%c2, %c0_14, %c0_15] : memref<4x4x128xf32, #tpu.memory_space<vmem>>, vector<1x4x128xf32>
    %47 = vector.shape_cast %46 : vector<1x4x128xf32> to vector<4x128xf32>
    %cst_16 = arith.constant dense<0.000000e+00> : vector<24x128xf32>
    %48 = tpu.matmul %24, %47, %cst_16 {dimension_numbers = #tpu.dot_dimension_numbers<[1], [0], [0], [1], [0, 0, 1, 1], [], []>} : vector<24x4xf32>, vector<4x128xf32>, vector<24x128xf32> -> vector<24x128xf32>
    %49 = arith.addf %48, %27 : vector<24x128xf32>
    %50 = vector.extract_strided_slice %49 {offsets = [0, 0], sizes = [8, 128], strides = [1, 1]} : vector<24x128xf32> to vector<8x128xf32>
    %51 = vector.extract_strided_slice %49 {offsets = [8, 0], sizes = [8, 128], strides = [1, 1]} : vector<24x128xf32> to vector<8x128xf32>
    %52 = vector.extract_strided_slice %49 {offsets = [16, 0], sizes = [8, 128], strides = [1, 1]} : vector<24x128xf32> to vector<8x128xf32>
    %cst_17 = arith.constant dense<0.000000e+00> : vector<4xf32>
    %53 = vector.multi_reduction <add>, %47, %cst_17 [1] : vector<4x128xf32> to vector<4xf32>
    %54 = vector.shape_cast %53 : vector<4xf32> to vector<4x1xf32>
    %c3 = arith.constant 3 : index
    %c0_18 = arith.constant 0 : index
    %c0_19 = arith.constant 0 : index
    %55 = vector.load %arg1[%c3, %c0_18, %c0_19] : memref<4x4x128xf32, #tpu.memory_space<vmem>>, vector<1x4x128xf32>
    %56 = vector.shape_cast %55 : vector<1x4x128xf32> to vector<4x128xf32>
    %cst_20 = arith.constant dense<0.000000e+00> : vector<24x128xf32>
    %57 = tpu.matmul %24, %56, %cst_20 {dimension_numbers = #tpu.dot_dimension_numbers<[1], [0], [0], [1], [0, 0, 1, 1], [], []>} : vector<24x4xf32>, vector<4x128xf32>, vector<24x128xf32> -> vector<24x128xf32>
    %58 = arith.addf %57, %27 : vector<24x128xf32>
    %59 = vector.extract_strided_slice %58 {offsets = [0, 0], sizes = [8, 128], strides = [1, 1]} : vector<24x128xf32> to vector<8x128xf32>
    %60 = vector.extract_strided_slice %58 {offsets = [8, 0], sizes = [8, 128], strides = [1, 1]} : vector<24x128xf32> to vector<8x128xf32>
    %61 = vector.extract_strided_slice %58 {offsets = [16, 0], sizes = [8, 128], strides = [1, 1]} : vector<24x128xf32> to vector<8x128xf32>
    %cst_21 = arith.constant dense<0.000000e+00> : vector<4xf32>
    %62 = vector.multi_reduction <add>, %56, %cst_21 [1] : vector<4x128xf32> to vector<4xf32>
    %63 = vector.shape_cast %62 : vector<4xf32> to vector<4x1xf32>
    %64 = arith.mulf %32, %33 : vector<8x128xf32>
    %cst_22 = arith.constant dense<0.000000e+00> : vector<128xf32>
    %65 = vector.multi_reduction <add>, %64, %cst_22 [0] : vector<8x128xf32> to vector<128xf32>
    %66 = vector.shape_cast %65 : vector<128xf32> to vector<1x128xf32>
    %67 = arith.mulf %32, %42 : vector<8x128xf32>
    %cst_23 = arith.constant dense<0.000000e+00> : vector<128xf32>
    %68 = vector.multi_reduction <add>, %67, %cst_23 [0] : vector<8x128xf32> to vector<128xf32>
    %69 = vector.shape_cast %68 : vector<128xf32> to vector<1x128xf32>
    %70 = arith.mulf %32, %51 : vector<8x128xf32>
    %cst_24 = arith.constant dense<0.000000e+00> : vector<128xf32>
    %71 = vector.multi_reduction <add>, %70, %cst_24 [0] : vector<8x128xf32> to vector<128xf32>
    %72 = vector.shape_cast %71 : vector<128xf32> to vector<1x128xf32>
    %73 = arith.mulf %32, %60 : vector<8x128xf32>
    %cst_25 = arith.constant dense<0.000000e+00> : vector<128xf32>
    %74 = vector.multi_reduction <add>, %73, %cst_25 [0] : vector<8x128xf32> to vector<128xf32>
    %75 = vector.shape_cast %74 : vector<128xf32> to vector<1x128xf32>
    %76 = tpu.concatenate %66, %69, %72, %75 in 0 : vector<1x128xf32>, vector<1x128xf32>, vector<1x128xf32>, vector<1x128xf32> -> vector<4x128xf32>
    %cst_26 = arith.constant dense<0xFF800000> : vector<128xf32>
    %77 = vector.multi_reduction <maximumf>, %76, %cst_26 [0] : vector<4x128xf32> to vector<128xf32>
    %78 = vector.shape_cast %77 : vector<128xf32> to vector<1x128xf32>
    %79 = vector.broadcast %78 : vector<1x128xf32> to vector<4x128xf32>
    %80 = arith.subf %76, %79 : vector<4x128xf32>
    %81 = math.exp %80 : vector<4x128xf32>
    %cst_27 = arith.constant dense<0.000000e+00> : vector<128xf32>
    %82 = vector.multi_reduction <add>, %81, %cst_27 [0] : vector<4x128xf32> to vector<128xf32>
    %83 = vector.shape_cast %82 : vector<128xf32> to vector<1x128xf32>
    %84 = tpu.reciprocal %83 {approx = true} : vector<1x128xf32> -> vector<1x128xf32>
    %85 = vector.broadcast %84 : vector<1x128xf32> to vector<4x128xf32>
    %86 = arith.mulf %81, %85 : vector<4x128xf32>
    %87 = vector.extract_strided_slice %86 {offsets = [0, 0], sizes = [1, 128], strides = [1, 1]} : vector<4x128xf32> to vector<1x128xf32>
    %88 = vector.broadcast %87 : vector<1x128xf32> to vector<8x128xf32>
    %89 = arith.mulf %88, %34 : vector<8x128xf32>
    %90 = vector.extract_strided_slice %86 {offsets = [1, 0], sizes = [1, 128], strides = [1, 1]} : vector<4x128xf32> to vector<1x128xf32>
    %91 = vector.broadcast %90 : vector<1x128xf32> to vector<8x128xf32>
    %92 = arith.mulf %91, %43 : vector<8x128xf32>
    %93 = arith.addf %89, %92 : vector<8x128xf32>
    %94 = vector.extract_strided_slice %86 {offsets = [2, 0], sizes = [1, 128], strides = [1, 1]} : vector<4x128xf32> to vector<1x128xf32>
    %95 = vector.broadcast %94 : vector<1x128xf32> to vector<8x128xf32>
    %96 = arith.mulf %95, %52 : vector<8x128xf32>
    %97 = arith.addf %93, %96 : vector<8x128xf32>
    %98 = vector.extract_strided_slice %86 {offsets = [3, 0], sizes = [1, 128], strides = [1, 1]} : vector<4x128xf32> to vector<1x128xf32>
    %99 = vector.broadcast %98 : vector<1x128xf32> to vector<8x128xf32>
    %100 = arith.mulf %99, %61 : vector<8x128xf32>
    %101 = arith.addf %97, %100 : vector<8x128xf32>
    %cst_28 = arith.constant dense<0.000000e+00> : vector<8xf32>
    %102 = vector.multi_reduction <add>, %101, %cst_28 [1] : vector<8x128xf32> to vector<8xf32>
    %103 = vector.shape_cast %102 : vector<8xf32> to vector<8x1xf32>
    %104 = arith.mulf %41, %33 : vector<8x128xf32>
    %cst_29 = arith.constant dense<0.000000e+00> : vector<128xf32>
    %105 = vector.multi_reduction <add>, %104, %cst_29 [0] : vector<8x128xf32> to vector<128xf32>
    %106 = vector.shape_cast %105 : vector<128xf32> to vector<1x128xf32>
    %107 = arith.mulf %41, %42 : vector<8x128xf32>
    %cst_30 = arith.constant dense<0.000000e+00> : vector<128xf32>
    %108 = vector.multi_reduction <add>, %107, %cst_30 [0] : vector<8x128xf32> to vector<128xf32>
    %109 = vector.shape_cast %108 : vector<128xf32> to vector<1x128xf32>
    %110 = arith.mulf %41, %51 : vector<8x128xf32>
    %cst_31 = arith.constant dense<0.000000e+00> : vector<128xf32>
    %111 = vector.multi_reduction <add>, %110, %cst_31 [0] : vector<8x128xf32> to vector<128xf32>
    %112 = vector.shape_cast %111 : vector<128xf32> to vector<1x128xf32>
    %113 = arith.mulf %41, %60 : vector<8x128xf32>
    %cst_32 = arith.constant dense<0.000000e+00> : vector<128xf32>
    %114 = vector.multi_reduction <add>, %113, %cst_32 [0] : vector<8x128xf32> to vector<128xf32>
    %115 = vector.shape_cast %114 : vector<128xf32> to vector<1x128xf32>
    %116 = tpu.concatenate %106, %109, %112, %115 in 0 : vector<1x128xf32>, vector<1x128xf32>, vector<1x128xf32>, vector<1x128xf32> -> vector<4x128xf32>
    %cst_33 = arith.constant dense<0xFF800000> : vector<128xf32>
    %117 = vector.multi_reduction <maximumf>, %116, %cst_33 [0] : vector<4x128xf32> to vector<128xf32>
    %118 = vector.shape_cast %117 : vector<128xf32> to vector<1x128xf32>
    %119 = vector.broadcast %118 : vector<1x128xf32> to vector<4x128xf32>
    %120 = arith.subf %116, %119 : vector<4x128xf32>
    %121 = math.exp %120 : vector<4x128xf32>
    %cst_34 = arith.constant dense<0.000000e+00> : vector<128xf32>
    %122 = vector.multi_reduction <add>, %121, %cst_34 [0] : vector<4x128xf32> to vector<128xf32>
    %123 = vector.shape_cast %122 : vector<128xf32> to vector<1x128xf32>
    %124 = tpu.reciprocal %123 {approx = true} : vector<1x128xf32> -> vector<1x128xf32>
    %125 = vector.broadcast %124 : vector<1x128xf32> to vector<4x128xf32>
    %126 = arith.mulf %121, %125 : vector<4x128xf32>
    %127 = vector.extract_strided_slice %126 {offsets = [0, 0], sizes = [1, 128], strides = [1, 1]} : vector<4x128xf32> to vector<1x128xf32>
    %128 = vector.broadcast %127 : vector<1x128xf32> to vector<8x128xf32>
    %129 = arith.mulf %128, %34 : vector<8x128xf32>
    %130 = vector.extract_strided_slice %126 {offsets = [1, 0], sizes = [1, 128], strides = [1, 1]} : vector<4x128xf32> to vector<1x128xf32>
    %131 = vector.broadcast %130 : vector<1x128xf32> to vector<8x128xf32>
    %132 = arith.mulf %131, %43 : vector<8x128xf32>
    %133 = arith.addf %129, %132 : vector<8x128xf32>
    %134 = vector.extract_strided_slice %126 {offsets = [2, 0], sizes = [1, 128], strides = [1, 1]} : vector<4x128xf32> to vector<1x128xf32>
    %135 = vector.broadcast %134 : vector<1x128xf32> to vector<8x128xf32>
    %136 = arith.mulf %135, %52 : vector<8x128xf32>
    %137 = arith.addf %133, %136 : vector<8x128xf32>
    %138 = vector.extract_strided_slice %126 {offsets = [3, 0], sizes = [1, 128], strides = [1, 1]} : vector<4x128xf32> to vector<1x128xf32>
    %139 = vector.broadcast %138 : vector<1x128xf32> to vector<8x128xf32>
    %140 = arith.mulf %139, %61 : vector<8x128xf32>
    %141 = arith.addf %137, %140 : vector<8x128xf32>
    %cst_35 = arith.constant dense<0.000000e+00> : vector<8xf32>
    %142 = vector.multi_reduction <add>, %141, %cst_35 [1] : vector<8x128xf32> to vector<8xf32>
    %143 = vector.shape_cast %142 : vector<8xf32> to vector<8x1xf32>
    %144 = arith.mulf %50, %33 : vector<8x128xf32>
    %cst_36 = arith.constant dense<0.000000e+00> : vector<128xf32>
    %145 = vector.multi_reduction <add>, %144, %cst_36 [0] : vector<8x128xf32> to vector<128xf32>
    %146 = vector.shape_cast %145 : vector<128xf32> to vector<1x128xf32>
    %147 = arith.mulf %50, %42 : vector<8x128xf32>
    %cst_37 = arith.constant dense<0.000000e+00> : vector<128xf32>
    %148 = vector.multi_reduction <add>, %147, %cst_37 [0] : vector<8x128xf32> to vector<128xf32>
    %149 = vector.shape_cast %148 : vector<128xf32> to vector<1x128xf32>
    %150 = arith.mulf %50, %51 : vector<8x128xf32>
    %cst_38 = arith.constant dense<0.000000e+00> : vector<128xf32>
    %151 = vector.multi_reduction <add>, %150, %cst_38 [0] : vector<8x128xf32> to vector<128xf32>
    %152 = vector.shape_cast %151 : vector<128xf32> to vector<1x128xf32>
    %153 = arith.mulf %50, %60 : vector<8x128xf32>
    %cst_39 = arith.constant dense<0.000000e+00> : vector<128xf32>
    %154 = vector.multi_reduction <add>, %153, %cst_39 [0] : vector<8x128xf32> to vector<128xf32>
    %155 = vector.shape_cast %154 : vector<128xf32> to vector<1x128xf32>
    %156 = tpu.concatenate %146, %149, %152, %155 in 0 : vector<1x128xf32>, vector<1x128xf32>, vector<1x128xf32>, vector<1x128xf32> -> vector<4x128xf32>
    %cst_40 = arith.constant dense<0xFF800000> : vector<128xf32>
    %157 = vector.multi_reduction <maximumf>, %156, %cst_40 [0] : vector<4x128xf32> to vector<128xf32>
    %158 = vector.shape_cast %157 : vector<128xf32> to vector<1x128xf32>
    %159 = vector.broadcast %158 : vector<1x128xf32> to vector<4x128xf32>
    %160 = arith.subf %156, %159 : vector<4x128xf32>
    %161 = math.exp %160 : vector<4x128xf32>
    %cst_41 = arith.constant dense<0.000000e+00> : vector<128xf32>
    %162 = vector.multi_reduction <add>, %161, %cst_41 [0] : vector<4x128xf32> to vector<128xf32>
    %163 = vector.shape_cast %162 : vector<128xf32> to vector<1x128xf32>
    %164 = tpu.reciprocal %163 {approx = true} : vector<1x128xf32> -> vector<1x128xf32>
    %165 = vector.broadcast %164 : vector<1x128xf32> to vector<4x128xf32>
    %166 = arith.mulf %161, %165 : vector<4x128xf32>
    %167 = vector.extract_strided_slice %166 {offsets = [0, 0], sizes = [1, 128], strides = [1, 1]} : vector<4x128xf32> to vector<1x128xf32>
    %168 = vector.broadcast %167 : vector<1x128xf32> to vector<8x128xf32>
    %169 = arith.mulf %168, %34 : vector<8x128xf32>
    %170 = vector.extract_strided_slice %166 {offsets = [1, 0], sizes = [1, 128], strides = [1, 1]} : vector<4x128xf32> to vector<1x128xf32>
    %171 = vector.broadcast %170 : vector<1x128xf32> to vector<8x128xf32>
    %172 = arith.mulf %171, %43 : vector<8x128xf32>
    %173 = arith.addf %169, %172 : vector<8x128xf32>
    %174 = vector.extract_strided_slice %166 {offsets = [2, 0], sizes = [1, 128], strides = [1, 1]} : vector<4x128xf32> to vector<1x128xf32>
    %175 = vector.broadcast %174 : vector<1x128xf32> to vector<8x128xf32>
    %176 = arith.mulf %175, %52 : vector<8x128xf32>
    %177 = arith.addf %173, %176 : vector<8x128xf32>
    %178 = vector.extract_strided_slice %166 {offsets = [3, 0], sizes = [1, 128], strides = [1, 1]} : vector<4x128xf32> to vector<1x128xf32>
    %179 = vector.broadcast %178 : vector<1x128xf32> to vector<8x128xf32>
    %180 = arith.mulf %179, %61 : vector<8x128xf32>
    %181 = arith.addf %177, %180 : vector<8x128xf32>
    %cst_42 = arith.constant dense<0.000000e+00> : vector<8xf32>
    %182 = vector.multi_reduction <add>, %181, %cst_42 [1] : vector<8x128xf32> to vector<8xf32>
    %183 = vector.shape_cast %182 : vector<8xf32> to vector<8x1xf32>
    %184 = arith.mulf %59, %33 : vector<8x128xf32>
    %cst_43 = arith.constant dense<0.000000e+00> : vector<128xf32>
    %185 = vector.multi_reduction <add>, %184, %cst_43 [0] : vector<8x128xf32> to vector<128xf32>
    %186 = vector.shape_cast %185 : vector<128xf32> to vector<1x128xf32>
    %187 = arith.mulf %59, %42 : vector<8x128xf32>
    %cst_44 = arith.constant dense<0.000000e+00> : vector<128xf32>
    %188 = vector.multi_reduction <add>, %187, %cst_44 [0] : vector<8x128xf32> to vector<128xf32>
    %189 = vector.shape_cast %188 : vector<128xf32> to vector<1x128xf32>
    %190 = arith.mulf %59, %51 : vector<8x128xf32>
    %cst_45 = arith.constant dense<0.000000e+00> : vector<128xf32>
    %191 = vector.multi_reduction <add>, %190, %cst_45 [0] : vector<8x128xf32> to vector<128xf32>
    %192 = vector.shape_cast %191 : vector<128xf32> to vector<1x128xf32>
    %193 = arith.mulf %59, %60 : vector<8x128xf32>
    %cst_46 = arith.constant dense<0.000000e+00> : vector<128xf32>
    %194 = vector.multi_reduction <add>, %193, %cst_46 [0] : vector<8x128xf32> to vector<128xf32>
    %195 = vector.shape_cast %194 : vector<128xf32> to vector<1x128xf32>
    %196 = tpu.concatenate %186, %189, %192, %195 in 0 : vector<1x128xf32>, vector<1x128xf32>, vector<1x128xf32>, vector<1x128xf32> -> vector<4x128xf32>
    %cst_47 = arith.constant dense<0xFF800000> : vector<128xf32>
    %197 = vector.multi_reduction <maximumf>, %196, %cst_47 [0] : vector<4x128xf32> to vector<128xf32>
    %198 = vector.shape_cast %197 : vector<128xf32> to vector<1x128xf32>
    %199 = vector.broadcast %198 : vector<1x128xf32> to vector<4x128xf32>
    %200 = arith.subf %196, %199 : vector<4x128xf32>
    %201 = math.exp %200 : vector<4x128xf32>
    %cst_48 = arith.constant dense<0.000000e+00> : vector<128xf32>
    %202 = vector.multi_reduction <add>, %201, %cst_48 [0] : vector<4x128xf32> to vector<128xf32>
    %203 = vector.shape_cast %202 : vector<128xf32> to vector<1x128xf32>
    %204 = tpu.reciprocal %203 {approx = true} : vector<1x128xf32> -> vector<1x128xf32>
    %205 = vector.broadcast %204 : vector<1x128xf32> to vector<4x128xf32>
    %206 = arith.mulf %201, %205 : vector<4x128xf32>
    %207 = vector.extract_strided_slice %206 {offsets = [0, 0], sizes = [1, 128], strides = [1, 1]} : vector<4x128xf32> to vector<1x128xf32>
    %208 = vector.broadcast %207 : vector<1x128xf32> to vector<8x128xf32>
    %209 = arith.mulf %208, %34 : vector<8x128xf32>
    %210 = vector.extract_strided_slice %206 {offsets = [1, 0], sizes = [1, 128], strides = [1, 1]} : vector<4x128xf32> to vector<1x128xf32>
    %211 = vector.broadcast %210 : vector<1x128xf32> to vector<8x128xf32>
    %212 = arith.mulf %211, %43 : vector<8x128xf32>
    %213 = arith.addf %209, %212 : vector<8x128xf32>
    %214 = vector.extract_strided_slice %206 {offsets = [2, 0], sizes = [1, 128], strides = [1, 1]} : vector<4x128xf32> to vector<1x128xf32>
    %215 = vector.broadcast %214 : vector<1x128xf32> to vector<8x128xf32>
    %216 = arith.mulf %215, %52 : vector<8x128xf32>
    %217 = arith.addf %213, %216 : vector<8x128xf32>
    %218 = vector.extract_strided_slice %206 {offsets = [3, 0], sizes = [1, 128], strides = [1, 1]} : vector<4x128xf32> to vector<1x128xf32>
    %219 = vector.broadcast %218 : vector<1x128xf32> to vector<8x128xf32>
    %220 = arith.mulf %219, %61 : vector<8x128xf32>
    %221 = arith.addf %217, %220 : vector<8x128xf32>
    %cst_49 = arith.constant dense<0.000000e+00> : vector<8xf32>
    %222 = vector.multi_reduction <add>, %221, %cst_49 [1] : vector<8x128xf32> to vector<8xf32>
    %223 = vector.shape_cast %222 : vector<8xf32> to vector<8x1xf32>
    %224 = vector.broadcast %36 : vector<4x1xf32> to vector<4x4xf32>
    %225 = vector.broadcast %7 : vector<1x4xf32> to vector<4x4xf32>
    %226 = arith.mulf %224, %225 : vector<4x4xf32>
    %cst_50 = arith.constant 0.000000e+00 : f32
    %227 = vector.broadcast %cst_50 : f32 to vector<4x4xf32>
    %228 = arith.addf %227, %226 : vector<4x4xf32>
    %229 = vector.broadcast %45 : vector<4x1xf32> to vector<4x4xf32>
    %230 = vector.broadcast %12 : vector<1x4xf32> to vector<4x4xf32>
    %231 = arith.mulf %229, %230 : vector<4x4xf32>
    %232 = arith.addf %228, %231 : vector<4x4xf32>
    %233 = vector.broadcast %54 : vector<4x1xf32> to vector<4x4xf32>
    %234 = vector.broadcast %17 : vector<1x4xf32> to vector<4x4xf32>
    %235 = arith.mulf %233, %234 : vector<4x4xf32>
    %236 = arith.addf %232, %235 : vector<4x4xf32>
    %237 = vector.broadcast %63 : vector<4x1xf32> to vector<4x4xf32>
    %238 = vector.broadcast %22 : vector<1x4xf32> to vector<4x4xf32>
    %239 = arith.mulf %237, %238 : vector<4x4xf32>
    %240 = arith.addf %236, %239 : vector<4x4xf32>
    %241 = vector.broadcast %103 : vector<8x1xf32> to vector<8x4xf32>
    %242 = vector.broadcast %7 : vector<1x4xf32> to vector<8x4xf32>
    %243 = arith.mulf %241, %242 : vector<8x4xf32>
    %cst_51 = arith.constant 0.000000e+00 : f32
    %244 = vector.broadcast %cst_51 : f32 to vector<8x4xf32>
    %245 = arith.addf %244, %243 : vector<8x4xf32>
    %246 = vector.broadcast %143 : vector<8x1xf32> to vector<8x4xf32>
    %247 = vector.broadcast %12 : vector<1x4xf32> to vector<8x4xf32>
    %248 = arith.mulf %246, %247 : vector<8x4xf32>
    %249 = arith.addf %245, %248 : vector<8x4xf32>
    %250 = vector.broadcast %183 : vector<8x1xf32> to vector<8x4xf32>
    %251 = vector.broadcast %17 : vector<1x4xf32> to vector<8x4xf32>
    %252 = arith.mulf %250, %251 : vector<8x4xf32>
    %253 = arith.addf %249, %252 : vector<8x4xf32>
    %254 = vector.broadcast %223 : vector<8x1xf32> to vector<8x4xf32>
    %255 = vector.broadcast %22 : vector<1x4xf32> to vector<8x4xf32>
    %256 = arith.mulf %254, %255 : vector<8x4xf32>
    %257 = arith.addf %253, %256 : vector<8x4xf32>
    %c48 = arith.constant 48 : index
    %c0_52 = arith.constant 0 : index
    %258 = vector.load %arg4[%c48, %c0_52] : memref<696x128xf32, #tpu.memory_space<vmem>>, vector<32x4xf32>
    %cst_53 = arith.constant dense<0.000000e+00> : vector<32x4xf32>
    %259 = tpu.matmul %258, %240, %cst_53 {dimension_numbers = #tpu.dot_dimension_numbers<[1], [0], [0], [1], [0, 0, 1, 1], [], []>} : vector<32x4xf32>, vector<4x4xf32>, vector<32x4xf32> -> vector<32x4xf32>
    %c80 = arith.constant 80 : index
    %c0_54 = arith.constant 0 : index
    %260 = vector.load %arg4[%c80, %c0_54] : memref<696x128xf32, #tpu.memory_space<vmem>>, vector<32x8xf32>
    %cst_55 = arith.constant dense<0.000000e+00> : vector<32x4xf32>
    %261 = tpu.matmul %260, %257, %cst_55 {dimension_numbers = #tpu.dot_dimension_numbers<[1], [0], [0], [1], [0, 0, 1, 1], [], []>} : vector<32x8xf32>, vector<8x4xf32>, vector<32x4xf32> -> vector<32x4xf32>
    %262 = arith.addf %259, %261 : vector<32x4xf32>
    %c112 = arith.constant 112 : index
    %c0_56 = arith.constant 0 : index
    %263 = vector.load %arg4[%c112, %c0_56] : memref<696x128xf32, #tpu.memory_space<vmem>>, vector<24x3xf32>
    %c136 = arith.constant 136 : index
    %c0_57 = arith.constant 0 : index
    %264 = vector.load %arg4[%c136, %c0_57] : memref<696x128xf32, #tpu.memory_space<vmem>>, vector<24x1xf32>
    %265 = vector.shape_cast %264 : vector<24x1xf32> to vector<24x1xf32>
    %266 = vector.broadcast %265 : vector<24x1xf32> to vector<24x128xf32>
    %c0_58 = arith.constant 0 : index
    %c0_59 = arith.constant 0 : index
    %c0_60 = arith.constant 0 : index
    %267 = vector.load %arg2[%c0_58, %c0_59, %c0_60] : memref<4x3x128xf32, #tpu.memory_space<vmem>>, vector<1x3x128xf32>
    %268 = vector.shape_cast %267 : vector<1x3x128xf32> to vector<3x128xf32>
    %cst_61 = arith.constant dense<0.000000e+00> : vector<24x128xf32>
    %269 = tpu.matmul %263, %268, %cst_61 {dimension_numbers = #tpu.dot_dimension_numbers<[1], [0], [0], [1], [0, 0, 1, 1], [], []>} : vector<24x3xf32>, vector<3x128xf32>, vector<24x128xf32> -> vector<24x128xf32>
    %270 = arith.addf %269, %266 : vector<24x128xf32>
    %271 = vector.extract_strided_slice %270 {offsets = [0, 0], sizes = [8, 128], strides = [1, 1]} : vector<24x128xf32> to vector<8x128xf32>
    %272 = vector.extract_strided_slice %270 {offsets = [8, 0], sizes = [8, 128], strides = [1, 1]} : vector<24x128xf32> to vector<8x128xf32>
    %273 = vector.extract_strided_slice %270 {offsets = [16, 0], sizes = [8, 128], strides = [1, 1]} : vector<24x128xf32> to vector<8x128xf32>
    %cst_62 = arith.constant dense<0.000000e+00> : vector<3xf32>
    %274 = vector.multi_reduction <add>, %268, %cst_62 [1] : vector<3x128xf32> to vector<3xf32>
    %275 = vector.shape_cast %274 : vector<3xf32> to vector<3x1xf32>
    %c1_63 = arith.constant 1 : index
    %c0_64 = arith.constant 0 : index
    %c0_65 = arith.constant 0 : index
    %276 = vector.load %arg2[%c1_63, %c0_64, %c0_65] : memref<4x3x128xf32, #tpu.memory_space<vmem>>, vector<1x3x128xf32>
    %277 = vector.shape_cast %276 : vector<1x3x128xf32> to vector<3x128xf32>
    %cst_66 = arith.constant dense<0.000000e+00> : vector<24x128xf32>
    %278 = tpu.matmul %263, %277, %cst_66 {dimension_numbers = #tpu.dot_dimension_numbers<[1], [0], [0], [1], [0, 0, 1, 1], [], []>} : vector<24x3xf32>, vector<3x128xf32>, vector<24x128xf32> -> vector<24x128xf32>
    %279 = arith.addf %278, %266 : vector<24x128xf32>
    %280 = vector.extract_strided_slice %279 {offsets = [0, 0], sizes = [8, 128], strides = [1, 1]} : vector<24x128xf32> to vector<8x128xf32>
    %281 = vector.extract_strided_slice %279 {offsets = [8, 0], sizes = [8, 128], strides = [1, 1]} : vector<24x128xf32> to vector<8x128xf32>
    %282 = vector.extract_strided_slice %279 {offsets = [16, 0], sizes = [8, 128], strides = [1, 1]} : vector<24x128xf32> to vector<8x128xf32>
    %cst_67 = arith.constant dense<0.000000e+00> : vector<3xf32>
    %283 = vector.multi_reduction <add>, %277, %cst_67 [1] : vector<3x128xf32> to vector<3xf32>
    %284 = vector.shape_cast %283 : vector<3xf32> to vector<3x1xf32>
    %c2_68 = arith.constant 2 : index
    %c0_69 = arith.constant 0 : index
    %c0_70 = arith.constant 0 : index
    %285 = vector.load %arg2[%c2_68, %c0_69, %c0_70] : memref<4x3x128xf32, #tpu.memory_space<vmem>>, vector<1x3x128xf32>
    %286 = vector.shape_cast %285 : vector<1x3x128xf32> to vector<3x128xf32>
    %cst_71 = arith.constant dense<0.000000e+00> : vector<24x128xf32>
    %287 = tpu.matmul %263, %286, %cst_71 {dimension_numbers = #tpu.dot_dimension_numbers<[1], [0], [0], [1], [0, 0, 1, 1], [], []>} : vector<24x3xf32>, vector<3x128xf32>, vector<24x128xf32> -> vector<24x128xf32>
    %288 = arith.addf %287, %266 : vector<24x128xf32>
    %289 = vector.extract_strided_slice %288 {offsets = [0, 0], sizes = [8, 128], strides = [1, 1]} : vector<24x128xf32> to vector<8x128xf32>
    %290 = vector.extract_strided_slice %288 {offsets = [8, 0], sizes = [8, 128], strides = [1, 1]} : vector<24x128xf32> to vector<8x128xf32>
    %291 = vector.extract_strided_slice %288 {offsets = [16, 0], sizes = [8, 128], strides = [1, 1]} : vector<24x128xf32> to vector<8x128xf32>
    %cst_72 = arith.constant dense<0.000000e+00> : vector<3xf32>
    %292 = vector.multi_reduction <add>, %286, %cst_72 [1] : vector<3x128xf32> to vector<3xf32>
    %293 = vector.shape_cast %292 : vector<3xf32> to vector<3x1xf32>
    %c3_73 = arith.constant 3 : index
    %c0_74 = arith.constant 0 : index
    %c0_75 = arith.constant 0 : index
    %294 = vector.load %arg2[%c3_73, %c0_74, %c0_75] : memref<4x3x128xf32, #tpu.memory_space<vmem>>, vector<1x3x128xf32>
    %295 = vector.shape_cast %294 : vector<1x3x128xf32> to vector<3x128xf32>
    %cst_76 = arith.constant dense<0.000000e+00> : vector<24x128xf32>
    %296 = tpu.matmul %263, %295, %cst_76 {dimension_numbers = #tpu.dot_dimension_numbers<[1], [0], [0], [1], [0, 0, 1, 1], [], []>} : vector<24x3xf32>, vector<3x128xf32>, vector<24x128xf32> -> vector<24x128xf32>
    %297 = arith.addf %296, %266 : vector<24x128xf32>
    %298 = vector.extract_strided_slice %297 {offsets = [0, 0], sizes = [8, 128], strides = [1, 1]} : vector<24x128xf32> to vector<8x128xf32>
    %299 = vector.extract_strided_slice %297 {offsets = [8, 0], sizes = [8, 128], strides = [1, 1]} : vector<24x128xf32> to vector<8x128xf32>
    %300 = vector.extract_strided_slice %297 {offsets = [16, 0], sizes = [8, 128], strides = [1, 1]} : vector<24x128xf32> to vector<8x128xf32>
    %cst_77 = arith.constant dense<0.000000e+00> : vector<3xf32>
    %301 = vector.multi_reduction <add>, %295, %cst_77 [1] : vector<3x128xf32> to vector<3xf32>
    %302 = vector.shape_cast %301 : vector<3xf32> to vector<3x1xf32>
    %303 = arith.mulf %271, %272 : vector<8x128xf32>
    %cst_78 = arith.constant dense<0.000000e+00> : vector<128xf32>
    %304 = vector.multi_reduction <add>, %303, %cst_78 [0] : vector<8x128xf32> to vector<128xf32>
    %305 = vector.shape_cast %304 : vector<128xf32> to vector<1x128xf32>
    %306 = arith.mulf %271, %281 : vector<8x128xf32>
    %cst_79 = arith.constant dense<0.000000e+00> : vector<128xf32>
    %307 = vector.multi_reduction <add>, %306, %cst_79 [0] : vector<8x128xf32> to vector<128xf32>
    %308 = vector.shape_cast %307 : vector<128xf32> to vector<1x128xf32>
    %309 = arith.mulf %271, %290 : vector<8x128xf32>
    %cst_80 = arith.constant dense<0.000000e+00> : vector<128xf32>
    %310 = vector.multi_reduction <add>, %309, %cst_80 [0] : vector<8x128xf32> to vector<128xf32>
    %311 = vector.shape_cast %310 : vector<128xf32> to vector<1x128xf32>
    %312 = arith.mulf %271, %299 : vector<8x128xf32>
    %cst_81 = arith.constant dense<0.000000e+00> : vector<128xf32>
    %313 = vector.multi_reduction <add>, %312, %cst_81 [0] : vector<8x128xf32> to vector<128xf32>
    %314 = vector.shape_cast %313 : vector<128xf32> to vector<1x128xf32>
    %315 = tpu.concatenate %305, %308, %311, %314 in 0 : vector<1x128xf32>, vector<1x128xf32>, vector<1x128xf32>, vector<1x128xf32> -> vector<4x128xf32>
    %cst_82 = arith.constant dense<0xFF800000> : vector<128xf32>
    %316 = vector.multi_reduction <maximumf>, %315, %cst_82 [0] : vector<4x128xf32> to vector<128xf32>
    %317 = vector.shape_cast %316 : vector<128xf32> to vector<1x128xf32>
    %318 = vector.broadcast %317 : vector<1x128xf32> to vector<4x128xf32>
    %319 = arith.subf %315, %318 : vector<4x128xf32>
    %320 = math.exp %319 : vector<4x128xf32>
    %cst_83 = arith.constant dense<0.000000e+00> : vector<128xf32>
    %321 = vector.multi_reduction <add>, %320, %cst_83 [0] : vector<4x128xf32> to vector<128xf32>
    %322 = vector.shape_cast %321 : vector<128xf32> to vector<1x128xf32>
    %323 = tpu.reciprocal %322 {approx = true} : vector<1x128xf32> -> vector<1x128xf32>
    %324 = vector.broadcast %323 : vector<1x128xf32> to vector<4x128xf32>
    %325 = arith.mulf %320, %324 : vector<4x128xf32>
    %326 = vector.extract_strided_slice %325 {offsets = [0, 0], sizes = [1, 128], strides = [1, 1]} : vector<4x128xf32> to vector<1x128xf32>
    %327 = vector.broadcast %326 : vector<1x128xf32> to vector<8x128xf32>
    %328 = arith.mulf %327, %273 : vector<8x128xf32>
    %329 = vector.extract_strided_slice %325 {offsets = [1, 0], sizes = [1, 128], strides = [1, 1]} : vector<4x128xf32> to vector<1x128xf32>
    %330 = vector.broadcast %329 : vector<1x128xf32> to vector<8x128xf32>
    %331 = arith.mulf %330, %282 : vector<8x128xf32>
    %332 = arith.addf %328, %331 : vector<8x128xf32>
    %333 = vector.extract_strided_slice %325 {offsets = [2, 0], sizes = [1, 128], strides = [1, 1]} : vector<4x128xf32> to vector<1x128xf32>
    %334 = vector.broadcast %333 : vector<1x128xf32> to vector<8x128xf32>
    %335 = arith.mulf %334, %291 : vector<8x128xf32>
    %336 = arith.addf %332, %335 : vector<8x128xf32>
    %337 = vector.extract_strided_slice %325 {offsets = [3, 0], sizes = [1, 128], strides = [1, 1]} : vector<4x128xf32> to vector<1x128xf32>
    %338 = vector.broadcast %337 : vector<1x128xf32> to vector<8x128xf32>
    %339 = arith.mulf %338, %300 : vector<8x128xf32>
    %340 = arith.addf %336, %339 : vector<8x128xf32>
    %cst_84 = arith.constant dense<0.000000e+00> : vector<8xf32>
    %341 = vector.multi_reduction <add>, %340, %cst_84 [1] : vector<8x128xf32> to vector<8xf32>
    %342 = vector.shape_cast %341 : vector<8xf32> to vector<8x1xf32>
    %343 = arith.mulf %280, %272 : vector<8x128xf32>
    %cst_85 = arith.constant dense<0.000000e+00> : vector<128xf32>
    %344 = vector.multi_reduction <add>, %343, %cst_85 [0] : vector<8x128xf32> to vector<128xf32>
    %345 = vector.shape_cast %344 : vector<128xf32> to vector<1x128xf32>
    %346 = arith.mulf %280, %281 : vector<8x128xf32>
    %cst_86 = arith.constant dense<0.000000e+00> : vector<128xf32>
    %347 = vector.multi_reduction <add>, %346, %cst_86 [0] : vector<8x128xf32> to vector<128xf32>
    %348 = vector.shape_cast %347 : vector<128xf32> to vector<1x128xf32>
    %349 = arith.mulf %280, %290 : vector<8x128xf32>
    %cst_87 = arith.constant dense<0.000000e+00> : vector<128xf32>
    %350 = vector.multi_reduction <add>, %349, %cst_87 [0] : vector<8x128xf32> to vector<128xf32>
    %351 = vector.shape_cast %350 : vector<128xf32> to vector<1x128xf32>
    %352 = arith.mulf %280, %299 : vector<8x128xf32>
    %cst_88 = arith.constant dense<0.000000e+00> : vector<128xf32>
    %353 = vector.multi_reduction <add>, %352, %cst_88 [0] : vector<8x128xf32> to vector<128xf32>
    %354 = vector.shape_cast %353 : vector<128xf32> to vector<1x128xf32>
    %355 = tpu.concatenate %345, %348, %351, %354 in 0 : vector<1x128xf32>, vector<1x128xf32>, vector<1x128xf32>, vector<1x128xf32> -> vector<4x128xf32>
    %cst_89 = arith.constant dense<0xFF800000> : vector<128xf32>
    %356 = vector.multi_reduction <maximumf>, %355, %cst_89 [0] : vector<4x128xf32> to vector<128xf32>
    %357 = vector.shape_cast %356 : vector<128xf32> to vector<1x128xf32>
    %358 = vector.broadcast %357 : vector<1x128xf32> to vector<4x128xf32>
    %359 = arith.subf %355, %358 : vector<4x128xf32>
    %360 = math.exp %359 : vector<4x128xf32>
    %cst_90 = arith.constant dense<0.000000e+00> : vector<128xf32>
    %361 = vector.multi_reduction <add>, %360, %cst_90 [0] : vector<4x128xf32> to vector<128xf32>
    %362 = vector.shape_cast %361 : vector<128xf32> to vector<1x128xf32>
    %363 = tpu.reciprocal %362 {approx = true} : vector<1x128xf32> -> vector<1x128xf32>
    %364 = vector.broadcast %363 : vector<1x128xf32> to vector<4x128xf32>
    %365 = arith.mulf %360, %364 : vector<4x128xf32>
    %366 = vector.extract_strided_slice %365 {offsets = [0, 0], sizes = [1, 128], strides = [1, 1]} : vector<4x128xf32> to vector<1x128xf32>
    %367 = vector.broadcast %366 : vector<1x128xf32> to vector<8x128xf32>
    %368 = arith.mulf %367, %273 : vector<8x128xf32>
    %369 = vector.extract_strided_slice %365 {offsets = [1, 0], sizes = [1, 128], strides = [1, 1]} : vector<4x128xf32> to vector<1x128xf32>
    %370 = vector.broadcast %369 : vector<1x128xf32> to vector<8x128xf32>
    %371 = arith.mulf %370, %282 : vector<8x128xf32>
    %372 = arith.addf %368, %371 : vector<8x128xf32>
    %373 = vector.extract_strided_slice %365 {offsets = [2, 0], sizes = [1, 128], strides = [1, 1]} : vector<4x128xf32> to vector<1x128xf32>
    %374 = vector.broadcast %373 : vector<1x128xf32> to vector<8x128xf32>
    %375 = arith.mulf %374, %291 : vector<8x128xf32>
    %376 = arith.addf %372, %375 : vector<8x128xf32>
    %377 = vector.extract_strided_slice %365 {offsets = [3, 0], sizes = [1, 128], strides = [1, 1]} : vector<4x128xf32> to vector<1x128xf32>
    %378 = vector.broadcast %377 : vector<1x128xf32> to vector<8x128xf32>
    %379 = arith.mulf %378, %300 : vector<8x128xf32>
    %380 = arith.addf %376, %379 : vector<8x128xf32>
    %cst_91 = arith.constant dense<0.000000e+00> : vector<8xf32>
    %381 = vector.multi_reduction <add>, %380, %cst_91 [1] : vector<8x128xf32> to vector<8xf32>
    %382 = vector.shape_cast %381 : vector<8xf32> to vector<8x1xf32>
    %383 = arith.mulf %289, %272 : vector<8x128xf32>
    %cst_92 = arith.constant dense<0.000000e+00> : vector<128xf32>
    %384 = vector.multi_reduction <add>, %383, %cst_92 [0] : vector<8x128xf32> to vector<128xf32>
    %385 = vector.shape_cast %384 : vector<128xf32> to vector<1x128xf32>
    %386 = arith.mulf %289, %281 : vector<8x128xf32>
    %cst_93 = arith.constant dense<0.000000e+00> : vector<128xf32>
    %387 = vector.multi_reduction <add>, %386, %cst_93 [0] : vector<8x128xf32> to vector<128xf32>
    %388 = vector.shape_cast %387 : vector<128xf32> to vector<1x128xf32>
    %389 = arith.mulf %289, %290 : vector<8x128xf32>
    %cst_94 = arith.constant dense<0.000000e+00> : vector<128xf32>
    %390 = vector.multi_reduction <add>, %389, %cst_94 [0] : vector<8x128xf32> to vector<128xf32>
    %391 = vector.shape_cast %390 : vector<128xf32> to vector<1x128xf32>
    %392 = arith.mulf %289, %299 : vector<8x128xf32>
    %cst_95 = arith.constant dense<0.000000e+00> : vector<128xf32>
    %393 = vector.multi_reduction <add>, %392, %cst_95 [0] : vector<8x128xf32> to vector<128xf32>
    %394 = vector.shape_cast %393 : vector<128xf32> to vector<1x128xf32>
    %395 = tpu.concatenate %385, %388, %391, %394 in 0 : vector<1x128xf32>, vector<1x128xf32>, vector<1x128xf32>, vector<1x128xf32> -> vector<4x128xf32>
    %cst_96 = arith.constant dense<0xFF800000> : vector<128xf32>
    %396 = vector.multi_reduction <maximumf>, %395, %cst_96 [0] : vector<4x128xf32> to vector<128xf32>
    %397 = vector.shape_cast %396 : vector<128xf32> to vector<1x128xf32>
    %398 = vector.broadcast %397 : vector<1x128xf32> to vector<4x128xf32>
    %399 = arith.subf %395, %398 : vector<4x128xf32>
    %400 = math.exp %399 : vector<4x128xf32>
    %cst_97 = arith.constant dense<0.000000e+00> : vector<128xf32>
    %401 = vector.multi_reduction <add>, %400, %cst_97 [0] : vector<4x128xf32> to vector<128xf32>
    %402 = vector.shape_cast %401 : vector<128xf32> to vector<1x128xf32>
    %403 = tpu.reciprocal %402 {approx = true} : vector<1x128xf32> -> vector<1x128xf32>
    %404 = vector.broadcast %403 : vector<1x128xf32> to vector<4x128xf32>
    %405 = arith.mulf %400, %404 : vector<4x128xf32>
    %406 = vector.extract_strided_slice %405 {offsets = [0, 0], sizes = [1, 128], strides = [1, 1]} : vector<4x128xf32> to vector<1x128xf32>
    %407 = vector.broadcast %406 : vector<1x128xf32> to vector<8x128xf32>
    %408 = arith.mulf %407, %273 : vector<8x128xf32>
    %409 = vector.extract_strided_slice %405 {offsets = [1, 0], sizes = [1, 128], strides = [1, 1]} : vector<4x128xf32> to vector<1x128xf32>
    %410 = vector.broadcast %409 : vector<1x128xf32> to vector<8x128xf32>
    %411 = arith.mulf %410, %282 : vector<8x128xf32>
    %412 = arith.addf %408, %411 : vector<8x128xf32>
    %413 = vector.extract_strided_slice %405 {offsets = [2, 0], sizes = [1, 128], strides = [1, 1]} : vector<4x128xf32> to vector<1x128xf32>
    %414 = vector.broadcast %413 : vector<1x128xf32> to vector<8x128xf32>
    %415 = arith.mulf %414, %291 : vector<8x128xf32>
    %416 = arith.addf %412, %415 : vector<8x128xf32>
    %417 = vector.extract_strided_slice %405 {offsets = [3, 0], sizes = [1, 128], strides = [1, 1]} : vector<4x128xf32> to vector<1x128xf32>
    %418 = vector.broadcast %417 : vector<1x128xf32> to vector<8x128xf32>
    %419 = arith.mulf %418, %300 : vector<8x128xf32>
    %420 = arith.addf %416, %419 : vector<8x128xf32>
    %cst_98 = arith.constant dense<0.000000e+00> : vector<8xf32>
    %421 = vector.multi_reduction <add>, %420, %cst_98 [1] : vector<8x128xf32> to vector<8xf32>
    %422 = vector.shape_cast %421 : vector<8xf32> to vector<8x1xf32>
    %423 = arith.mulf %298, %272 : vector<8x128xf32>
    %cst_99 = arith.constant dense<0.000000e+00> : vector<128xf32>
    %424 = vector.multi_reduction <add>, %423, %cst_99 [0] : vector<8x128xf32> to vector<128xf32>
    %425 = vector.shape_cast %424 : vector<128xf32> to vector<1x128xf32>
    %426 = arith.mulf %298, %281 : vector<8x128xf32>
    %cst_100 = arith.constant dense<0.000000e+00> : vector<128xf32>
    %427 = vector.multi_reduction <add>, %426, %cst_100 [0] : vector<8x128xf32> to vector<128xf32>
    %428 = vector.shape_cast %427 : vector<128xf32> to vector<1x128xf32>
    %429 = arith.mulf %298, %290 : vector<8x128xf32>
    %cst_101 = arith.constant dense<0.000000e+00> : vector<128xf32>
    %430 = vector.multi_reduction <add>, %429, %cst_101 [0] : vector<8x128xf32> to vector<128xf32>
    %431 = vector.shape_cast %430 : vector<128xf32> to vector<1x128xf32>
    %432 = arith.mulf %298, %299 : vector<8x128xf32>
    %cst_102 = arith.constant dense<0.000000e+00> : vector<128xf32>
    %433 = vector.multi_reduction <add>, %432, %cst_102 [0] : vector<8x128xf32> to vector<128xf32>
    %434 = vector.shape_cast %433 : vector<128xf32> to vector<1x128xf32>
    %435 = tpu.concatenate %425, %428, %431, %434 in 0 : vector<1x128xf32>, vector<1x128xf32>, vector<1x128xf32>, vector<1x128xf32> -> vector<4x128xf32>
    %cst_103 = arith.constant dense<0xFF800000> : vector<128xf32>
    %436 = vector.multi_reduction <maximumf>, %435, %cst_103 [0] : vector<4x128xf32> to vector<128xf32>
    %437 = vector.shape_cast %436 : vector<128xf32> to vector<1x128xf32>
    %438 = vector.broadcast %437 : vector<1x128xf32> to vector<4x128xf32>
    %439 = arith.subf %435, %438 : vector<4x128xf32>
    %440 = math.exp %439 : vector<4x128xf32>
    %cst_104 = arith.constant dense<0.000000e+00> : vector<128xf32>
    %441 = vector.multi_reduction <add>, %440, %cst_104 [0] : vector<4x128xf32> to vector<128xf32>
    %442 = vector.shape_cast %441 : vector<128xf32> to vector<1x128xf32>
    %443 = tpu.reciprocal %442 {approx = true} : vector<1x128xf32> -> vector<1x128xf32>
    %444 = vector.broadcast %443 : vector<1x128xf32> to vector<4x128xf32>
    %445 = arith.mulf %440, %444 : vector<4x128xf32>
    %446 = vector.extract_strided_slice %445 {offsets = [0, 0], sizes = [1, 128], strides = [1, 1]} : vector<4x128xf32> to vector<1x128xf32>
    %447 = vector.broadcast %446 : vector<1x128xf32> to vector<8x128xf32>
    %448 = arith.mulf %447, %273 : vector<8x128xf32>
    %449 = vector.extract_strided_slice %445 {offsets = [1, 0], sizes = [1, 128], strides = [1, 1]} : vector<4x128xf32> to vector<1x128xf32>
    %450 = vector.broadcast %449 : vector<1x128xf32> to vector<8x128xf32>
    %451 = arith.mulf %450, %282 : vector<8x128xf32>
    %452 = arith.addf %448, %451 : vector<8x128xf32>
    %453 = vector.extract_strided_slice %445 {offsets = [2, 0], sizes = [1, 128], strides = [1, 1]} : vector<4x128xf32> to vector<1x128xf32>
    %454 = vector.broadcast %453 : vector<1x128xf32> to vector<8x128xf32>
    %455 = arith.mulf %454, %291 : vector<8x128xf32>
    %456 = arith.addf %452, %455 : vector<8x128xf32>
    %457 = vector.extract_strided_slice %445 {offsets = [3, 0], sizes = [1, 128], strides = [1, 1]} : vector<4x128xf32> to vector<1x128xf32>
    %458 = vector.broadcast %457 : vector<1x128xf32> to vector<8x128xf32>
    %459 = arith.mulf %458, %300 : vector<8x128xf32>
    %460 = arith.addf %456, %459 : vector<8x128xf32>
    %cst_105 = arith.constant dense<0.000000e+00> : vector<8xf32>
    %461 = vector.multi_reduction <add>, %460, %cst_105 [1] : vector<8x128xf32> to vector<8xf32>
    %462 = vector.shape_cast %461 : vector<8xf32> to vector<8x1xf32>
    %463 = vector.broadcast %275 : vector<3x1xf32> to vector<3x4xf32>
    %464 = vector.broadcast %7 : vector<1x4xf32> to vector<3x4xf32>
    %465 = arith.mulf %463, %464 : vector<3x4xf32>
    %cst_106 = arith.constant 0.000000e+00 : f32
    %466 = vector.broadcast %cst_106 : f32 to vector<3x4xf32>
    %467 = arith.addf %466, %465 : vector<3x4xf32>
    %468 = vector.broadcast %284 : vector<3x1xf32> to vector<3x4xf32>
    %469 = vector.broadcast %12 : vector<1x4xf32> to vector<3x4xf32>
    %470 = arith.mulf %468, %469 : vector<3x4xf32>
    %471 = arith.addf %467, %470 : vector<3x4xf32>
    %472 = vector.broadcast %293 : vector<3x1xf32> to vector<3x4xf32>
    %473 = vector.broadcast %17 : vector<1x4xf32> to vector<3x4xf32>
    %474 = arith.mulf %472, %473 : vector<3x4xf32>
    %475 = arith.addf %471, %474 : vector<3x4xf32>
    %476 = vector.broadcast %302 : vector<3x1xf32> to vector<3x4xf32>
    %477 = vector.broadcast %22 : vector<1x4xf32> to vector<3x4xf32>
    %478 = arith.mulf %476, %477 : vector<3x4xf32>
    %479 = arith.addf %475, %478 : vector<3x4xf32>
    %480 = vector.broadcast %342 : vector<8x1xf32> to vector<8x4xf32>
    %481 = vector.broadcast %7 : vector<1x4xf32> to vector<8x4xf32>
    %482 = arith.mulf %480, %481 : vector<8x4xf32>
    %cst_107 = arith.constant 0.000000e+00 : f32
    %483 = vector.broadcast %cst_107 : f32 to vector<8x4xf32>
    %484 = arith.addf %483, %482 : vector<8x4xf32>
    %485 = vector.broadcast %382 : vector<8x1xf32> to vector<8x4xf32>
    %486 = vector.broadcast %12 : vector<1x4xf32> to vector<8x4xf32>
    %487 = arith.mulf %485, %486 : vector<8x4xf32>
    %488 = arith.addf %484, %487 : vector<8x4xf32>
    %489 = vector.broadcast %422 : vector<8x1xf32> to vector<8x4xf32>
    %490 = vector.broadcast %17 : vector<1x4xf32> to vector<8x4xf32>
    %491 = arith.mulf %489, %490 : vector<8x4xf32>
    %492 = arith.addf %488, %491 : vector<8x4xf32>
    %493 = vector.broadcast %462 : vector<8x1xf32> to vector<8x4xf32>
    %494 = vector.broadcast %22 : vector<1x4xf32> to vector<8x4xf32>
    %495 = arith.mulf %493, %494 : vector<8x4xf32>
    %496 = arith.addf %492, %495 : vector<8x4xf32>
    %c160 = arith.constant 160 : index
    %c0_108 = arith.constant 0 : index
    %497 = vector.load %arg4[%c160, %c0_108] : memref<696x128xf32, #tpu.memory_space<vmem>>, vector<32x3xf32>
    %cst_109 = arith.constant dense<0.000000e+00> : vector<32x4xf32>
    %498 = tpu.matmul %497, %479, %cst_109 {dimension_numbers = #tpu.dot_dimension_numbers<[1], [0], [0], [1], [0, 0, 1, 1], [], []>} : vector<32x3xf32>, vector<3x4xf32>, vector<32x4xf32> -> vector<32x4xf32>
    %c192 = arith.constant 192 : index
    %c0_110 = arith.constant 0 : index
    %499 = vector.load %arg4[%c192, %c0_110] : memref<696x128xf32, #tpu.memory_space<vmem>>, vector<32x8xf32>
    %cst_111 = arith.constant dense<0.000000e+00> : vector<32x4xf32>
    %500 = tpu.matmul %499, %496, %cst_111 {dimension_numbers = #tpu.dot_dimension_numbers<[1], [0], [0], [1], [0, 0, 1, 1], [], []>} : vector<32x8xf32>, vector<8x4xf32>, vector<32x4xf32> -> vector<32x4xf32>
    %501 = arith.addf %498, %500 : vector<32x4xf32>
    %502 = arith.addf %262, %501 : vector<32x4xf32>
    %c224 = arith.constant 224 : index
    %c0_112 = arith.constant 0 : index
    %503 = vector.load %arg4[%c224, %c0_112] : memref<696x128xf32, #tpu.memory_space<vmem>>, vector<144x41xf32>
    %c368 = arith.constant 368 : index
    %c0_113 = arith.constant 0 : index
    %504 = vector.load %arg4[%c368, %c0_113] : memref<696x128xf32, #tpu.memory_space<vmem>>, vector<144x1xf32>
    %505 = vector.shape_cast %504 : vector<144x1xf32> to vector<144x1xf32>
    %506 = vector.broadcast %505 : vector<144x1xf32> to vector<144x128xf32>
    %c0_114 = arith.constant 0 : index
    %c0_115 = arith.constant 0 : index
    %c0_116 = arith.constant 0 : index
    %507 = vector.load %arg3[%c0_114, %c0_115, %c0_116] : memref<4x41x128xf32, #tpu.memory_space<vmem>>, vector<1x41x128xf32>
    %508 = vector.shape_cast %507 : vector<1x41x128xf32> to vector<41x128xf32>
    %cst_117 = arith.constant dense<0.000000e+00> : vector<144x128xf32>
    %509 = tpu.matmul %503, %508, %cst_117 {dimension_numbers = #tpu.dot_dimension_numbers<[1], [0], [0], [1], [0, 0, 1, 1], [], []>} : vector<144x41xf32>, vector<41x128xf32>, vector<144x128xf32> -> vector<144x128xf32>
    %510 = arith.addf %509, %506 : vector<144x128xf32>
    %511 = vector.extract_strided_slice %510 {offsets = [0, 0], sizes = [48, 128], strides = [1, 1]} : vector<144x128xf32> to vector<48x128xf32>
    %512 = vector.extract_strided_slice %510 {offsets = [48, 0], sizes = [48, 128], strides = [1, 1]} : vector<144x128xf32> to vector<48x128xf32>
    %513 = vector.extract_strided_slice %510 {offsets = [96, 0], sizes = [48, 128], strides = [1, 1]} : vector<144x128xf32> to vector<48x128xf32>
    %cst_118 = arith.constant dense<0.000000e+00> : vector<41xf32>
    %514 = vector.multi_reduction <add>, %508, %cst_118 [1] : vector<41x128xf32> to vector<41xf32>
    %515 = vector.shape_cast %514 : vector<41xf32> to vector<41x1xf32>
    %c1_119 = arith.constant 1 : index
    %c0_120 = arith.constant 0 : index
    %c0_121 = arith.constant 0 : index
    %516 = vector.load %arg3[%c1_119, %c0_120, %c0_121] : memref<4x41x128xf32, #tpu.memory_space<vmem>>, vector<1x41x128xf32>
    %517 = vector.shape_cast %516 : vector<1x41x128xf32> to vector<41x128xf32>
    %cst_122 = arith.constant dense<0.000000e+00> : vector<144x128xf32>
    %518 = tpu.matmul %503, %517, %cst_122 {dimension_numbers = #tpu.dot_dimension_numbers<[1], [0], [0], [1], [0, 0, 1, 1], [], []>} : vector<144x41xf32>, vector<41x128xf32>, vector<144x128xf32> -> vector<144x128xf32>
    %519 = arith.addf %518, %506 : vector<144x128xf32>
    %520 = vector.extract_strided_slice %519 {offsets = [0, 0], sizes = [48, 128], strides = [1, 1]} : vector<144x128xf32> to vector<48x128xf32>
    %521 = vector.extract_strided_slice %519 {offsets = [48, 0], sizes = [48, 128], strides = [1, 1]} : vector<144x128xf32> to vector<48x128xf32>
    %522 = vector.extract_strided_slice %519 {offsets = [96, 0], sizes = [48, 128], strides = [1, 1]} : vector<144x128xf32> to vector<48x128xf32>
    %cst_123 = arith.constant dense<0.000000e+00> : vector<41xf32>
    %523 = vector.multi_reduction <add>, %517, %cst_123 [1] : vector<41x128xf32> to vector<41xf32>
    %524 = vector.shape_cast %523 : vector<41xf32> to vector<41x1xf32>
    %c2_124 = arith.constant 2 : index
    %c0_125 = arith.constant 0 : index
    %c0_126 = arith.constant 0 : index
    %525 = vector.load %arg3[%c2_124, %c0_125, %c0_126] : memref<4x41x128xf32, #tpu.memory_space<vmem>>, vector<1x41x128xf32>
    %526 = vector.shape_cast %525 : vector<1x41x128xf32> to vector<41x128xf32>
    %cst_127 = arith.constant dense<0.000000e+00> : vector<144x128xf32>
    %527 = tpu.matmul %503, %526, %cst_127 {dimension_numbers = #tpu.dot_dimension_numbers<[1], [0], [0], [1], [0, 0, 1, 1], [], []>} : vector<144x41xf32>, vector<41x128xf32>, vector<144x128xf32> -> vector<144x128xf32>
    %528 = arith.addf %527, %506 : vector<144x128xf32>
    %529 = vector.extract_strided_slice %528 {offsets = [0, 0], sizes = [48, 128], strides = [1, 1]} : vector<144x128xf32> to vector<48x128xf32>
    %530 = vector.extract_strided_slice %528 {offsets = [48, 0], sizes = [48, 128], strides = [1, 1]} : vector<144x128xf32> to vector<48x128xf32>
    %531 = vector.extract_strided_slice %528 {offsets = [96, 0], sizes = [48, 128], strides = [1, 1]} : vector<144x128xf32> to vector<48x128xf32>
    %cst_128 = arith.constant dense<0.000000e+00> : vector<41xf32>
    %532 = vector.multi_reduction <add>, %526, %cst_128 [1] : vector<41x128xf32> to vector<41xf32>
    %533 = vector.shape_cast %532 : vector<41xf32> to vector<41x1xf32>
    %c3_129 = arith.constant 3 : index
    %c0_130 = arith.constant 0 : index
    %c0_131 = arith.constant 0 : index
    %534 = vector.load %arg3[%c3_129, %c0_130, %c0_131] : memref<4x41x128xf32, #tpu.memory_space<vmem>>, vector<1x41x128xf32>
    %535 = vector.shape_cast %534 : vector<1x41x128xf32> to vector<41x128xf32>
    %cst_132 = arith.constant dense<0.000000e+00> : vector<144x128xf32>
    %536 = tpu.matmul %503, %535, %cst_132 {dimension_numbers = #tpu.dot_dimension_numbers<[1], [0], [0], [1], [0, 0, 1, 1], [], []>} : vector<144x41xf32>, vector<41x128xf32>, vector<144x128xf32> -> vector<144x128xf32>
    %537 = arith.addf %536, %506 : vector<144x128xf32>
    %538 = vector.extract_strided_slice %537 {offsets = [0, 0], sizes = [48, 128], strides = [1, 1]} : vector<144x128xf32> to vector<48x128xf32>
    %539 = vector.extract_strided_slice %537 {offsets = [48, 0], sizes = [48, 128], strides = [1, 1]} : vector<144x128xf32> to vector<48x128xf32>
    %540 = vector.extract_strided_slice %537 {offsets = [96, 0], sizes = [48, 128], strides = [1, 1]} : vector<144x128xf32> to vector<48x128xf32>
    %cst_133 = arith.constant dense<0.000000e+00> : vector<41xf32>
    %541 = vector.multi_reduction <add>, %535, %cst_133 [1] : vector<41x128xf32> to vector<41xf32>
    %542 = vector.shape_cast %541 : vector<41xf32> to vector<41x1xf32>
    %543 = arith.mulf %511, %512 : vector<48x128xf32>
    %cst_134 = arith.constant dense<0.000000e+00> : vector<128xf32>
    %544 = vector.multi_reduction <add>, %543, %cst_134 [0] : vector<48x128xf32> to vector<128xf32>
    %545 = vector.shape_cast %544 : vector<128xf32> to vector<1x128xf32>
    %546 = arith.mulf %511, %521 : vector<48x128xf32>
    %cst_135 = arith.constant dense<0.000000e+00> : vector<128xf32>
    %547 = vector.multi_reduction <add>, %546, %cst_135 [0] : vector<48x128xf32> to vector<128xf32>
    %548 = vector.shape_cast %547 : vector<128xf32> to vector<1x128xf32>
    %549 = arith.mulf %511, %530 : vector<48x128xf32>
    %cst_136 = arith.constant dense<0.000000e+00> : vector<128xf32>
    %550 = vector.multi_reduction <add>, %549, %cst_136 [0] : vector<48x128xf32> to vector<128xf32>
    %551 = vector.shape_cast %550 : vector<128xf32> to vector<1x128xf32>
    %552 = arith.mulf %511, %539 : vector<48x128xf32>
    %cst_137 = arith.constant dense<0.000000e+00> : vector<128xf32>
    %553 = vector.multi_reduction <add>, %552, %cst_137 [0] : vector<48x128xf32> to vector<128xf32>
    %554 = vector.shape_cast %553 : vector<128xf32> to vector<1x128xf32>
    %555 = tpu.concatenate %545, %548, %551, %554 in 0 : vector<1x128xf32>, vector<1x128xf32>, vector<1x128xf32>, vector<1x128xf32> -> vector<4x128xf32>
    %cst_138 = arith.constant dense<0xFF800000> : vector<128xf32>
    %556 = vector.multi_reduction <maximumf>, %555, %cst_138 [0] : vector<4x128xf32> to vector<128xf32>
    %557 = vector.shape_cast %556 : vector<128xf32> to vector<1x128xf32>
    %558 = vector.broadcast %557 : vector<1x128xf32> to vector<4x128xf32>
    %559 = arith.subf %555, %558 : vector<4x128xf32>
    %560 = math.exp %559 : vector<4x128xf32>
    %cst_139 = arith.constant dense<0.000000e+00> : vector<128xf32>
    %561 = vector.multi_reduction <add>, %560, %cst_139 [0] : vector<4x128xf32> to vector<128xf32>
    %562 = vector.shape_cast %561 : vector<128xf32> to vector<1x128xf32>
    %563 = tpu.reciprocal %562 {approx = true} : vector<1x128xf32> -> vector<1x128xf32>
    %564 = vector.broadcast %563 : vector<1x128xf32> to vector<4x128xf32>
    %565 = arith.mulf %560, %564 : vector<4x128xf32>
    %566 = vector.extract_strided_slice %565 {offsets = [0, 0], sizes = [1, 128], strides = [1, 1]} : vector<4x128xf32> to vector<1x128xf32>
    %567 = vector.broadcast %566 : vector<1x128xf32> to vector<48x128xf32>
    %568 = arith.mulf %567, %513 : vector<48x128xf32>
    %569 = vector.extract_strided_slice %565 {offsets = [1, 0], sizes = [1, 128], strides = [1, 1]} : vector<4x128xf32> to vector<1x128xf32>
    %570 = vector.broadcast %569 : vector<1x128xf32> to vector<48x128xf32>
    %571 = arith.mulf %570, %522 : vector<48x128xf32>
    %572 = arith.addf %568, %571 : vector<48x128xf32>
    %573 = vector.extract_strided_slice %565 {offsets = [2, 0], sizes = [1, 128], strides = [1, 1]} : vector<4x128xf32> to vector<1x128xf32>
    %574 = vector.broadcast %573 : vector<1x128xf32> to vector<48x128xf32>
    %575 = arith.mulf %574, %531 : vector<48x128xf32>
    %576 = arith.addf %572, %575 : vector<48x128xf32>
    %577 = vector.extract_strided_slice %565 {offsets = [3, 0], sizes = [1, 128], strides = [1, 1]} : vector<4x128xf32> to vector<1x128xf32>
    %578 = vector.broadcast %577 : vector<1x128xf32> to vector<48x128xf32>
    %579 = arith.mulf %578, %540 : vector<48x128xf32>
    %580 = arith.addf %576, %579 : vector<48x128xf32>
    %cst_140 = arith.constant dense<0.000000e+00> : vector<48xf32>
    %581 = vector.multi_reduction <add>, %580, %cst_140 [1] : vector<48x128xf32> to vector<48xf32>
    %582 = vector.shape_cast %581 : vector<48xf32> to vector<48x1xf32>
    %583 = arith.mulf %520, %512 : vector<48x128xf32>
    %cst_141 = arith.constant dense<0.000000e+00> : vector<128xf32>
    %584 = vector.multi_reduction <add>, %583, %cst_141 [0] : vector<48x128xf32> to vector<128xf32>
    %585 = vector.shape_cast %584 : vector<128xf32> to vector<1x128xf32>
    %586 = arith.mulf %520, %521 : vector<48x128xf32>
    %cst_142 = arith.constant dense<0.000000e+00> : vector<128xf32>
    %587 = vector.multi_reduction <add>, %586, %cst_142 [0] : vector<48x128xf32> to vector<128xf32>
    %588 = vector.shape_cast %587 : vector<128xf32> to vector<1x128xf32>
    %589 = arith.mulf %520, %530 : vector<48x128xf32>
    %cst_143 = arith.constant dense<0.000000e+00> : vector<128xf32>
    %590 = vector.multi_reduction <add>, %589, %cst_143 [0] : vector<48x128xf32> to vector<128xf32>
    %591 = vector.shape_cast %590 : vector<128xf32> to vector<1x128xf32>
    %592 = arith.mulf %520, %539 : vector<48x128xf32>
    %cst_144 = arith.constant dense<0.000000e+00> : vector<128xf32>
    %593 = vector.multi_reduction <add>, %592, %cst_144 [0] : vector<48x128xf32> to vector<128xf32>
    %594 = vector.shape_cast %593 : vector<128xf32> to vector<1x128xf32>
    %595 = tpu.concatenate %585, %588, %591, %594 in 0 : vector<1x128xf32>, vector<1x128xf32>, vector<1x128xf32>, vector<1x128xf32> -> vector<4x128xf32>
    %cst_145 = arith.constant dense<0xFF800000> : vector<128xf32>
    %596 = vector.multi_reduction <maximumf>, %595, %cst_145 [0] : vector<4x128xf32> to vector<128xf32>
    %597 = vector.shape_cast %596 : vector<128xf32> to vector<1x128xf32>
    %598 = vector.broadcast %597 : vector<1x128xf32> to vector<4x128xf32>
    %599 = arith.subf %595, %598 : vector<4x128xf32>
    %600 = math.exp %599 : vector<4x128xf32>
    %cst_146 = arith.constant dense<0.000000e+00> : vector<128xf32>
    %601 = vector.multi_reduction <add>, %600, %cst_146 [0] : vector<4x128xf32> to vector<128xf32>
    %602 = vector.shape_cast %601 : vector<128xf32> to vector<1x128xf32>
    %603 = tpu.reciprocal %602 {approx = true} : vector<1x128xf32> -> vector<1x128xf32>
    %604 = vector.broadcast %603 : vector<1x128xf32> to vector<4x128xf32>
    %605 = arith.mulf %600, %604 : vector<4x128xf32>
    %606 = vector.extract_strided_slice %605 {offsets = [0, 0], sizes = [1, 128], strides = [1, 1]} : vector<4x128xf32> to vector<1x128xf32>
    %607 = vector.broadcast %606 : vector<1x128xf32> to vector<48x128xf32>
    %608 = arith.mulf %607, %513 : vector<48x128xf32>
    %609 = vector.extract_strided_slice %605 {offsets = [1, 0], sizes = [1, 128], strides = [1, 1]} : vector<4x128xf32> to vector<1x128xf32>
    %610 = vector.broadcast %609 : vector<1x128xf32> to vector<48x128xf32>
    %611 = arith.mulf %610, %522 : vector<48x128xf32>
    %612 = arith.addf %608, %611 : vector<48x128xf32>
    %613 = vector.extract_strided_slice %605 {offsets = [2, 0], sizes = [1, 128], strides = [1, 1]} : vector<4x128xf32> to vector<1x128xf32>
    %614 = vector.broadcast %613 : vector<1x128xf32> to vector<48x128xf32>
    %615 = arith.mulf %614, %531 : vector<48x128xf32>
    %616 = arith.addf %612, %615 : vector<48x128xf32>
    %617 = vector.extract_strided_slice %605 {offsets = [3, 0], sizes = [1, 128], strides = [1, 1]} : vector<4x128xf32> to vector<1x128xf32>
    %618 = vector.broadcast %617 : vector<1x128xf32> to vector<48x128xf32>
    %619 = arith.mulf %618, %540 : vector<48x128xf32>
    %620 = arith.addf %616, %619 : vector<48x128xf32>
    %cst_147 = arith.constant dense<0.000000e+00> : vector<48xf32>
    %621 = vector.multi_reduction <add>, %620, %cst_147 [1] : vector<48x128xf32> to vector<48xf32>
    %622 = vector.shape_cast %621 : vector<48xf32> to vector<48x1xf32>
    %623 = arith.mulf %529, %512 : vector<48x128xf32>
    %cst_148 = arith.constant dense<0.000000e+00> : vector<128xf32>
    %624 = vector.multi_reduction <add>, %623, %cst_148 [0] : vector<48x128xf32> to vector<128xf32>
    %625 = vector.shape_cast %624 : vector<128xf32> to vector<1x128xf32>
    %626 = arith.mulf %529, %521 : vector<48x128xf32>
    %cst_149 = arith.constant dense<0.000000e+00> : vector<128xf32>
    %627 = vector.multi_reduction <add>, %626, %cst_149 [0] : vector<48x128xf32> to vector<128xf32>
    %628 = vector.shape_cast %627 : vector<128xf32> to vector<1x128xf32>
    %629 = arith.mulf %529, %530 : vector<48x128xf32>
    %cst_150 = arith.constant dense<0.000000e+00> : vector<128xf32>
    %630 = vector.multi_reduction <add>, %629, %cst_150 [0] : vector<48x128xf32> to vector<128xf32>
    %631 = vector.shape_cast %630 : vector<128xf32> to vector<1x128xf32>
    %632 = arith.mulf %529, %539 : vector<48x128xf32>
    %cst_151 = arith.constant dense<0.000000e+00> : vector<128xf32>
    %633 = vector.multi_reduction <add>, %632, %cst_151 [0] : vector<48x128xf32> to vector<128xf32>
    %634 = vector.shape_cast %633 : vector<128xf32> to vector<1x128xf32>
    %635 = tpu.concatenate %625, %628, %631, %634 in 0 : vector<1x128xf32>, vector<1x128xf32>, vector<1x128xf32>, vector<1x128xf32> -> vector<4x128xf32>
    %cst_152 = arith.constant dense<0xFF800000> : vector<128xf32>
    %636 = vector.multi_reduction <maximumf>, %635, %cst_152 [0] : vector<4x128xf32> to vector<128xf32>
    %637 = vector.shape_cast %636 : vector<128xf32> to vector<1x128xf32>
    %638 = vector.broadcast %637 : vector<1x128xf32> to vector<4x128xf32>
    %639 = arith.subf %635, %638 : vector<4x128xf32>
    %640 = math.exp %639 : vector<4x128xf32>
    %cst_153 = arith.constant dense<0.000000e+00> : vector<128xf32>
    %641 = vector.multi_reduction <add>, %640, %cst_153 [0] : vector<4x128xf32> to vector<128xf32>
    %642 = vector.shape_cast %641 : vector<128xf32> to vector<1x128xf32>
    %643 = tpu.reciprocal %642 {approx = true} : vector<1x128xf32> -> vector<1x128xf32>
    %644 = vector.broadcast %643 : vector<1x128xf32> to vector<4x128xf32>
    %645 = arith.mulf %640, %644 : vector<4x128xf32>
    %646 = vector.extract_strided_slice %645 {offsets = [0, 0], sizes = [1, 128], strides = [1, 1]} : vector<4x128xf32> to vector<1x128xf32>
    %647 = vector.broadcast %646 : vector<1x128xf32> to vector<48x128xf32>
    %648 = arith.mulf %647, %513 : vector<48x128xf32>
    %649 = vector.extract_strided_slice %645 {offsets = [1, 0], sizes = [1, 128], strides = [1, 1]} : vector<4x128xf32> to vector<1x128xf32>
    %650 = vector.broadcast %649 : vector<1x128xf32> to vector<48x128xf32>
    %651 = arith.mulf %650, %522 : vector<48x128xf32>
    %652 = arith.addf %648, %651 : vector<48x128xf32>
    %653 = vector.extract_strided_slice %645 {offsets = [2, 0], sizes = [1, 128], strides = [1, 1]} : vector<4x128xf32> to vector<1x128xf32>
    %654 = vector.broadcast %653 : vector<1x128xf32> to vector<48x128xf32>
    %655 = arith.mulf %654, %531 : vector<48x128xf32>
    %656 = arith.addf %652, %655 : vector<48x128xf32>
    %657 = vector.extract_strided_slice %645 {offsets = [3, 0], sizes = [1, 128], strides = [1, 1]} : vector<4x128xf32> to vector<1x128xf32>
    %658 = vector.broadcast %657 : vector<1x128xf32> to vector<48x128xf32>
    %659 = arith.mulf %658, %540 : vector<48x128xf32>
    %660 = arith.addf %656, %659 : vector<48x128xf32>
    %cst_154 = arith.constant dense<0.000000e+00> : vector<48xf32>
    %661 = vector.multi_reduction <add>, %660, %cst_154 [1] : vector<48x128xf32> to vector<48xf32>
    %662 = vector.shape_cast %661 : vector<48xf32> to vector<48x1xf32>
    %663 = arith.mulf %538, %512 : vector<48x128xf32>
    %cst_155 = arith.constant dense<0.000000e+00> : vector<128xf32>
    %664 = vector.multi_reduction <add>, %663, %cst_155 [0] : vector<48x128xf32> to vector<128xf32>
    %665 = vector.shape_cast %664 : vector<128xf32> to vector<1x128xf32>
    %666 = arith.mulf %538, %521 : vector<48x128xf32>
    %cst_156 = arith.constant dense<0.000000e+00> : vector<128xf32>
    %667 = vector.multi_reduction <add>, %666, %cst_156 [0] : vector<48x128xf32> to vector<128xf32>
    %668 = vector.shape_cast %667 : vector<128xf32> to vector<1x128xf32>
    %669 = arith.mulf %538, %530 : vector<48x128xf32>
    %cst_157 = arith.constant dense<0.000000e+00> : vector<128xf32>
    %670 = vector.multi_reduction <add>, %669, %cst_157 [0] : vector<48x128xf32> to vector<128xf32>
    %671 = vector.shape_cast %670 : vector<128xf32> to vector<1x128xf32>
    %672 = arith.mulf %538, %539 : vector<48x128xf32>
    %cst_158 = arith.constant dense<0.000000e+00> : vector<128xf32>
    %673 = vector.multi_reduction <add>, %672, %cst_158 [0] : vector<48x128xf32> to vector<128xf32>
    %674 = vector.shape_cast %673 : vector<128xf32> to vector<1x128xf32>
    %675 = tpu.concatenate %665, %668, %671, %674 in 0 : vector<1x128xf32>, vector<1x128xf32>, vector<1x128xf32>, vector<1x128xf32> -> vector<4x128xf32>
    %cst_159 = arith.constant dense<0xFF800000> : vector<128xf32>
    %676 = vector.multi_reduction <maximumf>, %675, %cst_159 [0] : vector<4x128xf32> to vector<128xf32>
    %677 = vector.shape_cast %676 : vector<128xf32> to vector<1x128xf32>
    %678 = vector.broadcast %677 : vector<1x128xf32> to vector<4x128xf32>
    %679 = arith.subf %675, %678 : vector<4x128xf32>
    %680 = math.exp %679 : vector<4x128xf32>
    %cst_160 = arith.constant dense<0.000000e+00> : vector<128xf32>
    %681 = vector.multi_reduction <add>, %680, %cst_160 [0] : vector<4x128xf32> to vector<128xf32>
    %682 = vector.shape_cast %681 : vector<128xf32> to vector<1x128xf32>
    %683 = tpu.reciprocal %682 {approx = true} : vector<1x128xf32> -> vector<1x128xf32>
    %684 = vector.broadcast %683 : vector<1x128xf32> to vector<4x128xf32>
    %685 = arith.mulf %680, %684 : vector<4x128xf32>
    %686 = vector.extract_strided_slice %685 {offsets = [0, 0], sizes = [1, 128], strides = [1, 1]} : vector<4x128xf32> to vector<1x128xf32>
    %687 = vector.broadcast %686 : vector<1x128xf32> to vector<48x128xf32>
    %688 = arith.mulf %687, %513 : vector<48x128xf32>
    %689 = vector.extract_strided_slice %685 {offsets = [1, 0], sizes = [1, 128], strides = [1, 1]} : vector<4x128xf32> to vector<1x128xf32>
    %690 = vector.broadcast %689 : vector<1x128xf32> to vector<48x128xf32>
    %691 = arith.mulf %690, %522 : vector<48x128xf32>
    %692 = arith.addf %688, %691 : vector<48x128xf32>
    %693 = vector.extract_strided_slice %685 {offsets = [2, 0], sizes = [1, 128], strides = [1, 1]} : vector<4x128xf32> to vector<1x128xf32>
    %694 = vector.broadcast %693 : vector<1x128xf32> to vector<48x128xf32>
    %695 = arith.mulf %694, %531 : vector<48x128xf32>
    %696 = arith.addf %692, %695 : vector<48x128xf32>
    %697 = vector.extract_strided_slice %685 {offsets = [3, 0], sizes = [1, 128], strides = [1, 1]} : vector<4x128xf32> to vector<1x128xf32>
    %698 = vector.broadcast %697 : vector<1x128xf32> to vector<48x128xf32>
    %699 = arith.mulf %698, %540 : vector<48x128xf32>
    %700 = arith.addf %696, %699 : vector<48x128xf32>
    %cst_161 = arith.constant dense<0.000000e+00> : vector<48xf32>
    %701 = vector.multi_reduction <add>, %700, %cst_161 [1] : vector<48x128xf32> to vector<48xf32>
    %702 = vector.shape_cast %701 : vector<48xf32> to vector<48x1xf32>
    %703 = vector.broadcast %515 : vector<41x1xf32> to vector<41x4xf32>
    %704 = vector.broadcast %7 : vector<1x4xf32> to vector<41x4xf32>
    %705 = arith.mulf %703, %704 : vector<41x4xf32>
    %cst_162 = arith.constant 0.000000e+00 : f32
    %706 = vector.broadcast %cst_162 : f32 to vector<41x4xf32>
    %707 = arith.addf %706, %705 : vector<41x4xf32>
    %708 = vector.broadcast %524 : vector<41x1xf32> to vector<41x4xf32>
    %709 = vector.broadcast %12 : vector<1x4xf32> to vector<41x4xf32>
    %710 = arith.mulf %708, %709 : vector<41x4xf32>
    %711 = arith.addf %707, %710 : vector<41x4xf32>
    %712 = vector.broadcast %533 : vector<41x1xf32> to vector<41x4xf32>
    %713 = vector.broadcast %17 : vector<1x4xf32> to vector<41x4xf32>
    %714 = arith.mulf %712, %713 : vector<41x4xf32>
    %715 = arith.addf %711, %714 : vector<41x4xf32>
    %716 = vector.broadcast %542 : vector<41x1xf32> to vector<41x4xf32>
    %717 = vector.broadcast %22 : vector<1x4xf32> to vector<41x4xf32>
    %718 = arith.mulf %716, %717 : vector<41x4xf32>
    %719 = arith.addf %715, %718 : vector<41x4xf32>
    %720 = vector.broadcast %582 : vector<48x1xf32> to vector<48x4xf32>
    %721 = vector.broadcast %7 : vector<1x4xf32> to vector<48x4xf32>
    %722 = arith.mulf %720, %721 : vector<48x4xf32>
    %cst_163 = arith.constant 0.000000e+00 : f32
    %723 = vector.broadcast %cst_163 : f32 to vector<48x4xf32>
    %724 = arith.addf %723, %722 : vector<48x4xf32>
    %725 = vector.broadcast %622 : vector<48x1xf32> to vector<48x4xf32>
    %726 = vector.broadcast %12 : vector<1x4xf32> to vector<48x4xf32>
    %727 = arith.mulf %725, %726 : vector<48x4xf32>
    %728 = arith.addf %724, %727 : vector<48x4xf32>
    %729 = vector.broadcast %662 : vector<48x1xf32> to vector<48x4xf32>
    %730 = vector.broadcast %17 : vector<1x4xf32> to vector<48x4xf32>
    %731 = arith.mulf %729, %730 : vector<48x4xf32>
    %732 = arith.addf %728, %731 : vector<48x4xf32>
    %733 = vector.broadcast %702 : vector<48x1xf32> to vector<48x4xf32>
    %734 = vector.broadcast %22 : vector<1x4xf32> to vector<48x4xf32>
    %735 = arith.mulf %733, %734 : vector<48x4xf32>
    %736 = arith.addf %732, %735 : vector<48x4xf32>
    %c512 = arith.constant 512 : index
    %c0_164 = arith.constant 0 : index
    %737 = vector.load %arg4[%c512, %c0_164] : memref<696x128xf32, #tpu.memory_space<vmem>>, vector<32x41xf32>
    %cst_165 = arith.constant dense<0.000000e+00> : vector<32x4xf32>
    %738 = tpu.matmul %737, %719, %cst_165 {dimension_numbers = #tpu.dot_dimension_numbers<[1], [0], [0], [1], [0, 0, 1, 1], [], []>} : vector<32x41xf32>, vector<41x4xf32>, vector<32x4xf32> -> vector<32x4xf32>
    %c544 = arith.constant 544 : index
    %c0_166 = arith.constant 0 : index
    %739 = vector.load %arg4[%c544, %c0_166] : memref<696x128xf32, #tpu.memory_space<vmem>>, vector<32x48xf32>
    %cst_167 = arith.constant dense<0.000000e+00> : vector<32x4xf32>
    %740 = tpu.matmul %739, %736, %cst_167 {dimension_numbers = #tpu.dot_dimension_numbers<[1], [0], [0], [1], [0, 0, 1, 1], [], []>} : vector<32x48xf32>, vector<48x4xf32>, vector<32x4xf32> -> vector<32x4xf32>
    %741 = arith.addf %738, %740 : vector<32x4xf32>
    %742 = arith.addf %502, %741 : vector<32x4xf32>
    %743 = arith.addf %23, %742 : vector<32x4xf32>
    %c0_168 = arith.constant 0 : index
    %c0_169 = arith.constant 0 : index
    %744 = vector.load %arg7[%c0_168, %c0_169] : memref<32x4xf32, #tpu.memory_space<vmem>>, vector<32x4xf32>
    tpu.vector_store %arg7[%c0_168, %c0_169], %743 {strides = array<i32>} : memref<32x4xf32, #tpu.memory_space<vmem>>, vector<32x4xf32>,
    %c1_i32_170 = arith.constant 1 : i32
    %745 = arith.cmpi eq, %arg0, %c1_i32_170 : i32
    %746 = arith.extui %745 : i1 to i32
    %c0_i32_171 = arith.constant 0 : i32
    %747 = arith.cmpi ne, %746, %c0_i32_171 : i32
    scf.if %747 {
      %c0_172 = arith.constant 0 : index
      %c0_173 = arith.constant 0 : index
      %748 = vector.load %arg7[%c0_172, %c0_173] : memref<32x4xf32, #tpu.memory_space<vmem>>, vector<32x4xf32>
      %cst_174 = arith.constant 3.906250e-03 : f32
      %749 = vector.broadcast %cst_174 : f32 to vector<32x4xf32>
      %750 = arith.mulf %748, %749 : vector<32x4xf32>
      %c576 = arith.constant 576 : index
      %c0_175 = arith.constant 0 : index
      %751 = vector.load %arg4[%c576, %c0_175] : memref<696x128xf32, #tpu.memory_space<vmem>>, vector<32x1xf32>
      %752 = vector.broadcast %751 : vector<32x1xf32> to vector<32x4xf32>
      %753 = arith.addf %750, %752 : vector<32x4xf32>
      %cst_176 = arith.constant 0.000000e+00 : f32
      %754 = vector.broadcast %cst_176 : f32 to vector<32x4xf32>
      %755 = arith.cmpf oge, %753, %754 : vector<32x4xf32>
      %c0_177 = arith.constant 0 : index
      %756 = memref.load %arg5[%c0_177] : memref<8xf32, #tpu.memory_space<smem>>
      %757 = vector.broadcast %756 : f32 to vector<32x4xf32>
      %758 = arith.mulf %757, %753 : vector<32x4xf32>
      %759 = arith.select %755, %753, %758 : vector<32x4xi1>, vector<32x4xf32>
      %c608 = arith.constant 608 : index
      %c0_178 = arith.constant 0 : index
      %760 = vector.load %arg4[%c608, %c0_178] : memref<696x128xf32, #tpu.memory_space<vmem>>, vector<16x32xf32>
      %cst_179 = arith.constant dense<0.000000e+00> : vector<16x4xf32>
      %761 = tpu.matmul %760, %759, %cst_179 {dimension_numbers = #tpu.dot_dimension_numbers<[1], [0], [0], [1], [0, 0, 1, 1], [], []>} : vector<16x32xf32>, vector<32x4xf32>, vector<16x4xf32> -> vector<16x4xf32>
      %c624 = arith.constant 624 : index
      %c0_180 = arith.constant 0 : index
      %762 = vector.load %arg4[%c624, %c0_180] : memref<696x128xf32, #tpu.memory_space<vmem>>, vector<16x1xf32>
      %763 = vector.broadcast %762 : vector<16x1xf32> to vector<16x4xf32>
      %764 = arith.addf %761, %763 : vector<16x4xf32>
      %cst_181 = arith.constant 0.000000e+00 : f32
      %765 = vector.broadcast %cst_181 : f32 to vector<16x4xf32>
      %766 = arith.cmpf oge, %764, %765 : vector<16x4xf32>
      %c1_182 = arith.constant 1 : index
      %767 = memref.load %arg5[%c1_182] : memref<8xf32, #tpu.memory_space<smem>>
      %768 = vector.broadcast %767 : f32 to vector<16x4xf32>
      %769 = arith.mulf %768, %764 : vector<16x4xf32>
      %770 = arith.select %766, %764, %769 : vector<16x4xi1>, vector<16x4xf32>
      %c640 = arith.constant 640 : index
      %c0_183 = arith.constant 0 : index
      %771 = vector.load %arg4[%c640, %c0_183] : memref<696x128xf32, #tpu.memory_space<vmem>>, vector<8x16xf32>
      %cst_184 = arith.constant dense<0.000000e+00> : vector<8x4xf32>
      %772 = tpu.matmul %771, %770, %cst_184 {dimension_numbers = #tpu.dot_dimension_numbers<[1], [0], [0], [1], [0, 0, 1, 1], [], []>} : vector<8x16xf32>, vector<16x4xf32>, vector<8x4xf32> -> vector<8x4xf32>
      %c648 = arith.constant 648 : index
      %c0_185 = arith.constant 0 : index
      %773 = vector.load %arg4[%c648, %c0_185] : memref<696x128xf32, #tpu.memory_space<vmem>>, vector<8x1xf32>
      %774 = vector.broadcast %773 : vector<8x1xf32> to vector<8x4xf32>
      %775 = arith.addf %772, %774 : vector<8x4xf32>
      %cst_186 = arith.constant 0.000000e+00 : f32
      %776 = vector.broadcast %cst_186 : f32 to vector<8x4xf32>
      %777 = arith.cmpf oge, %775, %776 : vector<8x4xf32>
      %c2_187 = arith.constant 2 : index
      %778 = memref.load %arg5[%c2_187] : memref<8xf32, #tpu.memory_space<smem>>
      %779 = vector.broadcast %778 : f32 to vector<8x4xf32>
      %780 = arith.mulf %779, %775 : vector<8x4xf32>
      %781 = arith.select %777, %775, %780 : vector<8x4xi1>, vector<8x4xf32>
      %c656 = arith.constant 656 : index
      %c0_188 = arith.constant 0 : index
      %782 = vector.load %arg4[%c656, %c0_188] : memref<696x128xf32, #tpu.memory_space<vmem>>, vector<4x8xf32>
      %cst_189 = arith.constant dense<0.000000e+00> : vector<4x4xf32>
      %783 = tpu.matmul %782, %781, %cst_189 {dimension_numbers = #tpu.dot_dimension_numbers<[1], [0], [0], [1], [0, 0, 1, 1], [], []>} : vector<4x8xf32>, vector<8x4xf32>, vector<4x4xf32> -> vector<4x4xf32>
      %c664 = arith.constant 664 : index
      %c0_190 = arith.constant 0 : index
      %784 = vector.load %arg4[%c664, %c0_190] : memref<696x128xf32, #tpu.memory_space<vmem>>, vector<4x1xf32>
      %785 = vector.broadcast %784 : vector<4x1xf32> to vector<4x4xf32>
      %786 = arith.addf %783, %785 : vector<4x4xf32>
      %cst_191 = arith.constant 0.000000e+00 : f32
      %787 = vector.broadcast %cst_191 : f32 to vector<4x4xf32>
      %788 = arith.cmpf oge, %786, %787 : vector<4x4xf32>
      %c3_192 = arith.constant 3 : index
      %789 = memref.load %arg5[%c3_192] : memref<8xf32, #tpu.memory_space<smem>>
      %790 = vector.broadcast %789 : f32 to vector<4x4xf32>
      %791 = arith.mulf %790, %786 : vector<4x4xf32>
      %792 = arith.select %788, %786, %791 : vector<4x4xi1>, vector<4x4xf32>
      %c672 = arith.constant 672 : index
      %c0_193 = arith.constant 0 : index
      %793 = vector.load %arg4[%c672, %c0_193] : memref<696x128xf32, #tpu.memory_space<vmem>>, vector<2x4xf32>
      %cst_194 = arith.constant dense<0.000000e+00> : vector<2x4xf32>
      %794 = tpu.matmul %793, %792, %cst_194 {dimension_numbers = #tpu.dot_dimension_numbers<[1], [0], [0], [1], [0, 0, 1, 1], [], []>} : vector<2x4xf32>, vector<4x4xf32>, vector<2x4xf32> -> vector<2x4xf32>
      %c680 = arith.constant 680 : index
      %c0_195 = arith.constant 0 : index
      %795 = vector.load %arg4[%c680, %c0_195] : memref<696x128xf32, #tpu.memory_space<vmem>>, vector<2x1xf32>
      %796 = vector.broadcast %795 : vector<2x1xf32> to vector<2x4xf32>
      %797 = arith.addf %794, %796 : vector<2x4xf32>
      %cst_196 = arith.constant 0.000000e+00 : f32
      %798 = vector.broadcast %cst_196 : f32 to vector<2x4xf32>
      %799 = arith.cmpf oge, %797, %798 : vector<2x4xf32>
      %c4 = arith.constant 4 : index
      %800 = memref.load %arg5[%c4] : memref<8xf32, #tpu.memory_space<smem>>
      %801 = vector.broadcast %800 : f32 to vector<2x4xf32>
      %802 = arith.mulf %801, %797 : vector<2x4xf32>
      %803 = arith.select %799, %797, %802 : vector<2x4xi1>, vector<2x4xf32>
      %c688 = arith.constant 688 : index
      %c0_197 = arith.constant 0 : index
      %804 = vector.load %arg4[%c688, %c0_197] : memref<696x128xf32, #tpu.memory_space<vmem>>, vector<1x2xf32>
      %cst_198 = arith.constant dense<0.000000e+00> : vector<1x4xf32>
      %805 = tpu.matmul %804, %803, %cst_198 {dimension_numbers = #tpu.dot_dimension_numbers<[1], [0], [0], [1], [0, 0, 1, 1], [], []>} : vector<1x2xf32>, vector<2x4xf32>, vector<1x4xf32> -> vector<1x4xf32>
      %c5 = arith.constant 5 : index
      %806 = memref.load %arg5[%c5] : memref<8xf32, #tpu.memory_space<smem>>
      %807 = vector.broadcast %806 : f32 to vector<1x4xf32>
      %808 = arith.addf %805, %807 : vector<1x4xf32>
      %c0_199 = arith.constant 0 : index
      %c0_200 = arith.constant 0 : index
      %809 = vector.load %arg6[%c0_199, %c0_200] : memref<1x4xf32, #tpu.memory_space<vmem>>, vector<1x4xf32>
      tpu.vector_store %arg6[%c0_199, %c0_200], %808 {strides = array<i32>} : memref<1x4xf32, #tpu.memory_space<vmem>>, vector<1x4xf32>,
    } else {
    }
    return
  }
  func.func @transform_0(%arg0: i32) -> (i32, i32, i32) {
    %c0_i32 = arith.constant 0 : i32
    %c0_i32_0 = arith.constant 0 : i32
    %c0_i32_1 = arith.constant 0 : i32
    return %c0_i32, %c0_i32_0, %arg0 : i32, i32, i32
  }
  func.func @transform_1(%arg0: i32) -> (i32, i32, i32) {
    %c0_i32 = arith.constant 0 : i32
    %c0_i32_0 = arith.constant 0 : i32
    %c0_i32_1 = arith.constant 0 : i32
    return %c0_i32, %c0_i32_0, %arg0 : i32, i32, i32
  }
  func.func @transform_2(%arg0: i32) -> (i32, i32, i32) {
    %c0_i32 = arith.constant 0 : i32
    %c0_i32_0 = arith.constant 0 : i32
    %c0_i32_1 = arith.constant 0 : i32
    return %c0_i32, %c0_i32_0, %arg0 : i32, i32, i32
  }
  func.func @transform_3(%arg0: i32) -> (i32, i32) {
    %c0_i32 = arith.constant 0 : i32
    %c0_i32_0 = arith.constant 0 : i32
    %c0_i32_1 = arith.constant 0 : i32
    return %c0_i32, %c0_i32_0 : i32, i32
  }
  func.func @transform_4(%arg0: i32) -> i32 {
    %c0_i32 = arith.constant 0 : i32
    %c0_i32_0 = arith.constant 0 : i32
    return %c0_i32 : i32
  }
  func.func @transform_5(%arg0: i32) -> (i32, i32) {
    %c0_i32 = arith.constant 0 : i32
    %c0_i32_0 = arith.constant 0 : i32
    %c0_i32_1 = arith.constant 0 : i32
    return %c0_i32, %c0_i32_0 : i32, i32
  }
}

</mosaic_0001>

<bundles_post_ra>
// kernel: tpu_custom_call.1
= control target key start
LH: loop header
LB: loop body
LE: loop exit
PB: predicated region body
PF: predicated region fallthrough
CT: control target
= control target key end

     0   :  { %10 = vsyncpa [#allocation8], 0  ;;  %s7628_s0 = inlined_call_operand.vmem [shape: f32[4,4,256], index: 0, kind: input, shape index: {}]   ;;  %s7629_s1 = inlined_call_operand.vmem [shape: f32[4,3,256], index: 1, kind: input, shape index: {}]   ;;  %s7630_s2 = inlined_call_operand.vmem [shape: f32[4,41,256], index: 2, kind: input, shape index: {}]   ;;  %s7631_s3 = inlined_call_operand.vmem [shape: f32[696,128], index: 3, kind: input, shape index: {}]   ;;  %s7632_s4 = inlined_call_operand.vmem [shape: f32[8], index: 4, kind: input, shape index: {}]   ;;  %s7633_s5 = inlined_call_operand.hbm [shape: f32[1,4], index: 5, kind: output, shape index: {}]  }
   0x1   :  { %11 = vsyncpa [#allocation7], 0  ;;  %s5726_s18 = smov 0   ;;  %s5728_s19 = smov 0  }
   0x2   :  { %s5730_s20 = smov 0  }
   0x3 LB: > { %s5742_s21 = sadd.s32 4294967295, %s5685_s20   ;;  %s5745_s22 = sadd.s32 1, %s5685_s20   ;;  %s5685_s20 = sphi %s5730_s20, %s7747_s20   ;;  %s5681_s19 = sphi %s5728_s19, %s7746_s19   ;;  %s5677_s18 = sphi %s5726_s18, %s7745_s18  }
   0x4   : > { %s21_s23 = ssub.s32 %s5685_s20, %s5745_s22  ;;  %s24_s24 = sadd.s32 1, %s5681_s19 }
   0x5   : > { %p22_p0 = scmp.eq.s32.totalorder %s21_s23, 0  ;;  %p31_p1 = scmp.ne.s32.totalorder %s5681_s19, %s5677_s18 }
   0x6   : > { %p32_p2 = scmp.eq.s32.totalorder %s5685_s20, 0  ;;  %p4790_p3 = scmp.ge.s32.totalorder %s5685_s20, 1 }
   0x7   : > { %s5755_s25 = scalar_select %p22_p0, %s5681_s19, %s24_s24  }
   0x8   : > { %p5757_p4 = por %p32_p2, %p31_p1  ;;  %p163_p5 = scmp.lt.s32.totalorder %s5685_s20, 3 }
   0x9   : > { %p5526_p7 = scmp.eq.s32.totalorder %s5742_s21, 0  ;;  %s179_s30 = sshll.u32 %s7632_s4, 4  ;;  %s180_s30 = int_to_ptr.vmem [resolvable:$true] %s179_s30 }
   0xa   : > { %p5764_p8 = pnand %p4790_p3, %p163_p5  ;;  %s5616_s6 = scalar_lea.vmem %s180_s30, 16 }
   0xb   : > { %p5617_p11 = scmp.ne.s32.totalorder %s180_s30, %s5616_s6  ;;  %p5624_p1 = scmp.lt.s32.totalorder %s180_s30, %s180_s30 }
   0xc   : > { %p5522_p9 = pneg %p5764_p8  ;;  %p5625_p2 = scmp.lt.s32.totalorder %s5616_s6, %s5616_s6 }
   0xe   : > { %p5523_p10 = pnand %p5526_p7, %p5522_p9  ;;  %p5626_p3 = por %p5625_p2, %p5624_p1 }
  0x10   : > { %p5618_p12 = pneg %p5523_p10 }
  0x12   : > { %p5619_p13 = pnand %p5618_p12, %p5617_p11 }
  0x14   : > { %p5620_p0 = pneg %p5619_p13 }
  0x16   : > { %p5627_p5 = pnand %p5626_p3, %p5620_p0 }
  0x18   : > { %5630 = shalt.err (!%p5627_p5)
}
  0x19   : > { %s5687_s7 = smov [#allocation6]   ;;  %p4792_p6 = scmp.ge.s32.totalorder %s5685_s20, 2 }
  0x1a   : > { %5525 = dma.vmem_to_smem (!%p5523_p10), %s180_s30, 16, %s5687_s7, [#allocation8]  }
  0x1b   : > { %186 = sbr.rel (%p4792_p6) target bundleno = 60 (0x3c), region = 24 }
  0x20   : > { %189 = sbr.rel (!%p5757_p4) target bundleno = 38 (0x26), region = 28  ;;  %s191_s8 = sand.u32 (%p5757_p4), 1, %s5681_s19  }
  0x21   : > { %s4794_s9 = sshll.u32 (%p5757_p4), %s5685_s20, 2  ;;  %s4793_s10 = sshll.u32 (%p5757_p4), %s191_s8, 4 }
  0x22   : > { %s195_s13 = scalar_lea.vmem (%p5757_p4), %s7628_s0, %s4794_s9  ;;  %s193_s14 = scalar_lea.vmem (%p5757_p4), [#allocation3], %s4793_s10 }
  0x23   : > { %v212_v0 = vld [vmem:[%s195_s13] sm:$0xf] (%p5757_p4)  ;;  %v214_v1 = vld [vmem:[%s195_s13 + $0x8] sm:$0xf] (%p5757_p4)  ;;  %v216_v2 = vld [vmem:[%s195_s13 + $0x10] sm:$0xf] (%p5757_p4) }
  0x24   : > { %213 = vst [vmem:[%s193_s14] sm:$0xf] (%p5757_p4), %v212_v0  ;;  %215 = vst [vmem:[%s193_s14 + $0x4] sm:$0xf] (%p5757_p4), %v214_v1  ;;  %v218_v3 = vld [vmem:[%s195_s13 + $0x18] sm:$0xf] (%p5757_p4) }
  0x25   : > { %217 = vst [vmem:[%s193_s14 + $0x8] sm:$0xf] %v216_v2  ;;  %219 = vst [vmem:[%s193_s14 + $0xc] sm:$0xf] %v218_v3 }
  0x26 PF: > { %251 = sbr.rel (!%p5757_p4) target bundleno = 44 (0x2c), region = 69  ;;  %s253_s15 = sand.u32 (%p5757_p4), 1, %s5681_s19  }
  0x27   : > { %s4796_s16 = sshll.u32 (%p5757_p4), %s5685_s20, 2  ;;  %s4795_s17 = sshll.u32 (%p5757_p4), %s253_s15, 4 }
  0x28   : > { %s257_s28 = scalar_lea.vmem (%p5757_p4), %s7629_s1, %s4796_s16  ;;  %s255_s29 = scalar_lea.vmem (%p5757_p4), [#allocation4], %s4795_s17 }
  0x29   : > { %v274_v4 = vld [vmem:[%s257_s28] sm:$0xf] (%p5757_p4)  ;;  %v276_v5 = vld [vmem:[%s257_s28 + $0x8] sm:$0xf] (%p5757_p4)  ;;  %v278_v6 = vld [vmem:[%s257_s28 + $0x10] sm:$0xf] (%p5757_p4) }
  0x2a   : > { %275 = vst [vmem:[%s255_s29] sm:$0xf] (%p5757_p4), %v274_v4  ;;  %277 = vst [vmem:[%s255_s29 + $0x4] sm:$0xf] (%p5757_p4), %v276_v5  ;;  %v280_v7 = vld [vmem:[%s257_s28 + $0x18] sm:$0xf] (%p5757_p4) }
  0x2b   : > { %279 = vst [vmem:[%s255_s29 + $0x8] sm:$0xf] %v278_v6  ;;  %281 = vst [vmem:[%s255_s29 + $0xc] sm:$0xf] %v280_v7 }
  0x2c PF: > { %313 = sbr.rel (!%p5757_p4) target bundleno = 60 (0x3c), region = 110  ;;  %s315_s30 = sand.u32 (%p5757_p4), 1, %s5681_s19  }
  0x2d   : > { %s4797_s6 = sshll.u32 (%p5757_p4), %s5685_s20, 3  ;;  %s5512_s7 = smul.u32 (%p5757_p4), 192, %s315_s30 }
  0x2e   : > { %s5797_s10 = scalar_lea.vmem (%p5757_p4), %s7630_s2, %s4797_s6 }
  0x2f   : > { %v394_v8 = vld [vmem:[%s5797_s10] sm:$0xff] (%p5757_p4)  ;;  %v396_v9 = vld [vmem:[%s5797_s10 + $0x10] sm:$0xff] (%p5757_p4)  ;;  %s5805_s20 = scalar_lea.vmem (%p5757_p4), [#allocation5], %s5512_s7 }
  0x30   : > { %v398_v10 = vld [vmem:[%s5797_s10 + $0x20] sm:$0xff] (%p5757_p4)  ;;  %v400_v11 = vld [vmem:[%s5797_s10 + $0x30] sm:$0xff] (%p5757_p4)  ;;  %395 = vst [vmem:[%s5805_s20] sm:$0xff] (%p5757_p4), %v394_v8  ;;  %397 = vst [vmem:[%s5805_s20 + $0x8] sm:$0xff] (%p5757_p4), %v396_v9 }
  0x31   : > { %v402_v12 = vld [vmem:[%s5797_s10 + $0x40] sm:$0xff]  ;;  %v404_v13 = vld [vmem:[%s5797_s10 + $0x50] sm:$0xff]  ;;  %399 = vst [vmem:[%s5805_s20 + $0x10] sm:$0xff] %v398_v10  ;;  %401 = vst [vmem:[%s5805_s20 + $0x18] sm:$0xff] %v400_v11 }
  0x32   : > { %403 = vst [vmem:[%s5805_s20 + $0x20] sm:$0xff] %v402_v12  ;;  %405 = vst [vmem:[%s5805_s20 + $0x28] sm:$0xff] %v404_v13  ;;  %v406_v14 = vld [vmem:[%s5797_s10 + $0x60] sm:$0xff]  ;;  %v408_v15 = vld [vmem:[%s5797_s10 + $0x70] sm:$0xff] }
  0x33   : > { %v410_v16 = vld [vmem:[%s5797_s10 + $0x80] sm:$0xff]  ;;  %407 = vst [vmem:[%s5805_s20 + $0x30] sm:$0xff] %v406_v14  ;;  %409 = vst [vmem:[%s5805_s20 + $0x38] sm:$0xff] %v408_v15  ;;  %v412_v17 = vld [vmem:[%s5797_s10 + $0x90] sm:$0xff] }
  0x34   : > { %411 = vst [vmem:[%s5805_s20 + $0x40] sm:$0xff] %v410_v16  ;;  %v414_v18 = vld [vmem:[%s5797_s10 + $0xa0] sm:$0xff]  ;;  %v416_v19 = vld [vmem:[%s5797_s10 + $0xb0] sm:$0xff]  ;;  %413 = vst [vmem:[%s5805_s20 + $0x48] sm:$0xff] %v412_v17 }
  0x35   : > { %415 = vst [vmem:[%s5805_s20 + $0x50] sm:$0xff] %v414_v18  ;;  %417 = vst [vmem:[%s5805_s20 + $0x58] sm:$0xff] %v416_v19  ;;  %v418_v20 = vld [vmem:[%s5797_s10 + $0xc0] sm:$0xff]  ;;  %v420_v21 = vld [vmem:[%s5797_s10 + $0xd0] sm:$0xff] }
  0x36   : > { %v422_v22 = vld [vmem:[%s5797_s10 + $0xe0] sm:$0xff]  ;;  %419 = vst [vmem:[%s5805_s20 + $0x60] sm:$0xff] %v418_v20  ;;  %421 = vst [vmem:[%s5805_s20 + $0x68] sm:$0xff] %v420_v21  ;;  %v424_v23 = vld [vmem:[%s5797_s10 + $0xf0] sm:$0xff] }
  0x37   : > { %423 = vst [vmem:[%s5805_s20 + $0x70] sm:$0xff] %v422_v22  ;;  %v426_v24 = vld [vmem:[%s5797_s10 + $0x100] sm:$0xff]  ;;  %v428_v25 = vld [vmem:[%s5797_s10 + $0x110] sm:$0xff]  ;;  %425 = vst [vmem:[%s5805_s20 + $0x78] sm:$0xff] %v424_v23 }
  0x38   : > { %427 = vst [vmem:[%s5805_s20 + $0x80] sm:$0xff] %v426_v24  ;;  %429 = vst [vmem:[%s5805_s20 + $0x88] sm:$0xff] %v428_v25  ;;  %v430_v26 = vld [vmem:[%s5797_s10 + $0x120] sm:$0xff]  ;;  %v432_v27 = vld [vmem:[%s5797_s10 + $0x130] sm:$0xff] }
  0x39   : > { %v434_v28 = vld [vmem:[%s5797_s10 + $0x140] sm:$0xff]  ;;  %431 = vst [vmem:[%s5805_s20 + $0x90] sm:$0xff] %v430_v26  ;;  %433 = vst [vmem:[%s5805_s20 + $0x98] sm:$0xff] %v432_v27  ;;  %v436_v29 = vld [vmem:[%s5797_s10 + $0x150] sm:$0xff] }
  0x3a   : > { %435 = vst [vmem:[%s5805_s20 + $0xa0] sm:$0xff] %v434_v28  ;;  %v438_v30 = vld [vmem:[%s5797_s10 + $0x160] sm:$0xff]  ;;  %v440_v31 = vld [vmem:[%s5797_s10 + $0x170] sm:$0xff]  ;;  %437 = vst [vmem:[%s5805_s20 + $0xa8] sm:$0xff] %v436_v29 }
  0x3b   : > { %439 = vst [vmem:[%s5805_s20 + $0xb0] sm:$0xff] %v438_v30  ;;  %441 = vst [vmem:[%s5805_s20 + $0xb8] sm:$0xff] %v440_v31 }
  0x3c PF: > { %450 = sbr.rel (%p5764_p8) target bundleno = 2942 (0xb7e), region = 148 }
  0x41   : > { %s453_s26 = sand.u32 1, %s5677_s18  }
  0x42   : > { %s4799_s11 = sshll.u32 %s453_s26, 4  ;;  %s5513_s12 = smul.u32 192, %s453_s26 }
  0x43   : > { %s455_s13 = scalar_lea.vmem [#allocation3], %s4799_s11  ;;  %s5852_s14 = scalar_lea.vmem [#allocation4], %s4799_s11 }
  0x44   : > { %s5854_s15 = scalar_lea.vmem [#allocation5], %s5513_s12 }
  0x45   : > { %5668 = dma.done.wait (%p5526_p7), [#allocation8], 16  }
  0x46   : > { %5670 = vsyncadd (%p5526_p7), [#allocation8], 4294967280 }
  0x47   : > { %477 = sfence }
  0x48   : > { %p7672_p4 = scmp.ne.s32.totalorder %s5742_s21, 0 }
  0x4a   : > { %505 = sbr.rel (%p7672_p4) target bundleno = 82 (0x52), region = 168 }
  0x4f   : > { %vm506_vm0 = vcmask 31744   ;;  %v5688_v32 = vmov 0.0  }
  0x50   : > { %507 = vst.msk [vmem:[#allocation2] sm:$0xff] %vm506_vm0, %v5688_v32  ;;  %508 = vst.msk [vmem:[#allocation2 + $0x8] sm:$0xff] %vm506_vm0, %v5688_v32 }
  0x51   : > { %509 = vst.msk [vmem:[#allocation2 + $0x10] sm:$0xff] %vm506_vm0, %v5688_v32  ;;  %510 = vst.msk [vmem:[#allocation2 + $0x18] sm:$0xff] %vm506_vm0, %v5688_v32 }
  0x52 PF: > { %v550_v33 = vld [vmem:[%s455_s13] sm:$0xf]  ;;  %vm561_vm1 = vcmask 1043456   ;;  %v5689_v34 = vmov 0.0   ;;  %v4811_v35 = vld [vmem:[%s455_s13 + $0x4] sm:$0xf] }
  0x53   : > { %5167 = vmatprep.subr.mxu0 %v5689_v34  ;;  %5178 = vmatprep.subr.mxu1 %v5689_v34  ;;  %v529_v36 = vld [vmem:[%s7631_s3] sm:$0xff]  ;;  %vm551_vm2 = vcmask 31744   ;;  %vm5690_vm3 = vmmov 0   ;;  %v5875_v37 = vld [vmem:[%s455_s13 + $0x8] sm:$0xf]  ;;  %v531_v42 = vld [vmem:[%s7631_s3 + $0x10] sm:$0xff] }
  0x54   : > { %5168 = vmatpush3.msk.msra.mxu0 %vm561_vm1, %v550_v33  ;;  %5169 = vmatprep.mubr.msk.f32.mxu0 %vm5690_vm3, %v5689_v34  ;;  %v5877_v38 = vld [vmem:[%s455_s13 + $0xc] sm:$0xf]  ;;  %v5691_v43 = vmov 0   ;;  %v533_v44 = vld [vmem:[%s7631_s3 + $0x20] sm:$0xff]  ;;  %v733_v45 = vsel %vm561_vm1, %v4811_v35, 0.0  ;;  %v645_v46 = vsel %vm561_vm1, %v550_v33, 0.0 }
  0x55   : > { %5179 = vmatpush3.msk.msra.mxu1 %vm561_vm1, %v4811_v35  ;;  %5180 = vmatprep.mubr.msk.f32.mxu1 %vm5690_vm3, %v5689_v34  ;;  %v530_v39 = vld [vmem:[%s7631_s3 + $0x8] sm:$0xff]  ;;  %v532_v40 = vld [vmem:[%s7631_s3 + $0x18] sm:$0xff]  ;;  %vm940_vm4 = vcmask 1040384   ;;  %vm942_vm5 = vcmask 1041408   ;;  %vm944_vm6 = vcmask 1042432   ;;  %vm1239_vm7 = vcmask 64512  }
  0x56   : > { %5170 = vmatmul.mubr.msk.f32.vlgmr.msra.gmra.mxu0 %vm551_vm2, %v529_v36  ;;  %5181 = vmatmul.mubr.msk.f32.vlgmr.msra.gmra.mxu1 %vm551_vm2, %v529_v36  ;;  %v534_v41 = vld [vmem:[%s7631_s3 + $0x28] sm:$0xff]  ;;  %vm1459_vm12 = vcmask 23552   ;;  %vm2476_vm13 = vcmask 334848   ;;  %vm3980_vm14 = vcmask 392192   ;;  %p4966_p6 = scmp.ne.s32.totalorder %s5742_s21, 1 }
  0x57   : > { %5172 = vmatprep.mubr.msk.f32.mxu0 %vm5690_vm3, %v5689_v34  ;;  %5183 = vmatprep.mubr.msk.f32.mxu1 %vm5690_vm3, %v5689_v34  ;;  %s4234_s17 = sld [smem:[#allocation6]] (!%p4966_p6) }
  0x58   : > { %5189 = vmatprep.subr.mxu0 %v5689_v34  ;;  %5200 = vmatprep.subr.mxu1 %v5689_v34  ;;  %s4969_s28 = sld [smem:[#allocation6 + $0x1]] (!%p4966_p6) }
  0x59   : > { %5190 = vmatpush3.msk.msra.mxu0 %vm561_vm1, %v5875_v37  ;;  %5201 = vmatpush3.msk.msra.mxu1 %vm561_vm1, %v5877_v38  ;;  %s4973_s8 = sld [smem:[#allocation6 + $0x3]] (!%p4966_p6) }
  0x5a   : > { %5173 = vmatmul.mubr.msk.f32.gmra.mxu0 %vm551_vm2, %v530_v39  ;;  %5184 = vmatmul.mubr.msk.f32.gmra.mxu1 %vm551_vm2, %v530_v39  ;;  %s4976_s20 = sld [smem:[#allocation6 + $0x4]] (!%p4966_p6) }
  0x5b   : > { %5175 = vmatprep.mubr.msk.f32.mxu0 %vm5690_vm3, %v5689_v34  ;;  %5186 = vmatprep.mubr.msk.f32.mxu1 %vm5690_vm3, %v5689_v34  ;;  %s4977_s12 = sld [smem:[#allocation6 + $0x5]] (!%p4966_p6) }
  0x5c   : > { %5563 = vset.pattern.permute.xlu0 %v5691_v43  ;;  %5564 = vset.pattern.permute.xlu1 %v5691_v43 }
  0x5d   : > { %537 = vperm.xlu0 %5563, %v532_v40   ;;  %547 = vperm.xlu1 %5564, %v534_v41  }
  0x5e   : > { %5176 = vmatmul.mubr.msk.f32.gmra.mxu0 %vm551_vm2, %v531_v42  ;;  %5187 = vmatmul.mubr.msk.f32.gmra.mxu1 %vm551_vm2, %v531_v42 }
  0x5f   : > { %5191 = vmatprep.mubr.msk.f32.mxu0 %vm5690_vm3, %v5689_v34  ;;  %5202 = vmatprep.mubr.msk.f32.mxu1 %vm5690_vm3, %v5689_v34 }
  0x61   : > { %542 = vperm.xlu0 %5563, %v533_v44  }
  0x62   : > { %5192 = vmatmul.mubr.msk.f32.vlgmr.msra.gmra.mxu0 %vm551_vm2, %v529_v36  ;;  %5203 = vmatmul.mubr.msk.f32.vlgmr.msra.gmra.mxu1 %vm551_vm2, %v529_v36 }
  0x63   : > { %5194 = vmatprep.mubr.msk.f32.mxu0 %vm5690_vm3, %v5689_v34  ;;  %5205 = vmatprep.mubr.msk.f32.mxu1 %vm5690_vm3, %v5689_v34 }
  0x66   : > { %5195 = vmatmul.mubr.msk.f32.gmra.mxu0 %vm551_vm2, %v530_v39  ;;  %5206 = vmatmul.mubr.msk.f32.gmra.mxu1 %vm551_vm2, %v530_v39 }
  0x67   : > { %5197 = vmatprep.mubr.msk.f32.mxu0 %vm5690_vm3, %v5689_v34  ;;  %5208 = vmatprep.mubr.msk.f32.mxu1 %vm5690_vm3, %v5689_v34 }
  0x6a   : > { %5198 = vmatmul.mubr.msk.f32.gmra.mxu0 %vm551_vm2, %v531_v42  ;;  %5209 = vmatmul.mubr.msk.f32.gmra.mxu1 %vm551_vm2, %v531_v42 }
  0x80   : > { %646 = vadd.xlane.f32.xlu0 %v645_v46 }
  0x81   : > { %734 = vadd.xlane.f32.xlu1 %v733_v45 }
  0xd8   : > { %v538_v47 = vpop.permute.xlu0 %537 }
  0xdc   : > { %v5932_v50 = vpop.permute.xlu0 %542 }
 0x116   : > { %v631_v48 = vpop.f32.mrf.mxu0  ;;  %v719_v49 = vpop.f32.mrf.mxu1 }
 0x117   : > { %v5934_v55 = vadd.f32 %v631_v48, %v538_v47  ;;  %v5936_v56 = vadd.f32 %v719_v49, %v538_v47 }
 0x118   : > { %v5171_v51 = vpop.f32.mrf.mxu0  ;;  %v5182_v52 = vpop.f32.mrf.mxu1 }
 0x11a   : > { %v636_v53 = vpop.f32.mrf.mxu0  ;;  %v724_v54 = vpop.f32.mrf.mxu1 }
 0x11b   : > { %v637_v57 = vadd.f32 %v636_v53, %v5932_v50  ;;  %v725_v58 = vadd.f32 %v724_v54, %v5932_v50 }
 0x11c   : > { %v5174_v59 = vpop.f32.mrf.mxu0  ;;  %v5185_v60 = vpop.f32.mrf.mxu1 }
 0x11d   : > { %v912_v61 = vmul.f32 %v637_v57, %v5934_v55  ;;  %v990_v62 = vmul.f32 %v5936_v56, %v637_v57  ;;  %v919_v63 = vmul.f32 %v725_v58, %v5934_v55  ;;  %v997_v0 = vmul.f32 %v725_v58, %v5936_v56 }
 0x11e   : > { %v5944_v1 = vpop.f32.mrf.mxu0  ;;  %v5946_v2 = vpop.f32.mrf.mxu1 }
 0x11f   : > { %v913_v3 = vrot.slane %v912_v61, 4  ;;  %v991_v4 = vrot.slane %v990_v62, 4  ;;  %v920_v5 = vrot.slane %v919_v63, 4  ;;  %v998_v6 = vrot.slane %v997_v0, 4 }
 0x120   : > { %v5177_v7 = vpop.f32.mrf.mxu0  ;;  %v5188_v8 = vpop.f32.mrf.mxu1 }
 0x121   : > { %v914_v9 = vadd.f32 %v913_v3, %v912_v61  ;;  %v992_v10 = vadd.f32 %v991_v4, %v990_v62  ;;  %v921_v11 = vadd.f32 %v920_v5, %v919_v63  ;;  %v999_v12 = vadd.f32 %v998_v6, %v997_v0 }
 0x122   : > { %v807_v13 = vpop.f32.mrf.mxu0  ;;  %v895_v14 = vpop.f32.mrf.mxu1 }
 0x123   : > { %v915_v15 = vrot.slane %v914_v9, 2  ;;  %v993_v16 = vrot.slane %v992_v10, 2  ;;  %v922_v17 = vrot.slane %v921_v11, 2  ;;  %v5948_v18 = vadd.f32 %v807_v13, %v538_v47 }
 0x124   : > { %v5950_v19 = vadd.f32 %v895_v14, %v538_v47  ;;  %v5193_v20 = vpop.f32.mrf.mxu0  ;;  %v5204_v21 = vpop.f32.mrf.mxu1  ;;  %v1000_v23 = vrot.slane %v999_v12, 2 }
 0x125   : > { %v916_v22 = vadd.f32 %v915_v15, %v914_v9  ;;  %v1065_v24 = vmul.f32 %v5948_v18, %v637_v57  ;;  %v1072_v25 = vmul.f32 %v5948_v18, %v725_v58  ;;  %v994_v30 = vadd.f32 %v993_v16, %v992_v10 }
 0x126   : > { %v1140_v26 = vmul.f32 %v5950_v19, %v637_v57  ;;  %v1147_v27 = vmul.f32 %v5950_v19, %v725_v58  ;;  %v812_v28 = vpop.f32.mrf.mxu0  ;;  %v900_v29 = vpop.f32.mrf.mxu1  ;;  %v923_v31 = vadd.f32 %v922_v17, %v921_v11  ;;  %v1001_v42 = vadd.f32 %v1000_v23, %v999_v12 }
 0x127   : > { %v1066_v32 = vrot.slane %v1065_v24, 4  ;;  %v1073_v33 = vrot.slane %v1072_v25, 4  ;;  %v917_v41 = vrot.slane %v916_v22, 1  ;;  %v813_v49 = vadd.f32 %v812_v28, %v5932_v50 }
 0x128   : > { %v1141_v35 = vrot.slane %v1140_v26, 4  ;;  %v1148_v36 = vrot.slane %v1147_v27, 4  ;;  %v5196_v39 = vpop.f32.mrf.mxu0  ;;  %v5207_v40 = vpop.f32.mrf.mxu1  ;;  %v995_v51 = vrot.slane %v994_v30, 1  ;;  %v924_v52 = vrot.slane %v923_v31, 1 }
 0x129   : > { %v1067_v43 = vadd.f32 %v1066_v32, %v1065_v24  ;;  %v1074_v44 = vadd.f32 %v1073_v33, %v1072_v25  ;;  %v926_v59 = vmul.f32 %v813_v49, %v5934_v55  ;;  %v1004_v60 = vmul.f32 %v813_v49, %v5936_v56 }
 0x12a   : > { %v1142_v45 = vadd.f32 %v1141_v35, %v1140_v26  ;;  %v1149_v46 = vadd.f32 %v1148_v36, %v1147_v27  ;;  %v5956_v47 = vpop.f32.mrf.mxu0  ;;  %v5958_v48 = vpop.f32.mrf.mxu1  ;;  %v1079_v61 = vmul.f32 %v813_v49, %v5948_v18  ;;  %v1154_v62 = vmul.f32 %v5950_v19, %v813_v49 }
 0x12b   : > { %v1068_v53 = vrot.slane %v1067_v43, 2  ;;  %v1075_v54 = vrot.slane %v1074_v44, 2  ;;  %v5965_v63 = vadd.f32 %v917_v41, %v916_v22  ;;  %v1002_v0 = vrot.slane %v1001_v42, 1 }
 0x12c   : > { %v5199_v57 = vpop.f32.mrf.mxu0  ;;  %v5210_v58 = vpop.f32.mrf.mxu1  ;;  %v1143_v3 = vrot.slane %v1142_v45, 2  ;;  %v1150_v4 = vrot.slane %v1149_v46, 2  ;;  %v927_v5 = vrot.slane %v926_v59, 4  ;;  %v1005_v6 = vrot.slane %v1004_v60, 4 }
 0x12d   : > { %v1080_v7 = vrot.slane %v1079_v61, 4  ;;  %v1155_v8 = vrot.slane %v1154_v62, 4  ;;  %v996_v9 = vadd.f32 %v995_v51, %v994_v30  ;;  %v1069_v10 = vadd.f32 %v1068_v53, %v1067_v43 }
 0x12e   : > { %v1076_v11 = vadd.f32 %v1075_v54, %v1074_v44  ;;  %v901_v12 = vadd.f32 %v900_v29, %v5932_v50  ;;  %v928_v13 = vadd.f32 %v927_v5, %v926_v59  ;;  %v1006_v14 = vadd.f32 %v1005_v6, %v1004_v60 }
 0x12f   : > { %v1081_v15 = vadd.f32 %v1080_v7, %v1079_v61  ;;  %v1156_v16 = vadd.f32 %v1155_v8, %v1154_v62  ;;  %v925_v17 = vadd.f32 %v924_v52, %v923_v31  ;;  %v1003_v20 = vadd.f32 %v1002_v0, %v1001_v42 }
 0x130   : > { %v1144_v21 = vadd.f32 %v1143_v3, %v1142_v45  ;;  %v1151_v22 = vadd.f32 %v1150_v4, %v1149_v46  ;;  %v929_v23 = vrot.slane %v928_v13, 2  ;;  %v1007_v24 = vrot.slane %v1006_v14, 2 }
 0x131   : > { %v1082_v25 = vrot.slane %v1081_v15, 2  ;;  %v1157_v26 = vrot.slane %v1156_v16, 2  ;;  %v1070_v27 = vrot.slane %v1069_v10, 1  ;;  %v1077_v28 = vrot.slane %v1076_v11, 1 }
 0x132   : > { %v933_v30 = vmul.f32 %v901_v12, %v5934_v55  ;;  %v1011_v50 = vmul.f32 %v901_v12, %v5936_v56  ;;  %v930_v29 = vadd.f32 %v929_v23, %v928_v13  ;;  %v1008_v32 = vadd.f32 %v1007_v24, %v1006_v14 }
 0x133   : > { %v1083_v33 = vadd.f32 %v1082_v25, %v1081_v15  ;;  %v1158_v35 = vadd.f32 %v1157_v26, %v1156_v16  ;;  %v1086_v39 = vmul.f32 %v901_v12, %v5948_v18  ;;  %v1161_v40 = vmul.f32 %v901_v12, %v5950_v19 }
 0x134   : > { %v934_v31 = vrot.slane %v933_v30, 4  ;;  %v1012_v36 = vrot.slane %v1011_v50, 4  ;;  %v1145_v41 = vrot.slane %v1144_v21, 1  ;;  %v1152_v42 = vrot.slane %v1151_v22, 1 }
 0x135   : > { %v931_v43 = vrot.slane %v930_v29, 1  ;;  %v1009_v44 = vrot.slane %v1008_v32, 1  ;;  %v1087_v55 = vrot.slane %v1086_v39, 4  ;;  %v1162_v49 = vrot.slane %v1161_v40, 4 }
 0x136   : > { %v935_v45 = vadd.f32 %v934_v31, %v933_v30  ;;  %v1013_v46 = vadd.f32 %v1012_v36, %v1011_v50  ;;  %v1071_v56 = vadd.f32 %v1070_v27, %v1069_v10  ;;  %v1078_v51 = vadd.f32 %v1077_v28, %v1076_v11 }
 0x137   : > { %v1084_v52 = vrot.slane %v1083_v33, 1  ;;  %v1159_v53 = vrot.slane %v1158_v35, 1  ;;  %v1088_v58 = vadd.f32 %v1087_v55, %v1086_v39  ;;  %v1163_v59 = vadd.f32 %v1162_v49, %v1161_v40 }
 0x138   : > { %v936_v54 = vrot.slane %v935_v45, 2  ;;  %v1014_v57 = vrot.slane %v1013_v46, 2  ;;  %v1146_v18 = vadd.f32 %v1145_v41, %v1144_v21  ;;  %v1153_v60 = vadd.f32 %v1152_v42, %v1151_v22 }
 0x139   : > { %v932_v19 = vadd.f32 %v931_v43, %v930_v29  ;;  %v1010_v61 = vadd.f32 %v1009_v44, %v1008_v32  ;;  %v1089_v3 = vrot.slane %v1088_v58, 2  ;;  %v1164_v4 = vrot.slane %v1163_v59, 2 }
 0x13a   : > { %v937_v62 = vadd.f32 %v936_v54, %v935_v45  ;;  %v1015_v0 = vadd.f32 %v1014_v57, %v1013_v46  ;;  %v941_v5 = vsel %vm940_vm4, %v5965_v63, %v925_v17  ;;  %v1018_v6 = vsel %vm940_vm4, %v996_v9, %v1003_v20 }
 0x13b   : > { %v1085_v7 = vadd.f32 %v1084_v52, %v1083_v33  ;;  %v1160_v8 = vadd.f32 %v1159_v53, %v1158_v35  ;;  %v1090_v12 = vadd.f32 %v1089_v3, %v1088_v58  ;;  %v1165_v13 = vadd.f32 %v1164_v4, %v1163_v59 }
 0x13c   : > { %v938_v10 = vrot.slane %v937_v62, 1  ;;  %v1016_v11 = vrot.slane %v1015_v0, 1  ;;  %v1093_v14 = vsel %vm940_vm4, %v1071_v56, %v1078_v51  ;;  %v1168_v15 = vsel %vm940_vm4, %v1146_v18, %v1153_v60 }
 0x13d   : > { %v943_v16 = vsel %vm942_vm5, %v941_v5, %v932_v19  ;;  %v1019_v21 = vsel %vm942_vm5, %v1018_v6, %v1010_v61  ;;  %v1091_v24 = vrot.slane %v1090_v12, 1  ;;  %v1166_v63 = vrot.slane %v1165_v13, 1 }
 0x13e   : > { %v939_v22 = vadd.f32 %v938_v10, %v937_v62  ;;  %v1017_v23 = vadd.f32 %v1016_v11, %v1015_v0  ;;  %v1094_v9 = vsel %vm942_vm5, %v1093_v14, %v1085_v7  ;;  %v1169_v17 = vsel %vm942_vm5, %v1168_v15, %v1160_v8 }
 0x13f   : > { %v1092_v26 = vadd.f32 %v1091_v24, %v1090_v12  ;;  %v1167_v27 = vadd.f32 %v1166_v63, %v1165_v13 }
 0x140   : > { %v945_v20 = vsel %vm944_vm6, %v943_v16, %v939_v22  ;;  %v1020_v25 = vsel %vm944_vm6, %v1019_v21, %v1017_v23 }
 0x141   : > { %v946_v28 = vsel %vm561_vm1, %v945_v20, -inf  ;;  %v1021_v30 = vsel %vm561_vm1, %v1020_v25, -inf  ;;  %v1095_v32 = vsel %vm944_vm6, %v1094_v9, %v1092_v26  ;;  %v1170_v33 = vsel %vm944_vm6, %v1169_v17, %v1167_v27 }
 0x142   : > { %v947_v50 = vrot.slane %v946_v28, 4  ;;  %v1022_v29 = vrot.slane %v1021_v30, 4  ;;  %v1096_v35 = vsel %vm561_vm1, %v1095_v32, -inf  ;;  %v1171_v31 = vsel %vm561_vm1, %v1170_v33, -inf }
 0x143   : > { %v1097_v40 = vrot.slane %v1096_v35, 4  ;;  %v1172_v41 = vrot.slane %v1171_v31, 4 }
 0x144   : > { %v948_v36 = vmax.f32 %v946_v28, %v947_v50  ;;  %v1023_v39 = vmax.f32 %v1021_v30, %v1022_v29 }
 0x145   : > { %v1098_v44 = vmax.f32 %v1096_v35, %v1097_v40  ;;  %v1173_v45 = vmax.f32 %v1171_v31, %v1172_v41 }
 0x146   : > { %v949_v42 = vrot.slane %v948_v36, 2  ;;  %v1024_v43 = vrot.slane %v1023_v39, 2 }
 0x147   : > { %v1099_v49 = vrot.slane %v1098_v44, 2  ;;  %v1174_v56 = vrot.slane %v1173_v45, 2 }
 0x148   : > { %v950_v46 = vmax.f32 %v948_v36, %v949_v42  ;;  %v1025_v55 = vmax.f32 %v1023_v39, %v1024_v43  ;;  %v511_v43 = vlaneseq }
 0x149   : > { %v1100_v53 = vmax.f32 %v1098_v44, %v1099_v49  ;;  %v1175_v54 = vmax.f32 %v1173_v45, %v1174_v56  ;;  %v548_v45 = vpop.permute.xlu1 %547 }
 0x14a   : > { %v951_v51 = vrot.slane %v950_v46, 1  ;;  %v1026_v52 = vrot.slane %v1025_v55, 1  ;;  %v966_v44 = vshrl.u32 %v511_v43, 7 }
 0x14b   : > { %v1101_v59 = vrot.slane %v1100_v53, 1  ;;  %v1176_v18 = vrot.slane %v1175_v54, 1 }
 0x14c   : > { %v952_v57 = vmax.f32 %v950_v46, %v951_v51  ;;  %v1027_v58 = vmax.f32 %v1025_v55, %v1026_v52  ;;  %v5997_v46 = vsub.s32 0, %v966_v44  ;;  %v5999_v55 = vsub.s32 1, %v966_v44 }
 0x14d   : > { %v1102_v61 = vmax.f32 %v1100_v53, %v1101_v59  ;;  %v1177_v62 = vmax.f32 %v1175_v54, %v1176_v18  ;;  %v6001_v49 = vsub.s32 2, %v966_v44  ;;  %v6003_v51 = vsub.s32 3, %v966_v44 }
 0x14e   : > { %v953_v60 = vsub.f32 %v945_v20, %v952_v57  ;;  %v1028_v19 = vsub.f32 %v1020_v25, %v1027_v58  ;;  %7673 = vst [vmem:[#allocation12_spill] sm:$0xff] %v5997_v46  ;;  %7674 = vst [vmem:[#allocation13_spill] sm:$0xff] %v5999_v55  ;;  %v642_v54 = vadd.f32 %v5944_v1, %v548_v45 }
 0x14f   : > { %v1103_v4 = vsub.f32 %v1095_v32, %v1102_v61  ;;  %v1178_v5 = vsub.f32 %v1170_v33, %v1177_v62  ;;  %7675 = vst [vmem:[#allocation14_spill] sm:$0xff] %v6001_v49  ;;  %7676 = vst [vmem:[#allocation15_spill] sm:$0xff] %v6003_v51  ;;  %v730_v57 = vadd.f32 %v5946_v2, %v548_v45 }
 0x150   : > { %v954_v0 = vmul.f32 1.442695, %v953_v60  ;;  %v1029_v3 = vmul.f32 1.442695, %v1028_v19  ;;  %v818_v58 = vadd.f32 %v5956_v47, %v548_v45  ;;  %v906_v60 = vadd.f32 %v5958_v48, %v548_v45 }
 0x151   : > { %v1104_v6 = vmul.f32 1.442695, %v1103_v4  ;;  %v1179_v7 = vmul.f32 1.442695, %v1178_v5 }
 0x152   : > { %5565 = vpow2.f32 %v954_v0 }
 0x153   : > { %5567 = vpow2.f32 %v1029_v3 }
 0x154   : > { %5569 = vpow2.f32 %v1104_v6 }
 0x155   : > { %5571 = vpow2.f32 %v1179_v7 }
 0x15f   : > { %v5566_v8 = vpop.eup %5565 }
 0x160   : > { %v5568_v10 = vpop.eup %5567  ;;  %v956_v11 = vsel %vm561_vm1, %v5566_v8, 0.0 }
 0x161   : > { %v5990_v12 = vpop.eup %5569  ;;  %v1031_v13 = vsel %vm561_vm1, %v5568_v10, 0.0  ;;  %v957_v14 = vrot.slane %v956_v11, 4 }
 0x162   : > { %v5572_v15 = vpop.eup %5571  ;;  %v1032_v16 = vrot.slane %v1031_v13, 4  ;;  %v1106_v21 = vsel %vm561_vm1, %v5990_v12, 0.0 }
 0x163   : > { %v958_v22 = vadd.f32 %v957_v14, %v956_v11  ;;  %v1107_v23 = vrot.slane %v1106_v21, 4  ;;  %v1181_v24 = vsel %vm561_vm1, %v5572_v15, 0.0 }
 0x164   : > { %v1033_v63 = vadd.f32 %v1032_v16, %v1031_v13  ;;  %v1182_v9 = vrot.slane %v1181_v24, 4 }
 0x165   : > { %v959_v17 = vrot.slane %v958_v22, 2  ;;  %v1108_v20 = vadd.f32 %v1107_v23, %v1106_v21 }
 0x166   : > { %v1034_v25 = vrot.slane %v1033_v63, 2  ;;  %v1183_v26 = vadd.f32 %v1182_v9, %v1181_v24 }
 0x167   : > { %v960_v27 = vadd.f32 %v959_v17, %v958_v22  ;;  %v1109_v28 = vrot.slane %v1108_v20, 2 }
 0x168   : > { %v1035_v30 = vadd.f32 %v1034_v25, %v1033_v63  ;;  %v1184_v50 = vrot.slane %v1183_v26, 2 }
 0x169   : > { %v961_v29 = vrot.slane %v960_v27, 1  ;;  %v1110_v32 = vadd.f32 %v1109_v28, %v1108_v20 }
 0x16a   : > { %v1036_v33 = vrot.slane %v1035_v30, 1  ;;  %v1185_v35 = vadd.f32 %v1184_v50, %v1183_v26 }
 0x16b   : > { %v962_v31 = vadd.f32 %v961_v29, %v960_v27  ;;  %v1111_v36 = vrot.slane %v1110_v32, 1 }
 0x16c   : > { %v1037_v39 = vadd.f32 %v1036_v33, %v1035_v30  ;;  %v1186_v40 = vrot.slane %v1185_v35, 1 }
 0x16d   : > { %5573 = vrcp.f32 %v962_v31  ;;  %v1112_v41 = vadd.f32 %v1111_v36, %v1110_v32  ;;  %v821_v31 = vsel %vm561_vm1, %v5875_v37, 0.0  ;;  %v1235_v37 = vld [vmem:[%s7631_s3 + $0x50] sm:$0xff] }
 0x16e   : > { %5575 = vrcp.f32 %v1037_v39  ;;  %v1187_v42 = vadd.f32 %v1186_v40, %v1185_v35  ;;  %5213 = vmatprep.mubr.msk.f32.mxu0 %vm1239_vm7, %v1235_v37 }
 0x16f   : > { %5577 = vrcp.f32 %v1112_v41 }
 0x170   : > { %5579 = vrcp.f32 %v1187_v42 }
 0x17a   : > { %v5574_v56 = vpop.eup %5573 }
 0x17b   : > { %v5576_v52 = vpop.eup %5575  ;;  %v964_v53 = vmul.f32 %v5574_v56, %v5566_v8  ;;  %v909_v56 = vsel %vm561_vm1, %v5877_v38, 0.0  ;;  %v1442_v38 = vld [vmem:[%s7631_s3 + $0x98] sm:$0xff] }
 0x17c   : > { %v1039_v59 = vmul.f32 %v5576_v52, %v5568_v10  ;;  %v5578_v18 = vpop.eup %5577 }
 0x17d   : > { %v968_v19 = vrot.slane %v964_v53, %v5997_v46  ;;  %v973_v61 = vrot.slane %v964_v53, %v5999_v55  ;;  %v979_v62 = vrot.slane %v964_v53, %v6001_v49  ;;  %v5580_v0 = vpop.eup %5579  ;;  %v985_v2 = vrot.slane %v964_v53, %v6003_v51  ;;  %v1441_v53 = vld [vmem:[%s7631_s3 + $0x90] sm:$0xff] }
 0x17e   : > { %v1043_v3 = vrot.slane %v1039_v59, %v5997_v46  ;;  %v1048_v4 = vrot.slane %v1039_v59, %v5999_v55  ;;  %v1054_v1 = vrot.slane %v1039_v59, %v6001_v49  ;;  %v1060_v48 = vrot.slane %v1039_v59, %v6003_v51  ;;  %v735_v59 = vpop.xlane.xlu1 %734 }
 0x17f   : > { %v969_v47 = vmul.f32 %v968_v19, %v642_v54  ;;  %v974_v5 = vmul.f32 %v973_v61, %v730_v57  ;;  %v980_v10 = vmul.f32 %v979_v62, %v818_v58  ;;  %v1114_v11 = vmul.f32 %v5578_v18, %v5990_v12  ;;  %v647_v18 = vpop.xlane.xlu0 %646 }
 0x180   : > { %v1044_v6 = vmul.f32 %v1043_v3, %v642_v54  ;;  %v1049_v7 = vmul.f32 %v1048_v4, %v730_v57  ;;  %v1189_v13 = vmul.f32 %v5580_v0, %v5572_v15  ;;  %v1055_v16 = vmul.f32 %v1054_v1, %v818_v58 }
 0x181   : > { %v975_v8 = vadd.f32 %v974_v5, %v969_v47  ;;  %v986_v21 = vmul.f32 %v985_v2, %v906_v60  ;;  %v1118_v23 = vrot.slane %v1114_v11, %v5997_v46  ;;  %v1123_v24 = vrot.slane %v1114_v11, %v5999_v55 }
 0x182   : > { %v1050_v14 = vadd.f32 %v1049_v7, %v1044_v6  ;;  %v1129_v63 = vrot.slane %v1114_v11, %v6001_v49  ;;  %v1061_v17 = vmul.f32 %v1060_v48, %v906_v60  ;;  %v1193_v20 = vrot.slane %v1189_v13, %v5997_v46 }
 0x183   : > { %v981_v22 = vadd.f32 %v980_v10, %v975_v8  ;;  %v1198_v25 = vrot.slane %v1189_v13, %v5999_v55  ;;  %v1119_v27 = vmul.f32 %v1118_v23, %v642_v54  ;;  %v1124_v12 = vmul.f32 %v1123_v24, %v730_v57  ;;  %v1232_v23 = vld [vmem:[%s7631_s3 + $0x38] sm:$0xff] }
 0x184   : > { %v1056_v9 = vadd.f32 %v1055_v16, %v1050_v14  ;;  %v1135_v15 = vrot.slane %v1114_v11, %v6003_v51  ;;  %v1194_v30 = vmul.f32 %v1193_v20, %v642_v54  ;;  %v1130_v32 = vmul.f32 %v1129_v63, %v818_v58  ;;  %v1231_v54 = vld [vmem:[%s7631_s3 + $0x30] sm:$0xff]  ;;  %v1233_v63 = vld [vmem:[%s7631_s3 + $0x40] sm:$0xff]  ;;  %v1234_v20 = vld [vmem:[%s7631_s3 + $0x48] sm:$0xff] }
 0x185   : > { %v987_v26 = vadd.f32 %v986_v21, %v981_v22  ;;  %v1199_v50 = vmul.f32 %v1198_v25, %v730_v57  ;;  %v1125_v29 = vadd.f32 %v1124_v12, %v1119_v27  ;;  %v1204_v33 = vrot.slane %v1189_v13, %v6001_v49  ;;  %5221 = vmatprep.mubr.msk.f32.mxu1 %vm551_vm2, %v1231_v54  ;;  %v1440_v57 = vld [vmem:[%s7631_s3 + $0x88] sm:$0xff]  ;;  %v1458_v25 = vld [vmem:[%s5852_s14] sm:$0x7] }
 0x186   : > { %v1062_v28 = vadd.f32 %v1061_v17, %v1056_v9  ;;  %v1210_v35 = vrot.slane %v1189_v13, %v6003_v51  ;;  %v1136_v40 = vmul.f32 %v1135_v15, %v906_v60  ;;  %v1236_v9 = vld [vmem:[%s7631_s3 + $0x58] sm:$0xff]  ;;  %v1237_v17 = vld [vmem:[%s7631_s3 + $0x60] sm:$0xff]  ;;  %v1238_v27 = vld [vmem:[%s7631_s3 + $0x68] sm:$0xff] }
 0x187   : > { %988 = vadd.xlane.f32.xlu1 %v987_v26  ;;  %v1200_v36 = vadd.f32 %v1199_v50, %v1194_v30  ;;  %v1131_v39 = vadd.f32 %v1130_v32, %v1125_v29  ;;  %v1205_v41 = vmul.f32 %v1204_v33, %v818_v58  ;;  %v512_v58 = vand.u32 127, %v511_v43  ;;  %v4839_v26 = vld [vmem:[%s5852_s14 + $0x4] sm:$0x7]  ;;  %v6107_v15 = vld [vmem:[%s5852_s14 + $0xc] sm:$0x7] }
 0x188   : > { %1063 = vadd.xlane.f32.xlu0 %v1062_v28  ;;  %v1211_v45 = vmul.f32 %v1210_v35, %v906_v60  ;;  %v1437_v12 = vld [vmem:[%s7631_s3 + $0x70] sm:$0xff]  ;;  %v6114_v28 = vld [vmem:[%s5852_s14 + $0x8] sm:$0x7]  ;;  %v1439_v50 = vld [vmem:[%s7631_s3 + $0x80] sm:$0xff]  ;;  %v1552_v29 = vsel %vm944_vm6, %v1458_v25, 0.0  ;;  %v1640_v32 = vsel %vm944_vm6, %v4839_v26, 0.0 }
 0x189   : > { %v1137_v42 = vadd.f32 %v1136_v40, %v1131_v39  ;;  %v1206_v44 = vadd.f32 %v1205_v41, %v1200_v36  ;;  %vm516_vm8 = vcmp.eq.s32.totalorder %v512_v58, 1  ;;  %vm513_vm9 = vcmp.eq.s32.totalorder %v512_v58, 0  ;;  %v1438_v30 = vld [vmem:[%s7631_s3 + $0x78] sm:$0xff] }
 0x18a   : > { %vm519_vm10 = vcmp.eq.s32.totalorder %v512_v58, 2  ;;  %v6049_v60 = vsel %vm516_vm8, 1.0, %v5689_v34  ;;  %v6052_v19 = vsel %vm513_vm9, 1.0, %v5689_v34  ;;  %vm522_vm11 = vcmp.eq.s32.totalorder %v512_v58, 3 }
 0x18b   : > { %822 = vadd.xlane.f32.xlu1 %v821_v31  ;;  %v1212_v52 = vadd.f32 %v1211_v45, %v1206_v44  ;;  %7677 = vst [vmem:[#allocation16_spill] sm:$0xff] %v6049_v60  ;;  %7678 = vst [vmem:[#allocation17_spill] sm:$0xff] %v6052_v19  ;;  %v6055_v0 = vsel %vm519_vm10, 1.0, %v5689_v34  ;;  %v1217_v3 = vmul.f32 %v6049_v60, %v735_v59  ;;  %v6063_v6 = vsel %vm522_vm11, 1.0, %v5689_v34 }
 0x18c   : > { %1138 = vadd.xlane.f32.xlu0 %v1137_v42  ;;  %7679 = vst [vmem:[#allocation18_spill] sm:$0xff] %v6055_v0  ;;  %v1215_v43 = vmul.f32 %v6052_v19, %v647_v18  ;;  %7680 = vst [vmem:[#allocation19_spill] sm:$0xff] %v6063_v6 }
 0x18e   : > { %v1218_v7 = vadd.f32 %v1217_v3, %v1215_v43 }
 0x18f   : > { %910 = vadd.xlane.f32.xlu1 %v909_v56 }
 0x190   : > { %1213 = vadd.xlane.f32.xlu0 %v1212_v52 }
 0x1a0   : > { %1450 = vperm.xlu1 %5564, %v1441_v53  }
 0x1a4   : > { %1455 = vperm.xlu1 %5564, %v1442_v38  }
 0x1a6   : > { %1445 = vperm.xlu0 %5563, %v1440_v57  }
 0x1c5   : > { %1553 = vadd.xlane.f32.xlu0 %v1552_v29 }
 0x1c9   : > { %1641 = vadd.xlane.f32.xlu0 %v1640_v32 }
 0x210   : > { %v989_v61 = vpop.xlane.xlu1 %988 }
 0x211   : > { %v1064_v62 = vpop.xlane.xlu0 %1063  ;;  %v1223_v2 = vmul.f32 %v6052_v19, %v989_v61 }
 0x212   : > { %v1225_v1 = vmul.f32 %v6049_v60, %v1064_v62 }
 0x214   : > { %v823_v4 = vpop.xlane.xlu1 %822  ;;  %v1226_v10 = vadd.f32 %v1225_v1, %v1223_v2 }
 0x215   : > { %v1219_v47 = vmul.f32 %v6055_v0, %v823_v4  ;;  %v1139_v5 = vpop.xlane.xlu0 %1138 }
 0x216   : > { %v1227_v48 = vmul.f32 %v6055_v0, %v1139_v5 }
 0x217   : > { %v1220_v11 = vadd.f32 %v1219_v47, %v1218_v7 }
 0x218   : > { %v911_v8 = vpop.xlane.xlu1 %910  ;;  %v1228_v16 = vadd.f32 %v1227_v48, %v1226_v10 }
 0x219   : > { %v1221_v13 = vmul.f32 %v6063_v6, %v911_v8  ;;  %v1214_v14 = vpop.xlane.xlu0 %1213 }
 0x21a   : > { %v1229_v21 = vmul.f32 %v6063_v6, %v1214_v14 }
 0x21b   : > { %v1222_v22 = vadd.f32 %v1221_v13, %v1220_v11 }
 0x21c   : > { %v1230_v24 = vadd.f32 %v1229_v21, %v1228_v16  ;;  %v6167_v54 = vpop.permute.xlu1 %1450 }
 0x21d   : > { %5219 = vmatprep.subr.msk.mxu1 %vm561_vm1, %v1222_v22 }
 0x21e   : > { %5220 = vmatpush3.msk.msra.mxu1 %vm561_vm1, %v1222_v22  ;;  %5211 = vmatprep.subr.mxu0 %v1230_v24 }
 0x21f   : > { %5222 = vmatmul.mubr.msk.f32.vlgmr.msra.gmra.mxu1 %vm551_vm2, %v1232_v23  ;;  %5212 = vmatpush3.msra.mxu0 %v1230_v24 }
 0x220   : > { %5224 = vmatprep.mubr.msk.f32.mxu1 %vm551_vm2, %v1233_v63  ;;  %5214 = vmatmul.mubr.msk.f32.vlgmr.msra.gmra.mxu0 %vm1239_vm7, %v1236_v9 }
 0x221   : > { %5227 = vmatprep.subr.mxu0 %v5689_v34  ;;  %5216 = vmatprep.mubr.msk.f32.mxu0 %vm1239_vm7, %v1237_v17  ;;  %v1446_v38 = vpop.permute.xlu0 %1445 }
 0x222   : > { %5238 = vmatprep.subr.mxu1 %v5689_v34  ;;  %5228 = vmatpush3.msk.msra.mxu0 %vm944_vm6, %v1458_v25 }
 0x223   : > { %5225 = vmatmul.mubr.msk.f32.gmra.mxu1 %vm551_vm2, %v1234_v20  ;;  %5249 = vmatprep.subr.mxu0 %v5689_v34 }
 0x224   : > { %5239 = vmatpush3.msk.msra.mxu1 %vm944_vm6, %v4839_v26  ;;  %5240 = vmatprep.mubr.msk.f32.mxu1 %vm5690_vm3, %v5689_v34 }
 0x225   : > { %5217 = vmatmul.mubr.msk.f32.gmra.mxu0 %vm1239_vm7, %v1238_v27  ;;  %5260 = vmatprep.subr.mxu1 %v5689_v34 }
 0x226   : > { %5229 = vmatprep.mubr.msk.f32.mxu0 %vm5690_vm3, %v5689_v34 }
 0x227   : > { %5241 = vmatmul.mubr.msk.f32.vlgmr.msra.gmra.mxu1 %vm1459_vm12, %v1437_v12 }
 0x228   : > { %5243 = vmatprep.mubr.msk.f32.mxu1 %vm5690_vm3, %v5689_v34  ;;  %5261 = vmatpush3.msk.msra.mxu1 %vm944_vm6, %v6107_v15 }
 0x229   : > { %5230 = vmatmul.mubr.msk.f32.vlgmr.msra.gmra.mxu0 %vm1459_vm12, %v1437_v12 }
 0x22a   : > { %5232 = vmatprep.mubr.msk.f32.mxu0 %vm5690_vm3, %v5689_v34  ;;  %5250 = vmatpush3.msk.msra.mxu0 %vm944_vm6, %v6114_v28 }
 0x22b   : > { %5244 = vmatmul.mubr.msk.f32.gmra.mxu1 %vm1459_vm12, %v1438_v30 }
 0x22c   : > { %5246 = vmatprep.mubr.msk.f32.mxu1 %vm5690_vm3, %v5689_v34 }
 0x22d   : > { %5233 = vmatmul.mubr.msk.f32.gmra.mxu0 %vm1459_vm12, %v1438_v30 }
 0x22e   : > { %5235 = vmatprep.mubr.msk.f32.mxu0 %vm5690_vm3, %v5689_v34 }
 0x22f   : > { %5247 = vmatmul.mubr.msk.f32.gmra.mxu1 %vm1459_vm12, %v1439_v50 }
 0x230   : > { %5262 = vmatprep.mubr.msk.f32.mxu1 %vm5690_vm3, %v5689_v34 }
 0x231   : > { %5236 = vmatmul.mubr.msk.f32.gmra.mxu0 %vm1459_vm12, %v1439_v50 }
 0x232   : > { %5251 = vmatprep.mubr.msk.f32.mxu0 %vm5690_vm3, %v5689_v34 }
 0x233   : > { %5263 = vmatmul.mubr.msk.f32.vlgmr.msra.gmra.mxu1 %vm1459_vm12, %v1437_v12 }
 0x234   : > { %5265 = vmatprep.mubr.msk.f32.mxu1 %vm5690_vm3, %v5689_v34 }
 0x235   : > { %5252 = vmatmul.mubr.msk.f32.vlgmr.msra.gmra.mxu0 %vm1459_vm12, %v1437_v12 }
 0x236   : > { %5254 = vmatprep.mubr.msk.f32.mxu0 %vm5690_vm3, %v5689_v34 }
 0x237   : > { %5266 = vmatmul.mubr.msk.f32.gmra.mxu1 %vm1459_vm12, %v1438_v30 }
 0x238   : > { %5268 = vmatprep.mubr.msk.f32.mxu1 %vm5690_vm3, %v5689_v34 }
 0x239   : > { %5255 = vmatmul.mubr.msk.f32.gmra.mxu0 %vm1459_vm12, %v1438_v30 }
 0x23a   : > { %5257 = vmatprep.mubr.msk.f32.mxu0 %vm5690_vm3, %v5689_v34 }
 0x23b   : > { %5269 = vmatmul.mubr.msk.f32.gmra.mxu1 %vm1459_vm12, %v1439_v50 }
 0x23d   : > { %5258 = vmatmul.mubr.msk.f32.gmra.mxu0 %vm1459_vm12, %v1439_v50 }
 0x2df   : > { %v5223_v33 = vpop.f32.mrf.mxu1 }
 0x2e0   : > { %v5215_v35 = vpop.f32.mrf.mxu0 }
 0x2e1   : > { %v1418_v31 = vpop.f32.mrf.mxu1  ;;  %v6159_v36 = vadd.f32 %v5223_v33, %v5215_v35 }
 0x2e2   : > { %v1318_v39 = vpop.f32.mrf.mxu0 }
 0x2e3   : > { %v5226_v40 = vpop.f32.mrf.mxu1  ;;  %v6161_v41 = vadd.f32 %v1418_v31, %v1318_v39 }
 0x2e5   : > { %v5218_v34 = vpop.f32.mrf.mxu0  ;;  %v1428_v42 = vpop.f32.mrf.mxu1 }
 0x2e6   : > { %v6163_v44 = vadd.f32 %v5226_v40, %v5218_v34 }
 0x2e7   : > { %v1328_v45 = vpop.f32.mrf.mxu0  ;;  %v1626_v56 = vpop.f32.mrf.mxu1 }
 0x2e8   : > { %v6165_v52 = vadd.f32 %v1428_v42, %v1328_v45  ;;  %v6171_v18 = vadd.f32 %v1626_v56, %v1446_v38 }
 0x2e9   : > { %v1538_v53 = vpop.f32.mrf.mxu0  ;;  %v5242_v37 = vpop.f32.mrf.mxu1 }
 0x2ea   : > { %v6169_v59 = vadd.f32 %v1538_v53, %v1446_v38 }
 0x2eb   : > { %v5231_v57 = vpop.f32.mrf.mxu0  ;;  %v1631_v58 = vpop.f32.mrf.mxu1 }
 0x2ec   : > { %v1632_v61 = vadd.f32 %v1631_v58, %v6167_v54 }
 0x2ed   : > { %v1543_v62 = vpop.f32.mrf.mxu0  ;;  %v5245_v3 = vpop.f32.mrf.mxu1 }
 0x2ee   : > { %v1544_v43 = vadd.f32 %v1543_v62, %v6167_v54  ;;  %v1826_v4 = vmul.f32 %v1632_v61, %v6169_v59  ;;  %v1901_v1 = vmul.f32 %v1632_v61, %v6171_v18 }
 0x2ef   : > { %v5234_v2 = vpop.f32.mrf.mxu0  ;;  %v6177_v47 = vpop.f32.mrf.mxu1 }
 0x2f0   : > { %v1819_v5 = vmul.f32 %v1544_v43, %v6169_v59  ;;  %v1894_v7 = vmul.f32 %v6171_v18, %v1544_v43  ;;  %v1827_v48 = vrot.slane %v1826_v4, 4  ;;  %v1902_v8 = vrot.slane %v1901_v1, 4 }
 0x2f1   : > { %v6181_v10 = vpop.f32.mrf.mxu0  ;;  %v5248_v11 = vpop.f32.mrf.mxu1 }
 0x2f2   : > { %v1820_v13 = vrot.slane %v1819_v5, 4  ;;  %v1895_v14 = vrot.slane %v1894_v7, 4  ;;  %v1828_v16 = vadd.f32 %v1827_v48, %v1826_v4  ;;  %v1903_v21 = vadd.f32 %v1902_v8, %v1901_v1 }
 0x2f3   : > { %v5237_v22 = vpop.f32.mrf.mxu0  ;;  %v1802_v23 = vpop.f32.mrf.mxu1 }
 0x2f4   : > { %v1821_v24 = vadd.f32 %v1820_v13, %v1819_v5  ;;  %v1896_v63 = vadd.f32 %v1895_v14, %v1894_v7  ;;  %v1829_v9 = vrot.slane %v1828_v16, 2  ;;  %v6183_v20 = vadd.f32 %v1802_v23, %v1446_v38 }
 0x2f5   : > { %v1714_v17 = vpop.f32.mrf.mxu0  ;;  %v5264_v25 = vpop.f32.mrf.mxu1  ;;  %v1904_v12 = vrot.slane %v1903_v21, 2 }
 0x2f6   : > { %v1822_v26 = vrot.slane %v1821_v24, 2  ;;  %v1897_v27 = vrot.slane %v1896_v63, 2  ;;  %v1830_v30 = vadd.f32 %v1829_v9, %v1828_v16  ;;  %v6185_v50 = vadd.f32 %v1714_v17, %v1446_v38 }
 0x2f7   : > { %v2044_v29 = vmul.f32 %v6183_v20, %v1544_v43  ;;  %v2051_v32 = vmul.f32 %v6183_v20, %v1632_v61  ;;  %v5253_v33 = vpop.f32.mrf.mxu0  ;;  %v1807_v35 = vpop.f32.mrf.mxu1  ;;  %v1905_v53 = vadd.f32 %v1904_v12, %v1903_v21 }
 0x2f8   : > { %v1823_v31 = vadd.f32 %v1822_v26, %v1821_v24  ;;  %v1969_v39 = vmul.f32 %v6185_v50, %v1544_v43  ;;  %v1976_v40 = vmul.f32 %v6185_v50, %v1632_v61  ;;  %v1898_v37 = vadd.f32 %v1897_v27, %v1896_v63 }
 0x2f9   : > { %v2045_v34 = vrot.slane %v2044_v29, 4  ;;  %v2052_v42 = vrot.slane %v2051_v32, 4  ;;  %v1719_v45 = vpop.f32.mrf.mxu0  ;;  %v5267_v56 = vpop.f32.mrf.mxu1  ;;  %v1831_v57 = vrot.slane %v1830_v30, 1  ;;  %v1906_v8 = vrot.slane %v1905_v53, 1 }
 0x2fa   : > { %v1970_v38 = vrot.slane %v1969_v39, 4  ;;  %v1977_v58 = vrot.slane %v1976_v40, 4  ;;  %v1824_v4 = vrot.slane %v1823_v31, 1  ;;  %v1720_v1 = vadd.f32 %v1719_v45, %v6167_v54 }
 0x2fb   : > { %v5256_v62 = vpop.f32.mrf.mxu0  ;;  %v6191_v3 = vpop.f32.mrf.mxu1  ;;  %v2046_v43 = vadd.f32 %v2045_v34, %v2044_v29  ;;  %v2053_v7 = vadd.f32 %v2052_v42, %v2051_v32  ;;  %v1899_v14 = vrot.slane %v1898_v37, 1  ;;  %v1832_v16 = vadd.f32 %v1831_v57, %v1830_v30 }
 0x2fc   : > { %v1971_v2 = vadd.f32 %v1970_v38, %v1969_v39  ;;  %v1978_v5 = vadd.f32 %v1977_v58, %v1976_v40  ;;  %v1833_v11 = vmul.f32 %v1720_v1, %v6169_v59  ;;  %v1908_v13 = vmul.f32 %v1720_v1, %v6171_v18 }
 0x2fd   : > { %v6194_v61 = vpop.f32.mrf.mxu0  ;;  %v5270_v48 = vpop.f32.mrf.mxu1  ;;  %v1983_v9 = vmul.f32 %v1720_v1, %v6185_v50  ;;  %v2058_v17 = vmul.f32 %v6183_v20, %v1720_v1  ;;  %v1825_v25 = vadd.f32 %v1824_v4, %v1823_v31  ;;  %v2047_v26 = vrot.slane %v2046_v43, 2 }
 0x2fe   : > { %v1972_v21 = vrot.slane %v1971_v2, 2  ;;  %v1979_v22 = vrot.slane %v1978_v5, 2  ;;  %v1834_v24 = vrot.slane %v1833_v11, 4  ;;  %v1909_v63 = vrot.slane %v1908_v13, 4 }
 0x2ff   : > { %v5259_v23 = vpop.f32.mrf.mxu0  ;;  %v2054_v27 = vrot.slane %v2053_v7, 2  ;;  %v1808_v12 = vadd.f32 %v1807_v35, %v6167_v54  ;;  %v1984_v33 = vrot.slane %v1983_v9, 4  ;;  %v2059_v39 = vrot.slane %v2058_v17, 4 }
 0x300   : > { %v1835_v29 = vadd.f32 %v1834_v24, %v1833_v11  ;;  %v1910_v32 = vadd.f32 %v1909_v63, %v1908_v13  ;;  %v1900_v40 = vadd.f32 %v1899_v14, %v1898_v37  ;;  %v1907_v30 = vadd.f32 %v1906_v8, %v1905_v53 }
 0x301   : > { %v1973_v34 = vadd.f32 %v1972_v21, %v1971_v2  ;;  %v1980_v42 = vadd.f32 %v1979_v22, %v1978_v5  ;;  %v1985_v57 = vadd.f32 %v1984_v33, %v1983_v9  ;;  %v2060_v38 = vadd.f32 %v2059_v39, %v2058_v17 }
 0x302   : > { %v1836_v45 = vrot.slane %v1835_v29, 2  ;;  %v1911_v56 = vrot.slane %v1910_v32, 2  ;;  %v1847_v58 = vsel %vm940_vm4, %v1825_v25, %v1832_v16  ;;  %v2048_v62 = vadd.f32 %v2047_v26, %v2046_v43 }
 0x303   : > { %v2055_v31 = vadd.f32 %v2054_v27, %v2053_v7  ;;  %v1840_v4 = vmul.f32 %v1808_v12, %v6169_v59  ;;  %v1986_v35 = vrot.slane %v1985_v57, 2  ;;  %v2061_v48 = vrot.slane %v2060_v38, 2 }
 0x304   : > { %v1837_v1 = vadd.f32 %v1836_v45, %v1835_v29  ;;  %v1912_v54 = vadd.f32 %v1911_v56, %v1910_v32  ;;  %v1974_v11 = vrot.slane %v1973_v34, 1  ;;  %v1915_v53 = vmul.f32 %v1808_v12, %v6171_v18 }
 0x305   : > { %v1841_v13 = vrot.slane %v1840_v4, 4  ;;  %v1990_v37 = vmul.f32 %v1808_v12, %v6185_v50  ;;  %v1981_v2 = vrot.slane %v1980_v42, 1  ;;  %v1987_v8 = vadd.f32 %v1986_v35, %v1985_v57 }
 0x306   : > { %v1838_v5 = vrot.slane %v1837_v1, 1  ;;  %v2062_v14 = vadd.f32 %v2061_v48, %v2060_v38  ;;  %v1916_v16 = vrot.slane %v1915_v53, 4  ;;  %v2065_v7 = vmul.f32 %v1808_v12, %v6183_v20 }
 0x307   : > { %v1842_v21 = vadd.f32 %v1841_v13, %v1840_v4  ;;  %v1991_v43 = vrot.slane %v1990_v37, 4  ;;  %v2049_v59 = vrot.slane %v2048_v62, 1  ;;  %v2056_v22 = vrot.slane %v2055_v31, 1 }
 0x308   : > { %v1913_v23 = vrot.slane %v1912_v54, 1  ;;  %v1988_v24 = vrot.slane %v1987_v8, 1  ;;  %v1917_v9 = vadd.f32 %v1916_v16, %v1915_v53  ;;  %v2066_v25 = vrot.slane %v2065_v7, 4 }
 0x309   : > { %v1843_v63 = vrot.slane %v1842_v21, 2  ;;  %v1992_v17 = vadd.f32 %v1991_v43, %v1990_v37  ;;  %v1975_v18 = vadd.f32 %v1974_v11, %v1973_v34  ;;  %v1982_v26 = vadd.f32 %v1981_v2, %v1980_v42 }
 0x30a   : > { %v1839_v50 = vadd.f32 %v1838_v5, %v1837_v1  ;;  %v2063_v27 = vrot.slane %v2062_v14, 1  ;;  %v1918_v32 = vrot.slane %v1917_v9, 2  ;;  %v2067_v39 = vadd.f32 %v2066_v25, %v2065_v7 }
 0x30b   : > { %v1844_v29 = vadd.f32 %v1843_v63, %v1842_v21  ;;  %v1993_v33 = vrot.slane %v1992_v17, 2  ;;  %v2050_v45 = vadd.f32 %v2049_v59, %v2048_v62  ;;  %v2057_v56 = vadd.f32 %v2056_v22, %v2055_v31 }
 0x30c   : > { %v1914_v57 = vadd.f32 %v1913_v23, %v1912_v54  ;;  %v1989_v20 = vadd.f32 %v1988_v24, %v1987_v8  ;;  %v1919_v38 = vadd.f32 %v1918_v32, %v1917_v9  ;;  %v2068_v35 = vrot.slane %v2067_v39, 2 }
 0x30d   : > { %v1845_v12 = vrot.slane %v1844_v29, 1  ;;  %v1994_v4 = vadd.f32 %v1993_v33, %v1992_v17  ;;  %v1922_v48 = vsel %vm940_vm4, %v1900_v40, %v1907_v30  ;;  %v1997_v13 = vsel %vm940_vm4, %v1975_v18, %v1982_v26 }
 0x30e   : > { %v1848_v34 = vsel %vm942_vm5, %v1847_v58, %v1839_v50  ;;  %v2064_v42 = vadd.f32 %v2063_v27, %v2062_v14  ;;  %v1920_v11 = vrot.slane %v1919_v38, 1  ;;  %v2069_v37 = vadd.f32 %v2068_v35, %v2067_v39 }
 0x30f   : > { %v1846_v1 = vadd.f32 %v1845_v12, %v1844_v29  ;;  %v1995_v53 = vrot.slane %v1994_v4, 1  ;;  %v2072_v62 = vsel %vm940_vm4, %v2050_v45, %v2057_v56  ;;  %v1923_v31 = vsel %vm942_vm5, %v1922_v48, %v1914_v57 }
 0x310   : > { %v1998_v54 = vsel %vm942_vm5, %v1997_v13, %v1989_v20  ;;  %v1921_v5 = vadd.f32 %v1920_v11, %v1919_v38  ;;  %v2070_v40 = vrot.slane %v2069_v37, 1  ;;  %v2073_v30 = vsel %vm942_vm5, %v2072_v62, %v2064_v42 }
 0x311   : > { %v1849_v2 = vsel %vm944_vm6, %v1848_v34, %v1846_v1  ;;  %v1996_v8 = vadd.f32 %v1995_v53, %v1994_v4 }
 0x312   : > { %v1850_v58 = vsel %vm561_vm1, %v1849_v2, -inf  ;;  %v1924_v21 = vsel %vm944_vm6, %v1923_v31, %v1921_v5  ;;  %v2071_v43 = vadd.f32 %v2070_v40, %v2069_v37 }
 0x313   : > { %v1851_v14 = vrot.slane %v1850_v58, 4  ;;  %v1999_v16 = vsel %vm944_vm6, %v1998_v54, %v1996_v8  ;;  %v1925_v7 = vsel %vm561_vm1, %v1924_v21, -inf }
 0x314   : > { %v2000_v59 = vsel %vm561_vm1, %v1999_v16, -inf  ;;  %v1926_v23 = vrot.slane %v1925_v7, 4  ;;  %v2074_v63 = vsel %vm944_vm6, %v2073_v30, %v2071_v43 }
 0x315   : > { %v1852_v22 = vmax.f32 %v1850_v58, %v1851_v14  ;;  %v2001_v24 = vrot.slane %v2000_v59, 4  ;;  %v2075_v9 = vsel %vm561_vm1, %v2074_v63, -inf }
 0x316   : > { %v1927_v25 = vmax.f32 %v1925_v7, %v1926_v23  ;;  %v2076_v26 = vrot.slane %v2075_v9, 4 }
 0x317   : > { %v1853_v17 = vrot.slane %v1852_v22, 2  ;;  %v2002_v18 = vmax.f32 %v2000_v59, %v2001_v24 }
 0x318   : > { %v1928_v27 = vrot.slane %v1927_v25, 2  ;;  %v2077_v32 = vmax.f32 %v2075_v9, %v2076_v26 }
 0x319   : > { %v1854_v50 = vmax.f32 %v1852_v22, %v1853_v17  ;;  %v2003_v29 = vrot.slane %v2002_v18, 2 }
 0x31a   : > { %v1929_v39 = vmax.f32 %v1927_v25, %v1928_v27  ;;  %v2078_v56 = vrot.slane %v2077_v32, 2 }
 0x31b   : > { %v1855_v33 = vrot.slane %v1854_v50, 1  ;;  %v2004_v45 = vmax.f32 %v2002_v18, %v2003_v29 }
 0x31c   : > { %v1930_v20 = vrot.slane %v1929_v39, 1  ;;  %v2079_v38 = vmax.f32 %v2077_v32, %v2078_v56 }
 0x31d   : > { %v1856_v57 = vmax.f32 %v1854_v50, %v1855_v33  ;;  %v2005_v12 = vrot.slane %v2004_v45, 1 }
 0x31e   : > { %v1931_v35 = vmax.f32 %v1929_v39, %v1930_v20  ;;  %v2080_v13 = vrot.slane %v2079_v38, 1 }
 0x31f   : > { %v1857_v4 = vsub.f32 %v1849_v2, %v1856_v57  ;;  %v2006_v48 = vmax.f32 %v2004_v45, %v2005_v12 }
 0x320   : > { %v1932_v42 = vsub.f32 %v1924_v21, %v1931_v35  ;;  %v2081_v11 = vmax.f32 %v2079_v38, %v2080_v13 }
 0x321   : > { %v1858_v34 = vmul.f32 1.442695, %v1857_v4  ;;  %v2007_v1 = vsub.f32 %v1999_v16, %v2006_v48  ;;  %v1456_v48 = vpop.permute.xlu1 %1455 }
 0x322   : > { %v1933_v53 = vmul.f32 1.442695, %v1932_v42  ;;  %v2082_v62 = vsub.f32 %v2074_v63, %v2081_v11  ;;  %v1549_v11 = vadd.f32 %v6181_v10, %v1456_v48 }
 0x323   : > { %5581 = vpow2.f32 %v1858_v34  ;;  %v2008_v37 = vmul.f32 1.442695, %v2007_v1 }
 0x324   : > { %5583 = vpow2.f32 %v1933_v53  ;;  %v2083_v31 = vmul.f32 1.442695, %v2082_v62  ;;  %v1637_v53 = vadd.f32 %v6177_v47, %v1456_v48 }
 0x325   : > { %5585 = vpow2.f32 %v2008_v37  ;;  %v1725_v37 = vadd.f32 %v6194_v61, %v1456_v48 }
 0x326   : > { %5587 = vpow2.f32 %v2083_v31 }
 0x330   : > { %v5582_v54 = vpop.eup %5581 }
 0x331   : > { %v1860_v5 = vsel %vm561_vm1, %v5582_v54, 0.0  ;;  %v5584_v8 = vpop.eup %5583 }
 0x332   : > { %v1861_v2 = vrot.slane %v1860_v5, 4  ;;  %v5586_v40 = vpop.eup %5585  ;;  %v1935_v30 = vsel %vm561_vm1, %v5584_v8, 0.0 }
 0x333   : > { %v5588_v58 = vpop.eup %5587  ;;  %v1936_v14 = vrot.slane %v1935_v30, 4  ;;  %v2010_v16 = vsel %vm561_vm1, %v5586_v40, 0.0 }
 0x334   : > { %v1862_v21 = vadd.f32 %v1861_v2, %v1860_v5  ;;  %v2011_v43 = vrot.slane %v2010_v16, 4  ;;  %v2085_v7 = vsel %vm561_vm1, %v5588_v58, 0.0 }
 0x335   : > { %v1937_v59 = vadd.f32 %v1936_v14, %v1935_v30  ;;  %v2086_v23 = vrot.slane %v2085_v7, 4  ;;  %v1813_v30 = vadd.f32 %v6191_v3, %v1456_v48 }
 0x336   : > { %v1863_v22 = vrot.slane %v1862_v21, 2  ;;  %v2012_v24 = vadd.f32 %v2011_v43, %v2010_v16 }
 0x337   : > { %v1938_v63 = vrot.slane %v1937_v59, 2  ;;  %v2087_v17 = vadd.f32 %v2086_v23, %v2085_v7 }
 0x338   : > { %v1864_v9 = vadd.f32 %v1863_v22, %v1862_v21  ;;  %v2013_v25 = vrot.slane %v2012_v24, 2 }
 0x339   : > { %v1939_v18 = vadd.f32 %v1938_v63, %v1937_v59  ;;  %v2088_v50 = vrot.slane %v2087_v17, 2 }
 0x33a   : > { %v1865_v26 = vrot.slane %v1864_v9, 1  ;;  %v2014_v27 = vadd.f32 %v2013_v25, %v2012_v24 }
 0x33b   : > { %v1940_v29 = vrot.slane %v1939_v18, 1  ;;  %v2089_v33 = vadd.f32 %v2088_v50, %v2087_v17 }
 0x33c   : > { %v1866_v32 = vadd.f32 %v1865_v26, %v1864_v9  ;;  %v2015_v39 = vrot.slane %v2014_v27, 1 }
 0x33d   : > { %v1941_v45 = vadd.f32 %v1940_v29, %v1939_v18  ;;  %v2090_v56 = vrot.slane %v2089_v33, 1 }
 0x33e   : > { %5589 = vrcp.f32 %v1866_v32  ;;  %v2016_v57 = vadd.f32 %v2015_v39, %v2014_v27 }
 0x33f   : > { %5591 = vrcp.f32 %v1941_v45  ;;  %v2091_v20 = vadd.f32 %v2090_v56, %v2089_v33 }
 0x340   : > { %5593 = vrcp.f32 %v2016_v57 }
 0x341   : > { %5595 = vrcp.f32 %v2091_v20 }
 0x34b   : > { %v5590_v12 = vpop.eup %5589 }
 0x34c   : > { %v1868_v38 = vmul.f32 %v5590_v12, %v5582_v54  ;;  %v5592_v4 = vpop.eup %5591 }
 0x34d   : > { %v5594_v35 = vpop.eup %5593  ;;  %v1943_v13 = vmul.f32 %v5592_v4, %v5584_v8 }
 0x34e   : > { %v1872_v34 = vrot.slane %v1868_v38, %v5997_v46  ;;  %v1877_v42 = vrot.slane %v1868_v38, %v5999_v55  ;;  %v1883_v1 = vrot.slane %v1868_v38, %v6001_v49  ;;  %v2018_v62 = vmul.f32 %v5594_v35, %v5586_v40  ;;  %v5596_v2 = vpop.eup %5595 }
 0x34f   : > { %v1947_v31 = vrot.slane %v1943_v13, %v5997_v46  ;;  %v1952_v54 = vrot.slane %v1943_v13, %v5999_v55  ;;  %v1958_v5 = vrot.slane %v1943_v13, %v6001_v49  ;;  %v1889_v8 = vrot.slane %v1868_v38, %v6003_v51 }
 0x350   : > { %v1873_v14 = vmul.f32 %v1872_v34, %v1549_v11  ;;  %v1878_v21 = vmul.f32 %v1877_v42, %v1637_v53  ;;  %v1964_v47 = vrot.slane %v1943_v13, %v6003_v51  ;;  %v1884_v43 = vmul.f32 %v1883_v1, %v1725_v37 }
 0x351   : > { %v1948_v16 = vmul.f32 %v1947_v31, %v1549_v11  ;;  %v1953_v10 = vmul.f32 %v1952_v54, %v1637_v53  ;;  %v2022_v40 = vrot.slane %v2018_v62, %v5997_v46  ;;  %v2027_v7 = vrot.slane %v2018_v62, %v5999_v55  ;;  %v2364_v31 = vld [vmem:[%s7631_s3 + $0x180] sm:$0xff]  ;;  %v2370_v54 = vld [vmem:[%s7631_s3 + $0x1b0] sm:$0xff] }
 0x352   : > { %v1879_v61 = vadd.f32 %v1878_v21, %v1873_v14  ;;  %v2033_v59 = vrot.slane %v2018_v62, %v6001_v49  ;;  %v1959_v23 = vmul.f32 %v1958_v5, %v1725_v37  ;;  %v1890_v24 = vmul.f32 %v1889_v8, %v1813_v30  ;;  %v2365_v5 = vld [vmem:[%s7631_s3 + $0x188] sm:$0xff]  ;;  %v2371_v8 = vld [vmem:[%s7631_s3 + $0x1b8] sm:$0xff] }
 0x353   : > { %v1954_v22 = vadd.f32 %v1953_v10, %v1948_v16  ;;  %v2093_v63 = vmul.f32 %v5596_v2, %v5588_v58  ;;  %v2023_v3 = vmul.f32 %v2022_v40, %v1549_v11  ;;  %v2028_v17 = vmul.f32 %v2027_v7, %v1637_v53  ;;  %v2366_v2 = vld [vmem:[%s7631_s3 + $0x190] sm:$0xff]  ;;  %v2367_v14 = vld [vmem:[%s7631_s3 + $0x198] sm:$0xff]  ;;  %v2373_v21 = vld [vmem:[%s7631_s3 + $0x1c8] sm:$0xff]  ;;  %v1554_v7 = vpop.xlane.xlu0 %1553 }
 0x354   : > { %v1885_v9 = vadd.f32 %v1884_v43, %v1879_v61  ;;  %v2039_v25 = vrot.slane %v2018_v62, %v6003_v51  ;;  %v1965_v26 = vmul.f32 %v1964_v47, %v1813_v30  ;;  %v2034_v33 = vmul.f32 %v2033_v59, %v1725_v37  ;;  %v2369_v62 = vld [vmem:[%s7631_s3 + $0x1a8] sm:$0xff]  ;;  %v2379_v16 = vld [vmem:[%s7631_s3 + $0x1f8] sm:$0xff]  ;;  %v2378_v10 = vld [vmem:[%s7631_s3 + $0x1f0] sm:$0xff] }
 0x355   : > { %v1960_v18 = vadd.f32 %v1959_v23, %v1954_v22  ;;  %v2097_v50 = vrot.slane %v2093_v63, %v5997_v46  ;;  %v2102_v27 = vrot.slane %v2093_v63, %v5999_v55  ;;  %v2029_v32 = vadd.f32 %v2028_v17, %v2023_v3  ;;  %v2377_v47 = vld [vmem:[%s7631_s3 + $0x1e8] sm:$0xff]  ;;  %v2376_v43 = vld [vmem:[%s7631_s3 + $0x1e0] sm:$0xff]  ;;  %v2375_v61 = vld [vmem:[%s7631_s3 + $0x1d8] sm:$0xff] }
 0x356   : > { %v1891_v29 = vadd.f32 %v1890_v24, %v1885_v9  ;;  %v2108_v39 = vrot.slane %v2093_v63, %v6001_v49  ;;  %v2114_v58 = vrot.slane %v2093_v63, %v6003_v51  ;;  %v2040_v12 = vmul.f32 %v2039_v25, %v1813_v30  ;;  %v2374_v40 = vld [vmem:[%s7631_s3 + $0x1d0] sm:$0xff] }
 0x357   : > { %v1966_v45 = vadd.f32 %v1965_v26, %v1960_v18  ;;  %v2098_v56 = vmul.f32 %v2097_v50, %v1549_v11  ;;  %v2103_v57 = vmul.f32 %v2102_v27, %v1637_v53  ;;  %v2035_v20 = vadd.f32 %v2034_v33, %v2029_v32  ;;  %v2362_v11 = vld [vmem:[%s7631_s3 + $0x170] sm:$0xff]  ;;  %v2135_v53 = vld [vmem:[%s7631_s3 + $0xa0] sm:$0xff]  ;;  %v1642_v59 = vpop.xlane.xlu0 %1641 }
 0x358   : > { %1892 = vadd.xlane.f32.xlu0 %v1891_v29  ;;  %v1728_v38 = vsel %vm944_vm6, %v6114_v28, 0.0  ;;  %v2109_v35 = vmul.f32 %v2108_v39, %v1725_v37  ;;  %v2115_v34 = vmul.f32 %v2114_v58, %v1813_v30  ;;  %v1816_v1 = vsel %vm944_vm6, %v6107_v15, 0.0  ;;  %v2139_v28 = vld [vmem:[%s7631_s3 + $0xc0] sm:$0xff]  ;;  %5281 = vmatprep.mubr.msk.f32.mxu1 %vm1459_vm12, %v2135_v53  ;;  %v2363_v37 = vld [vmem:[%s7631_s3 + $0x178] sm:$0xff]  ;;  %v6375_v53 = vld [vmem:[%s5854_s15 + $0x10] sm:$0xff] }
 0x359   : > { %1967 = vadd.xlane.f32.xlu1 %v1966_v45  ;;  %v2104_v4 = vadd.f32 %v2103_v57, %v2098_v56  ;;  %v2041_v48 = vadd.f32 %v2040_v12, %v2035_v20  ;;  %5273 = vmatprep.mubr.msk.f32.mxu0 %vm1239_vm7, %v2139_v28  ;;  %v2368_v15 = vld [vmem:[%s7631_s3 + $0x1a0] sm:$0xff]  ;;  %v2119_v24 = vmul.f32 %v6052_v19, %v1554_v7  ;;  %v2136_v20 = vld [vmem:[%s7631_s3 + $0xa8] sm:$0xff] }
 0x35a   : > { %v2372_v30 = vld [vmem:[%s7631_s3 + $0x1c0] sm:$0xff]  ;;  %v2121_v63 = vmul.f32 %v6049_v60, %v1642_v59  ;;  %v2140_v12 = vld [vmem:[%s7631_s3 + $0xc8] sm:$0xff]  ;;  %v6503_v59 = vld [vmem:[%s7631_s3 + $0x118] sm:$0xff] }
 0x35b   : > { %v2110_v13 = vadd.f32 %v2109_v35, %v2104_v4  ;;  %v6331_v4 = vld [vmem:[%s5854_s15 + $0x58] sm:$0x1]  ;;  %v6335_v35 = vld [vmem:[%s5854_s15 + $0x20] sm:$0xff]  ;;  %v6370_v28 = vld [vmem:[%s5854_s15 + $0x48] sm:$0xff] }
 0x35c   : > { %1729 = vadd.xlane.f32.xlu0 %v1728_v38  ;;  %v2122_v50 = vadd.f32 %v2121_v63, %v2119_v24  ;;  %v6327_v38 = vld [vmem:[%s5854_s15 + $0x28] sm:$0x1]  ;;  %v6522_v24 = vld [vmem:[%s5854_s15 + $0xa0] sm:$0xff] }
 0x35d   : > { %2042 = vadd.xlane.f32.xlu1 %v2041_v48  ;;  %v2116_v42 = vadd.f32 %v2115_v34, %v2110_v13  ;;  %v6341_v48 = vld [vmem:[%s5854_s15 + $0x50] sm:$0xff]  ;;  %v6494_v7 = vld [vmem:[%s5854_s15 + $0xa8] sm:$0xff] }
 0x35e   : > { %v2141_v13 = vld [vmem:[%s7631_s3 + $0xd0] sm:$0xff]  ;;  %v6531_v63 = vld [vmem:[%s7631_s3 + $0x128] sm:$0xff] }
 0x35f   : > { %v2137_v34 = vld [vmem:[%s7631_s3 + $0xb0] sm:$0xff] }
 0x360   : > { %1817 = vadd.xlane.f32.xlu0 %v1816_v1  ;;  %v2138_v1 = vld [vmem:[%s7631_s3 + $0xb8] sm:$0xff] }
 0x361   : > { %2117 = vadd.xlane.f32.xlu1 %v2116_v42  ;;  %v2142_v42 = vld [vmem:[%s7631_s3 + $0xd8] sm:$0xff] }
 0x372   : > { %2382 = vperm.xlu1 %5564, %v2362_v11   ;;  %v6365_v11 = vld [vmem:[%s5854_s15 + $0x18] sm:$0xff] }
 0x376   : > { %2412 = vperm.xlu1 %5564, %v2368_v15   ;;  %2387 = vperm.xlu0 %5563, %v2363_v37   ;;  %v6380_v15 = vld [vmem:[%s5854_s15 + $0x40] sm:$0xff]  ;;  %v6385_v37 = vld [vmem:[%s5854_s15 + $0x8] sm:$0xff] }
 0x37a   : > { %2417 = vperm.xlu1 %5564, %v2369_v62   ;;  %2392 = vperm.xlu0 %5563, %v2364_v31   ;;  %v6390_v62 = vld [vmem:[%s5854_s15 + $0x38] sm:$0xff]  ;;  %v6395_v31 = vld [vmem:[%s5854_s15] sm:$0xff] }
 0x37e   : > { %2422 = vperm.xlu1 %5564, %v2370_v54   ;;  %2397 = vperm.xlu0 %5563, %v2365_v5   ;;  %v6400_v54 = vld [vmem:[%s5854_s15 + $0x30] sm:$0xff]  ;;  %v6407_v5 = vld [vmem:[%s7631_s3 + $0xe0] sm:$0xff] }
 0x382   : > { %2427 = vperm.xlu1 %5564, %v2371_v8   ;;  %2402 = vperm.xlu0 %5563, %v2366_v2   ;;  %v6414_v8 = vld [vmem:[%s7631_s3 + $0xe8] sm:$0xff]  ;;  %v6421_v2 = vld [vmem:[%s7631_s3 + $0xf0] sm:$0xff] }
 0x386   : > { %2432 = vperm.xlu1 %5564, %v2372_v30   ;;  %2407 = vperm.xlu0 %5563, %v2367_v14   ;;  %v6427_v30 = vld [vmem:[%s5854_s15 + $0x88] sm:$0x1]  ;;  %v6434_v14 = vld [vmem:[%s5854_s15 + $0xb8] sm:$0x1] }
 0x38a   : > { %2437 = vperm.xlu1 %5564, %v2373_v21   ;;  %2467 = vperm.xlu0 %5563, %v2379_v16   ;;  %v6443_v21 = vld [vmem:[%s7631_s3 + $0xf8] sm:$0xff]  ;;  %v6450_v16 = vld [vmem:[%s7631_s3 + $0x100] sm:$0xff] }
 0x38e   : > { %2462 = vperm.xlu1 %5564, %v2378_v10   ;;  %2457 = vperm.xlu0 %5563, %v2377_v47   ;;  %v6459_v10 = vld [vmem:[%s5854_s15 + $0x80] sm:$0xff]  ;;  %v6466_v47 = vld [vmem:[%s5854_s15 + $0xb0] sm:$0xff] }
 0x392   : > { %2452 = vperm.xlu1 %5564, %v2376_v43   ;;  %2447 = vperm.xlu0 %5563, %v2375_v61   ;;  %v6475_v43 = vld [vmem:[%s7631_s3 + $0x108] sm:$0xff]  ;;  %v6482_v61 = vld [vmem:[%s7631_s3 + $0x110] sm:$0xff] }
 0x396   : > { %2442 = vperm.xlu1 %5564, %v2374_v40   ;;  %v6488_v40 = vld [vmem:[%s5854_s15 + $0x78] sm:$0xff] }
 0x3e1   : > { %v1893_v22 = vpop.xlane.xlu0 %1892 }
 0x3e2   : > { %v1968_v23 = vpop.xlane.xlu1 %1967  ;;  %v2127_v3 = vmul.f32 %v6052_v19, %v1893_v22  ;;  %v6510_v22 = vld [vmem:[%s7631_s3 + $0x120] sm:$0xff] }
 0x3e3   : > { %v2129_v9 = vmul.f32 %v6049_v60, %v1968_v23  ;;  %v6516_v23 = vld [vmem:[%s5854_s15 + $0x70] sm:$0xff] }
 0x3e5   : > { %v1730_v17 = vpop.xlane.xlu0 %1729  ;;  %v2130_v27 = vadd.f32 %v2129_v9, %v2127_v3  ;;  %v6538_v9 = vld [vmem:[%s7631_s3 + $0x130] sm:$0xff]  ;;  %v6544_v3 = vld [vmem:[%s5854_s15 + $0x68] sm:$0xff] }
 0x3e6   : > { %v2043_v25 = vpop.xlane.xlu1 %2042  ;;  %v2123_v18 = vmul.f32 %v6055_v0, %v1730_v17  ;;  %v6550_v17 = vld [vmem:[%s5854_s15 + $0x98] sm:$0xff] }
 0x3e7   : > { %v2131_v26 = vmul.f32 %v6055_v0, %v2043_v25  ;;  %v2355_v25 = vld [vmem:[%s7631_s3 + $0x138] sm:$0xff] }
 0x3e8   : > { %v2124_v32 = vadd.f32 %v2123_v18, %v2122_v50  ;;  %v2356_v18 = vld [vmem:[%s7631_s3 + $0x140] sm:$0xff]  ;;  %v4932_v50 = vld [vmem:[%s5854_s15 + $0x90] sm:$0xff] }
 0x3e9   : > { %v1818_v29 = vpop.xlane.xlu0 %1817  ;;  %v2132_v45 = vadd.f32 %v2131_v26, %v2130_v27  ;;  %v6568_v26 = vld [vmem:[%s5854_s15 + $0x60] sm:$0xff]  ;;  %v2357_v27 = vld [vmem:[%s7631_s3 + $0x148] sm:$0xff] }
 0x3ea   : > { %v2118_v33 = vpop.xlane.xlu1 %2117  ;;  %v2125_v39 = vmul.f32 %v6063_v6, %v1818_v29  ;;  %v2358_v29 = vld [vmem:[%s7631_s3 + $0x150] sm:$0xff] }
 0x3eb   : > { %v2133_v56 = vmul.f32 %v6063_v6, %v2118_v33  ;;  %v2360_v33 = vld [vmem:[%s7631_s3 + $0x160] sm:$0xff] }
 0x3ec   : > { %v2126_v57 = vadd.f32 %v2125_v39, %v2124_v32  ;;  %v2359_v32 = vld [vmem:[%s7631_s3 + $0x158] sm:$0xff]  ;;  %v2361_v39 = vld [vmem:[%s7631_s3 + $0x168] sm:$0xff] }
 0x3ed   : > { %v2134_v58 = vadd.f32 %v2133_v56, %v2132_v45 }
 0x3ee   : > { %5279 = vmatprep.subr.msk.mxu1 %vm944_vm6, %v2126_v57 }
 0x3ef   : > { %5271 = vmatprep.subr.mxu0 %v2134_v58  ;;  %5280 = vmatpush3.msk.msra.mxu1 %vm944_vm6, %v2126_v57 }
 0x3f0   : > { %5272 = vmatpush3.msra.mxu0 %v2134_v58  ;;  %5282 = vmatmul.mubr.msk.f32.vlgmr.msra.gmra.mxu1 %vm1459_vm12, %v2136_v20  ;;  %v6661_v20 = vpop.permute.xlu1 %2382 }
 0x3f1   : > { %5274 = vmatmul.mubr.msk.f32.vlgmr.msra.gmra.mxu0 %vm1239_vm7, %v2140_v12  ;;  %5287 = vmatprep.subr.msk.mxu0 %vm940_vm4, %v6327_v38 }
 0x3f2   : > { %5326 = vmatprep.subr.msk.mxu1 %vm940_vm4, %v6331_v4  ;;  %5288 = vmatpush3.msk.msra.mxu0 %vm940_vm4, %v6327_v38 }
 0x3f3   : > { %5327 = vmatpush3.msk.msra.mxu1 %vm940_vm4, %v6331_v4  ;;  %5289 = vmatprep.subr.mxu0 %v6335_v35 }
 0x3f4   : > { %5328 = vmatprep.subr.mxu1 %v6341_v48  ;;  %5276 = vmatprep.mubr.msk.f32.mxu0 %vm1239_vm7, %v2141_v13 }
 0x3f5   : > { %5284 = vmatprep.mubr.msk.f32.mxu1 %vm1459_vm12, %v2137_v34  ;;  %5290 = vmatpush3.msra.mxu0 %v6335_v35 }
 0x3f6   : > { %5329 = vmatpush3.msra.mxu1 %v6341_v48  ;;  %5277 = vmatmul.mubr.msk.f32.gmra.mxu0 %vm1239_vm7, %v2142_v42 }
 0x3f7   : > { %5285 = vmatmul.mubr.msk.f32.gmra.mxu1 %vm1459_vm12, %v2138_v1  ;;  %5291 = vmatprep.subr.mxu0 %v6365_v11 }
 0x3f8   : > { %5330 = vmatprep.subr.mxu1 %v6370_v28  ;;  %5292 = vmatpush3.msra.mxu0 %v6365_v11 }
 0x3f9   : > { %5331 = vmatpush3.msra.mxu1 %v6370_v28  ;;  %5293 = vmatprep.subr.mxu0 %v6375_v53 }
 0x3fa   : > { %5332 = vmatprep.subr.mxu1 %v6380_v15  ;;  %5294 = vmatpush3.msra.mxu0 %v6375_v53 }
 0x3fb   : > { %5333 = vmatpush3.msra.mxu1 %v6380_v15  ;;  %5295 = vmatprep.subr.mxu0 %v6385_v37 }
 0x3fc   : > { %5334 = vmatprep.subr.mxu1 %v6390_v62  ;;  %5296 = vmatpush3.msra.mxu0 %v6385_v37 }
 0x3fd   : > { %5335 = vmatpush3.msra.mxu1 %v6390_v62  ;;  %5297 = vmatprep.subr.mxu0 %v6395_v31 }
 0x3fe   : > { %5336 = vmatprep.subr.mxu1 %v6400_v54  ;;  %5298 = vmatpush3.msra.mxu0 %v6395_v31 }
 0x3ff   : > { %5299 = vmatprep.mubr.msk.f32.mxu0 %vm2476_vm13, %v6407_v5  ;;  %5337 = vmatpush3.msra.mxu1 %v6400_v54 }
 0x400   : > { %5338 = vmatprep.mubr.msk.f32.mxu1 %vm2476_vm13, %v6407_v5  ;;  %5300 = vmatmul.mubr.msk.f32.vlgmr.msra.gmra.mxu0 %vm2476_vm13, %v6414_v8 }
 0x401   : > { %5339 = vmatmul.mubr.msk.f32.vlgmr.msra.gmra.mxu1 %vm2476_vm13, %v6414_v8  ;;  %5302 = vmatprep.mubr.msk.f32.mxu0 %vm2476_vm13, %v6421_v2 }
 0x402   : > { %5341 = vmatprep.mubr.msk.f32.mxu1 %vm2476_vm13, %v6421_v2  ;;  %5365 = vmatprep.subr.msk.mxu0 %vm940_vm4, %v6427_v30 }
 0x403   : > { %5366 = vmatpush3.msk.msra.mxu0 %vm940_vm4, %v6427_v30  ;;  %5404 = vmatprep.subr.msk.mxu1 %vm940_vm4, %v6434_v14 }
 0x404   : > { %5303 = vmatmul.mubr.msk.f32.gmra.mxu0 %vm2476_vm13, %v6443_v21  ;;  %5405 = vmatpush3.msk.msra.mxu1 %vm940_vm4, %v6434_v14 }
 0x405   : > { %5342 = vmatmul.mubr.msk.f32.gmra.mxu1 %vm2476_vm13, %v6443_v21  ;;  %5305 = vmatprep.mubr.msk.f32.mxu0 %vm2476_vm13, %v6450_v16 }
 0x406   : > { %5344 = vmatprep.mubr.msk.f32.mxu1 %vm2476_vm13, %v6450_v16  ;;  %5367 = vmatprep.subr.mxu0 %v6459_v10 }
 0x407   : > { %5368 = vmatpush3.msra.mxu0 %v6459_v10  ;;  %5406 = vmatprep.subr.mxu1 %v6466_v47 }
 0x408   : > { %5306 = vmatmul.mubr.msk.f32.gmra.mxu0 %vm2476_vm13, %v6475_v43  ;;  %5407 = vmatpush3.msra.mxu1 %v6466_v47 }
 0x409   : > { %5345 = vmatmul.mubr.msk.f32.gmra.mxu1 %vm2476_vm13, %v6475_v43  ;;  %5308 = vmatprep.mubr.msk.f32.mxu0 %vm2476_vm13, %v6482_v61 }
 0x40a   : > { %5347 = vmatprep.mubr.msk.f32.mxu1 %vm2476_vm13, %v6482_v61  ;;  %5369 = vmatprep.subr.mxu0 %v6488_v40 }
 0x40b   : > { %5370 = vmatpush3.msra.mxu0 %v6488_v40  ;;  %5408 = vmatprep.subr.mxu1 %v6494_v7 }
 0x40c   : > { %5309 = vmatmul.mubr.msk.f32.gmra.mxu0 %vm2476_vm13, %v6503_v59  ;;  %5409 = vmatpush3.msra.mxu1 %v6494_v7 }
 0x40d   : > { %5348 = vmatmul.mubr.msk.f32.gmra.mxu1 %vm2476_vm13, %v6503_v59  ;;  %5311 = vmatprep.mubr.msk.f32.mxu0 %vm2476_vm13, %v6510_v22 }
 0x40e   : > { %5350 = vmatprep.mubr.msk.f32.mxu1 %vm2476_vm13, %v6510_v22  ;;  %5371 = vmatprep.subr.mxu0 %v6516_v23 }
 0x40f   : > { %5372 = vmatpush3.msra.mxu0 %v6516_v23  ;;  %5410 = vmatprep.subr.mxu1 %v6522_v24 }
 0x410   : > { %5312 = vmatmul.mubr.msk.f32.gmra.mxu0 %vm2476_vm13, %v6531_v63  ;;  %5411 = vmatpush3.msra.mxu1 %v6522_v24 }
 0x411   : > { %5351 = vmatmul.mubr.msk.f32.gmra.mxu1 %vm2476_vm13, %v6531_v63  ;;  %5314 = vmatprep.mubr.msk.f32.mxu0 %vm2476_vm13, %v6538_v9 }
 0x412   : > { %5353 = vmatprep.mubr.msk.f32.mxu1 %vm2476_vm13, %v6538_v9  ;;  %5373 = vmatprep.subr.mxu0 %v6544_v3 }
 0x413   : > { %5412 = vmatprep.subr.mxu1 %v6550_v17  ;;  %5374 = vmatpush3.msra.mxu0 %v6544_v3 }
 0x414   : > { %5315 = vmatmul.mubr.msk.f32.gmra.mxu0 %vm2476_vm13, %v2355_v25  ;;  %5413 = vmatpush3.msra.mxu1 %v6550_v17 }
 0x415   : > { %5354 = vmatmul.mubr.msk.f32.gmra.mxu1 %vm2476_vm13, %v2355_v25  ;;  %5317 = vmatprep.mubr.msk.f32.mxu0 %vm2476_vm13, %v2356_v18 }
 0x416   : > { %5356 = vmatprep.mubr.msk.f32.mxu1 %vm2476_vm13, %v2356_v18  ;;  %5375 = vmatprep.subr.mxu0 %v6568_v26 }
 0x417   : > { %5414 = vmatprep.subr.mxu1 %v4932_v50  ;;  %5376 = vmatpush3.msra.mxu0 %v6568_v26 }
 0x418   : > { %5318 = vmatmul.mubr.msk.f32.gmra.mxu0 %vm2476_vm13, %v2357_v27  ;;  %5415 = vmatpush3.msra.mxu1 %v4932_v50  ;;  %v2877_v50 = vsel %vm940_vm4, %v6331_v4, 0.0  ;;  %v3055_v4 = vsel %vm940_vm4, %v6427_v30, 0.0 }
 0x419   : > { %5357 = vmatmul.mubr.msk.f32.gmra.mxu1 %vm2476_vm13, %v2357_v27  ;;  %5320 = vmatprep.mubr.msk.f32.mxu0 %vm2476_vm13, %v2358_v29 }
 0x41a   : > { %5359 = vmatprep.mubr.msk.f32.mxu1 %vm2476_vm13, %v2358_v29  ;;  %2878 = vadd.xlane.f32.xlu1 %v2877_v50 }
 0x41c   : > { %5321 = vmatmul.mubr.msk.f32.gmra.mxu0 %vm2476_vm13, %v2359_v32 }
 0x41d   : > { %5360 = vmatmul.mubr.msk.f32.gmra.mxu1 %vm2476_vm13, %v2359_v32  ;;  %5323 = vmatprep.mubr.msk.f32.mxu0 %vm2476_vm13, %v2360_v33 }
 0x41e   : > { %5362 = vmatprep.mubr.msk.f32.mxu1 %vm2476_vm13, %v2360_v33  ;;  %2697 = vadd.xlane.f32.xlu1 %v6335_v35  ;;  %v3233_v35 = vsel %vm940_vm4, %v6434_v14, 0.0 }
 0x420   : > { %5324 = vmatmul.mubr.msk.f32.gmra.mxu0 %vm2476_vm13, %v2361_v39 }
 0x421   : > { %5363 = vmatmul.mubr.msk.f32.gmra.mxu1 %vm2476_vm13, %v2361_v39  ;;  %5377 = vmatprep.mubr.msk.f32.mxu0 %vm2476_vm13, %v6407_v5 }
 0x422   : > { %5416 = vmatprep.mubr.msk.f32.mxu1 %vm2476_vm13, %v6407_v5  ;;  %3056 = vadd.xlane.f32.xlu1 %v3055_v4 }
 0x424   : > { %5378 = vmatmul.mubr.msk.f32.vlgmr.msra.gmra.mxu0 %vm2476_vm13, %v6414_v8 }
 0x425   : > { %5417 = vmatmul.mubr.msk.f32.vlgmr.msra.gmra.mxu1 %vm2476_vm13, %v6414_v8  ;;  %5380 = vmatprep.mubr.msk.f32.mxu0 %vm2476_vm13, %v6421_v2 }
 0x426   : > { %5419 = vmatprep.mubr.msk.f32.mxu1 %vm2476_vm13, %v6421_v2  ;;  %2695 = vadd.xlane.f32.xlu1 %v6365_v11 }
 0x428   : > { %5381 = vmatmul.mubr.msk.f32.gmra.mxu0 %vm2476_vm13, %v6443_v21 }
 0x429   : > { %5420 = vmatmul.mubr.msk.f32.gmra.mxu1 %vm2476_vm13, %v6443_v21  ;;  %5383 = vmatprep.mubr.msk.f32.mxu0 %vm2476_vm13, %v6450_v16  ;;  %v6669_v21 = vpop.permute.xlu1 %2412 }
 0x42a   : > { %5422 = vmatprep.mubr.msk.f32.mxu1 %vm2476_vm13, %v6450_v16  ;;  %3053 = vadd.xlane.f32.xlu1 %v6459_v10 }
 0x42c   : > { %5384 = vmatmul.mubr.msk.f32.gmra.mxu0 %vm2476_vm13, %v6475_v43 }
 0x42d   : > { %5423 = vmatmul.mubr.msk.f32.gmra.mxu1 %vm2476_vm13, %v6475_v43  ;;  %5386 = vmatprep.mubr.msk.f32.mxu0 %vm2476_vm13, %v6482_v61  ;;  %v6671_v43 = vpop.permute.xlu0 %2387 }
 0x42e   : > { %5425 = vmatprep.mubr.msk.f32.mxu1 %vm2476_vm13, %v6482_v61  ;;  %2693 = vadd.xlane.f32.xlu1 %v6375_v53 }
 0x430   : > { %5387 = vmatmul.mubr.msk.f32.gmra.mxu0 %vm2476_vm13, %v6503_v59 }
 0x431   : > { %5426 = vmatmul.mubr.msk.f32.gmra.mxu1 %vm2476_vm13, %v6503_v59  ;;  %5389 = vmatprep.mubr.msk.f32.mxu0 %vm2476_vm13, %v6510_v22 }
 0x432   : > { %5428 = vmatprep.mubr.msk.f32.mxu1 %vm2476_vm13, %v6510_v22  ;;  %v6679_v22 = vpop.permute.xlu1 %2417  ;;  %3051 = vadd.xlane.f32.xlu1 %v6488_v40 }
 0x434   : > { %5390 = vmatmul.mubr.msk.f32.gmra.mxu0 %vm2476_vm13, %v6531_v63 }
 0x435   : > { %5429 = vmatmul.mubr.msk.f32.gmra.mxu1 %vm2476_vm13, %v6531_v63  ;;  %5392 = vmatprep.mubr.msk.f32.mxu0 %vm2476_vm13, %v6538_v9 }
 0x436   : > { %5431 = vmatprep.mubr.msk.f32.mxu1 %vm2476_vm13, %v6538_v9  ;;  %v2699_v9 = vsel %vm940_vm4, %v6327_v38, 0.0  ;;  %2691 = vadd.xlane.f32.xlu1 %v6385_v37 }
 0x437   : > { %2700 = vadd.xlane.f32.xlu0 %v2699_v9 }
 0x438   : > { %5393 = vmatmul.mubr.msk.f32.gmra.mxu0 %vm2476_vm13, %v2355_v25 }
 0x439   : > { %5432 = vmatmul.mubr.msk.f32.gmra.mxu1 %vm2476_vm13, %v2355_v25  ;;  %5395 = vmatprep.mubr.msk.f32.mxu0 %vm2476_vm13, %v2356_v18 }
 0x43a   : > { %5434 = vmatprep.mubr.msk.f32.mxu1 %vm2476_vm13, %v2356_v18  ;;  %3049 = vadd.xlane.f32.xlu1 %v6516_v23 }
 0x43b   : > { %2875 = vadd.xlane.f32.xlu0 %v6341_v48 }
 0x43c   : > { %5396 = vmatmul.mubr.msk.f32.gmra.mxu0 %vm2476_vm13, %v2357_v27 }
 0x43d   : > { %5435 = vmatmul.mubr.msk.f32.gmra.mxu1 %vm2476_vm13, %v2357_v27  ;;  %5398 = vmatprep.mubr.msk.f32.mxu0 %vm2476_vm13, %v2358_v29 }
 0x43e   : > { %5437 = vmatprep.mubr.msk.f32.mxu1 %vm2476_vm13, %v2358_v29  ;;  %v6687_v29 = vpop.permute.xlu1 %2422  ;;  %2689 = vadd.xlane.f32.xlu1 %v6395_v31 }
 0x43f   : > { %7685 = vst [vmem:[#allocation24_spill] sm:$0xff] %v6687_v29  ;;  %2873 = vadd.xlane.f32.xlu0 %v6370_v28 }
 0x440   : > { %5399 = vmatmul.mubr.msk.f32.gmra.mxu0 %vm2476_vm13, %v2359_v32 }
 0x441   : > { %5438 = vmatmul.mubr.msk.f32.gmra.mxu1 %vm2476_vm13, %v2359_v32  ;;  %5401 = vmatprep.mubr.msk.f32.mxu0 %vm2476_vm13, %v2360_v33 }
 0x442   : > { %5440 = vmatprep.mubr.msk.f32.mxu1 %vm2476_vm13, %v2360_v33  ;;  %3047 = vadd.xlane.f32.xlu1 %v6544_v3 }
 0x443   : > { %3234 = vadd.xlane.f32.xlu0 %v3233_v35 }
 0x444   : > { %5402 = vmatmul.mubr.msk.f32.gmra.mxu0 %vm2476_vm13, %v2361_v39 }
 0x445   : > { %5441 = vmatmul.mubr.msk.f32.gmra.mxu1 %vm2476_vm13, %v2361_v39 }
 0x446   : > { %3045 = vadd.xlane.f32.xlu1 %v6568_v26 }
 0x447   : > { %2871 = vadd.xlane.f32.xlu0 %v6380_v15 }
 0x44b   : > { %3231 = vadd.xlane.f32.xlu0 %v6466_v47 }
 0x44f   : > { %2869 = vadd.xlane.f32.xlu0 %v6390_v62 }
 0x453   : > { %3229 = vadd.xlane.f32.xlu0 %v6494_v7 }
 0x457   : > { %2867 = vadd.xlane.f32.xlu0 %v6400_v54 }
 0x45b   : > { %3227 = vadd.xlane.f32.xlu0 %v6522_v24 }
 0x45f   : > { %3225 = vadd.xlane.f32.xlu0 %v6550_v17 }
 0x4b0   : > { %v5283_v45 = vpop.f32.mrf.mxu1 }
 0x4b1   : > { %v5275_v56 = vpop.f32.mrf.mxu0 }
 0x4b2   : > { %v2327_v57 = vadd.f32 %v5283_v45, %v5275_v56  ;;  %v2321_v58 = vpop.f32.mrf.mxu1 }
 0x4b3   : > { %v2221_v12 = vpop.f32.mrf.mxu0 }
 0x4b4   : > { %v6664_v13 = vadd.f32 %v2327_v57, %v6159_v36  ;;  %v2322_v34 = vadd.f32 %v2321_v58, %v2221_v12  ;;  %v6698_v57 = vpop.permute.xlu1 %2427 }
 0x4b5   : > { %7686 = vst [vmem:[#allocation25_spill] sm:$0xff] %v6698_v57 }
 0x4b6   : > { %7681 = vst [vmem:[#allocation20_spill] sm:$0xff] %v6664_v13  ;;  %v6667_v42 = vadd.f32 %v2322_v34, %v6161_v41  ;;  %v5278_v1 = vpop.f32.mrf.mxu0  ;;  %v6681_v41 = vpop.permute.xlu0 %2392 }
 0x4b7   : > { %v5286_v5 = vpop.f32.mrf.mxu1 }
 0x4b8   : > { %7682 = vst [vmem:[#allocation21_spill] sm:$0xff] %v6667_v42  ;;  %v2337_v8 = vadd.f32 %v5286_v5, %v5278_v1  ;;  %v2231_v2 = vpop.f32.mrf.mxu0  ;;  %v6731_v50 = vpop.permute.xlu1 %2432 }
 0x4b9   : > { %v2331_v16 = vpop.f32.mrf.mxu1 }
 0x4ba   : > { %v6674_v61 = vadd.f32 %v2337_v8, %v6163_v44  ;;  %v2332_v59 = vadd.f32 %v2331_v16, %v2231_v2  ;;  %v6690_v32 = vpop.permute.xlu0 %2397 }
 0x4bc   : > { %7683 = vst [vmem:[#allocation22_spill] sm:$0xff] %v6674_v61  ;;  %v6677_v36 = vadd.f32 %v2332_v59, %v6165_v52 }
 0x4be   : > { %7684 = vst [vmem:[#allocation23_spill] sm:$0xff] %v6677_v36  ;;  %v6702_v48 = vpop.permute.xlu0 %2402 }
 0x4c0   : > { %v5301_v63 = vpop.f32.mrf.mxu0 }
 0x4c1   : > { %v5340_v25 = vpop.f32.mrf.mxu1  ;;  %v6720_v14 = vadd.f32 %v5301_v63, %v6671_v43 }
 0x4c2   : > { %v2600_v18 = vpop.f32.mrf.mxu0  ;;  %v6723_v16 = vadd.f32 %v5340_v25, %v6671_v43 }
 0x4c3   : > { %v2778_v44 = vpop.f32.mrf.mxu1  ;;  %v6707_v28 = vadd.f32 %v2600_v18, %v6661_v20 }
 0x4c4   : > { %v5304_v27 = vpop.f32.mrf.mxu0  ;;  %v6710_v5 = vadd.f32 %v2778_v44, %v6661_v20 }
 0x4c5   : > { %v5343_v52 = vpop.f32.mrf.mxu1  ;;  %v6734_v44 = vadd.f32 %v5304_v27, %v6690_v32 }
 0x4c6   : > { %v2610_v33 = vpop.f32.mrf.mxu0  ;;  %v6737_v11 = vadd.f32 %v5343_v52, %v6690_v32 }
 0x4c7   : > { %v2788_v39 = vpop.f32.mrf.mxu1  ;;  %v6747_v35 = vadd.f32 %v2610_v33, %v6681_v41 }
 0x4c8   : > { %v5307_v38 = vpop.f32.mrf.mxu0 }
 0x4c9   : > { %v5346_v45 = vpop.f32.mrf.mxu1  ;;  %7687 = vst [vmem:[#allocation26_spill] sm:$0xff] %v6747_v35 }
 0x4ca   : > { %v6694_v56 = vpop.f32.mrf.mxu0 }
 0x4cb   : > { %v6700_v58 = vpop.f32.mrf.mxu1  ;;  %v6816_v53 = vadd.f32 %v6694_v56, %v6702_v48 }
 0x4cc   : > { %v5310_v12 = vpop.f32.mrf.mxu0 }
 0x4cd   : > { %v5349_v34 = vpop.f32.mrf.mxu1  ;;  %v6713_v30 = vadd.f32 %v5310_v12, %v6679_v22  ;;  %v6744_v12 = vpop.permute.xlu0 %2407  ;;  %7691 = vst [vmem:[#allocation30_spill] sm:$0xff] %v6816_v53 }
 0x4ce   : > { %v2630_v1 = vpop.f32.mrf.mxu0  ;;  %v6726_v59 = vadd.f32 %v5349_v34, %v6679_v22  ;;  %v6760_v15 = vadd.f32 %v5307_v38, %v6744_v12  ;;  %v6768_v42 = vadd.f32 %v5346_v45, %v6744_v12 }
 0x4cf   : > { %v6716_v8 = vadd.f32 %v2630_v1, %v6669_v21  ;;  %v2808_v2 = vpop.f32.mrf.mxu1  ;;  %v3237_v33 = vmul.f32 %v6713_v30, %v6720_v14  ;;  %v3397_v36 = vmul.f32 %v6723_v16, %v6713_v30 }
 0x4d0   : > { %v6729_v9 = vadd.f32 %v2808_v2, %v6669_v21  ;;  %v5313_v18 = vpop.f32.mrf.mxu0  ;;  %v6757_v2 = vadd.f32 %v2788_v39, %v6681_v41  ;;  %v3414_v39 = vmul.f32 %v6726_v59, %v6723_v16 }
 0x4d1   : > { %v3236_v63 = vmul.f32 %v6716_v8, %v6707_v28  ;;  %v3396_v25 = vmul.f32 %v6710_v5, %v6716_v8  ;;  %v5352_v4 = vpop.f32.mrf.mxu1  ;;  %v6754_v34 = vadd.f32 %v5313_v18, %v6698_v57  ;;  %v3254_v18 = vmul.f32 %v6726_v59, %v6720_v14 }
 0x4d2   : > { %v3253_v27 = vmul.f32 %v6729_v9, %v6707_v28  ;;  %v3413_v52 = vmul.f32 %v6729_v9, %v6710_v5  ;;  %v2640_v1 = vpop.f32.mrf.mxu0  ;;  %7688 = vst [vmem:[#allocation27_spill] sm:$0xff] %v6757_v2  ;;  %v6775_v38 = vadd.f32 %v5352_v4, %v6698_v57 }
 0x4d3   : > { %v2818_v61 = vpop.f32.mrf.mxu1  ;;  %v3242_v51 = vadd.f32 %v3237_v33, %v3236_v63  ;;  %v3402_v49 = vadd.f32 %v3397_v36, %v3396_v25  ;;  %v6778_v55 = vadd.f32 %v2640_v1, %v6687_v29  ;;  %v3239_v0 = vmul.f32 %v6754_v34, %v6734_v44  ;;  %v6788_v63 = vpop.permute.xlu1 %2437 }
 0x4d4   : > { %v5316_v13 = vpop.f32.mrf.mxu0  ;;  %v6781_v10 = vadd.f32 %v2818_v61, %v6687_v29  ;;  %v3259_v46 = vadd.f32 %v3254_v18, %v3253_v27  ;;  %v3419_v6 = vadd.f32 %v3414_v39, %v3413_v52  ;;  %v3399_v4 = vmul.f32 %v6737_v11, %v6754_v34 }
 0x4d5   : > { %v5355_v45 = vpop.f32.mrf.mxu1  ;;  %v3238_v36 = vmul.f32 %v6778_v55, %v6747_v35  ;;  %v3398_v61 = vmul.f32 %v6757_v2, %v6778_v55  ;;  %v3256_v52 = vmul.f32 %v6775_v38, %v6734_v44  ;;  %v3416_v1 = vmul.f32 %v6775_v38, %v6737_v11 }
 0x4d6   : > { %v2650_v60 = vpop.f32.mrf.mxu0  ;;  %v3255_v47 = vmul.f32 %v6781_v10, %v6747_v35  ;;  %v3415_v25 = vmul.f32 %v6781_v10, %v6757_v2  ;;  %v6804_v33 = vadd.f32 %v5316_v13, %v6788_v63  ;;  %v6807_v18 = vadd.f32 %v5355_v45, %v6788_v63 }
 0x4d7   : > { %v2828_v27 = vpop.f32.mrf.mxu1  ;;  %v3243_v19 = vadd.f32 %v3242_v51, %v3238_v36  ;;  %v3403_v35 = vadd.f32 %v3402_v49, %v3398_v61  ;;  %v6820_v13 = vadd.f32 %v6700_v58, %v6702_v48  ;;  %v6823_v45 = vadd.f32 %v2650_v60, %v6731_v50 }
 0x4d8   : > { %v6809_v39 = vpop.f32.mrf.mxu0  ;;  %v3260_v2 = vadd.f32 %v3259_v46, %v3255_v47  ;;  %v3420_v29 = vadd.f32 %v3419_v6, %v3415_v25  ;;  %v6826_v51 = vadd.f32 %v2828_v27, %v6731_v50  ;;  %v3401_v40 = vmul.f32 %v6768_v42, %v6804_v33 }
 0x4d9   : > { %7689 = vst [vmem:[#allocation28_spill] sm:$0xff] %v6809_v39  ;;  %v6811_v57 = vpop.f32.mrf.mxu1  ;;  %7692 = vst [vmem:[#allocation31_spill] sm:$0xff] %v6820_v13  ;;  %v3244_v49 = vadd.f32 %v3243_v19, %v3239_v0  ;;  %v3404_v6 = vadd.f32 %v3403_v35, %v3399_v4  ;;  %v3240_v56 = vmul.f32 %v6823_v45, %v6816_v53 }
 0x4da   : > { %7690 = vst [vmem:[#allocation29_spill] sm:$0xff] %v6811_v57  ;;  %v6828_v46 = vpop.f32.mrf.mxu0  ;;  %v3261_v36 = vadd.f32 %v3260_v2, %v3256_v52  ;;  %v3421_v62 = vadd.f32 %v3420_v29, %v3416_v1  ;;  %v3400_v60 = vmul.f32 %v6820_v13, %v6823_v45  ;;  %v3257_v58 = vmul.f32 %v6826_v51, %v6816_v53 }
 0x4db   : > { %7693 = vst [vmem:[#allocation32_spill] sm:$0xff] %v6828_v46  ;;  %v6830_v61 = vpop.f32.mrf.mxu1  ;;  %v3417_v47 = vmul.f32 %v6826_v51, %v6820_v13  ;;  %v3241_v0 = vmul.f32 %v6804_v33, %v6760_v15  ;;  %v3258_v29 = vmul.f32 %v6807_v18, %v6760_v15  ;;  %v3418_v35 = vmul.f32 %v6807_v18, %v6768_v42 }
 0x4dc   : > { %7694 = vst [vmem:[#allocation33_spill] sm:$0xff] %v6830_v61  ;;  %v6841_v19 = vpop.f32.mrf.mxu0  ;;  %v3245_v4 = vadd.f32 %v3244_v49, %v3240_v56  ;;  %v3405_v25 = vadd.f32 %v3404_v6, %v3400_v60  ;;  %v3262_v27 = vadd.f32 %v3261_v36, %v3257_v58 }
 0x4dd   : > { %7695 = vst [vmem:[#allocation34_spill] sm:$0xff] %v6841_v19  ;;  %v6851_v2 = vpop.f32.mrf.mxu1  ;;  %v3422_v52 = vadd.f32 %v3421_v62, %v3417_v47 }
 0x4de   : > { %v6854_v1 = vpop.f32.mrf.mxu0  ;;  %v3246_v61 = vadd.f32 %v3245_v4, %v3241_v0  ;;  %v3406_v46 = vadd.f32 %v3405_v25, %v3401_v40  ;;  %v3263_v57 = vadd.f32 %v3262_v27, %v3258_v29 }
 0x4df   : > { %v6856_v19 = vpop.f32.mrf.mxu1  ;;  %v3423_v39 = vadd.f32 %v3422_v52, %v3418_v35 }
 0x4e0   : > { %7696 = vst [vmem:[#allocation35_spill] sm:$0xff] %v6856_v19  ;;  %v6859_v13 = vpop.f32.mrf.mxu0  ;;  %v3247_v7 = vrot.slane %v3246_v61, 4  ;;  %v3407_v49 = vrot.slane %v3406_v46, 4  ;;  %v3264_v6 = vrot.slane %v3263_v57, 4 }
 0x4e1   : > { %7697 = vst [vmem:[#allocation36_spill] sm:$0xff] %v6859_v13  ;;  %v6861_v53 = vpop.f32.mrf.mxu1  ;;  %v3424_v36 = vrot.slane %v3423_v39, 4 }
 0x4e2   : > { %7698 = vst [vmem:[#allocation37_spill] sm:$0xff] %v6861_v53  ;;  %v6864_v62 = vpop.f32.mrf.mxu0  ;;  %v3248_v37 = vadd.f32 %v3247_v7, %v3246_v61  ;;  %v3408_v60 = vadd.f32 %v3407_v49, %v3406_v46  ;;  %v3265_v58 = vadd.f32 %v3264_v6, %v3263_v57 }
 0x4e3   : > { %7699 = vst [vmem:[#allocation38_spill] sm:$0xff] %v6864_v62  ;;  %v6866_v56 = vpop.f32.mrf.mxu1  ;;  %v3425_v47 = vadd.f32 %v3424_v36, %v3423_v39 }
 0x4e4   : > { %7700 = vst [vmem:[#allocation39_spill] sm:$0xff] %v6866_v56  ;;  %v5379_v0 = vpop.f32.mrf.mxu0  ;;  %v3249_v54 = vrot.slane %v3248_v37, 2  ;;  %v3409_v35 = vrot.slane %v3408_v60, 2  ;;  %v3266_v4 = vrot.slane %v3265_v58, 2 }
 0x4e5   : > { %v6870_v40 = vadd.f32 %v5379_v0, %v6671_v43  ;;  %v5418_v29 = vpop.f32.mrf.mxu1  ;;  %v3426_v25 = vrot.slane %v3425_v47, 2 }
 0x4e6   : > { %v2956_v27 = vpop.f32.mrf.mxu0  ;;  %v6874_v52 = vadd.f32 %v5418_v29, %v6671_v43  ;;  %v3250_v39 = vadd.f32 %v3249_v54, %v3248_v37  ;;  %v3410_v46 = vadd.f32 %v3409_v35, %v3408_v60  ;;  %v3267_v61 = vadd.f32 %v3266_v4, %v3265_v58 }
 0x4e7   : > { %v6877_v23 = vadd.f32 %v2956_v27, %v6661_v20  ;;  %v3134_v57 = vpop.f32.mrf.mxu1  ;;  %v3427_v7 = vadd.f32 %v3426_v25, %v3425_v47  ;;  %v3557_v24 = vmul.f32 %v6870_v40, %v6713_v30  ;;  %v3574_v6 = vmul.f32 %v6870_v40, %v6726_v59 }
 0x4e8   : > { %v5382_v49 = vpop.f32.mrf.mxu0  ;;  %v3251_v31 = vrot.slane %v3250_v39, 1  ;;  %v3411_v37 = vrot.slane %v3410_v46, 1  ;;  %v3268_v60 = vrot.slane %v3267_v61, 1  ;;  %v3717_v29 = vmul.f32 %v6874_v52, %v6713_v30 }
 0x4e9   : > { %v3556_v43 = vmul.f32 %v6877_v23, %v6716_v8  ;;  %v3573_v36 = vmul.f32 %v6877_v23, %v6729_v9  ;;  %v5421_v0 = vpop.f32.mrf.mxu1  ;;  %v3428_v58 = vrot.slane %v3427_v7, 1  ;;  %v3734_v54 = vmul.f32 %v6874_v52, %v6726_v59 }
 0x4ea   : > { %v2966_v47 = vpop.f32.mrf.mxu0  ;;  %v6894_v35 = vadd.f32 %v3134_v57, %v6661_v20  ;;  %v6897_v4 = vadd.f32 %v5382_v49, %v6690_v32  ;;  %v3252_v17 = vadd.f32 %v3251_v31, %v3250_v39  ;;  %v3412_v27 = vadd.f32 %v3411_v37, %v3410_v46 }
 0x4eb   : > { %v3144_v25 = vpop.f32.mrf.mxu1  ;;  %v3269_v56 = vadd.f32 %v3268_v60, %v3267_v61  ;;  %v3429_v62 = vadd.f32 %v3428_v58, %v3427_v7  ;;  %v3562_v13 = vadd.f32 %v3557_v24, %v3556_v43  ;;  %v3579_v19 = vadd.f32 %v3574_v6, %v3573_v36 }
 0x4ec   : > { %v5385_v53 = vpop.f32.mrf.mxu0  ;;  %v3716_v30 = vmul.f32 %v6894_v35, %v6716_v8  ;;  %v3733_v20 = vmul.f32 %v6894_v35, %v6729_v9  ;;  %v3559_v57 = vmul.f32 %v6897_v4, %v6754_v34  ;;  %v3576_v3 = vmul.f32 %v6897_v4, %v6775_v38 }
 0x4ed   : > { %v5424_v59 = vpop.f32.mrf.mxu1  ;;  %v6909_v39 = vadd.f32 %v5421_v0, %v6690_v32  ;;  %v6912_v46 = vadd.f32 %v2966_v47, %v6681_v41  ;;  %v6915_v7 = vsel %vm940_vm4, %v3252_v17, %v3269_v56  ;;  %v6918_v8 = vsel %vm940_vm4, %v3412_v27, %v3429_v62 }
 0x4ee   : > { %v2976_v61 = vpop.f32.mrf.mxu0  ;;  %v3722_v9 = vadd.f32 %v3717_v29, %v3716_v30  ;;  %v6921_v49 = vadd.f32 %v3144_v25, %v6681_v41  ;;  %v3739_v6 = vadd.f32 %v3734_v54, %v3733_v20  ;;  %v6929_v56 = vadd.f32 %v5385_v53, %v6744_v12 }
 0x4ef   : > { %v3154_v24 = vpop.f32.mrf.mxu1  ;;  %v3558_v32 = vmul.f32 %v6912_v46, %v6778_v55  ;;  %v3575_v43 = vmul.f32 %v6912_v46, %v6781_v10  ;;  %v3719_v62 = vmul.f32 %v6909_v39, %v6754_v34  ;;  %v3736_v41 = vmul.f32 %v6909_v39, %v6775_v38 }
 0x4f0   : > { %v5388_v36 = vpop.f32.mrf.mxu0  ;;  %v3718_v26 = vmul.f32 %v6921_v49, %v6778_v55  ;;  %v3735_v0 = vmul.f32 %v6921_v49, %v6781_v10  ;;  %v6940_v60 = vadd.f32 %v5424_v59, %v6744_v12  ;;  %v6943_v53 = vadd.f32 %v2976_v61, %v6702_v48 }
 0x4f1   : > { %v3563_v31 = vadd.f32 %v3562_v13, %v3558_v32  ;;  %v3580_v37 = vadd.f32 %v3579_v19, %v3575_v43  ;;  %v6946_v34 = vadd.f32 %v3154_v24, %v6702_v48  ;;  %v2992_v38 = vadd.f32 %v5388_v36, %v6679_v22  ;;  %v5427_v29 = vpop.f32.mrf.mxu1 }
 0x4f2   : > { %v3723_v58 = vadd.f32 %v3722_v9, %v3718_v26  ;;  %v3740_v47 = vadd.f32 %v3739_v6, %v3735_v0  ;;  %v3561_v55 = vmul.f32 %v6929_v56, %v6804_v33  ;;  %v3578_v10 = vmul.f32 %v6929_v56, %v6807_v18  ;;  %v2986_v59 = vpop.f32.mrf.mxu0 }
 0x4f3   : > { %v3560_v12 = vmul.f32 %v6943_v53, %v6823_v45  ;;  %v3564_v13 = vadd.f32 %v3563_v31, %v3559_v57  ;;  %v3577_v19 = vmul.f32 %v6943_v53, %v6826_v51  ;;  %v3581_v54 = vadd.f32 %v3580_v37, %v3576_v3  ;;  %v3164_v24 = vpop.f32.mrf.mxu1 }
 0x4f4   : > { %v3720_v48 = vmul.f32 %v6946_v34, %v6823_v45  ;;  %v3724_v25 = vadd.f32 %v3723_v58, %v3719_v62  ;;  %v3721_v17 = vmul.f32 %v6940_v60, %v6804_v33  ;;  %v3737_v30 = vmul.f32 %v6946_v34, %v6826_v51 }
 0x4f5   : > { %v3565_v27 = vadd.f32 %v3564_v13, %v3560_v12  ;;  %v3741_v20 = vadd.f32 %v3740_v47, %v3736_v41  ;;  %v3738_v57 = vmul.f32 %v6940_v60, %v6807_v18  ;;  %v3582_v61 = vadd.f32 %v3581_v54, %v3577_v19 }
 0x4f6   : > { %v3725_v9 = vadd.f32 %v3724_v25, %v3720_v48  ;;  %v3271_v3 = vmul.f32 %v2992_v38, %v6720_v14  ;;  %v3431_v32 = vmul.f32 %v2992_v38, %v6723_v16  ;;  %v3170_v33 = vadd.f32 %v5427_v29, %v6679_v22  ;;  %v5391_v25 = vpop.f32.mrf.mxu0 }
 0x4f7   : > { %v3566_v6 = vadd.f32 %v3565_v27, %v3561_v55  ;;  %v3742_v45 = vadd.f32 %v3741_v20, %v3737_v30  ;;  %v3583_v43 = vadd.f32 %v3582_v61, %v3578_v10  ;;  %v3591_v51 = vmul.f32 %v2992_v38, %v6870_v40 }
 0x4f8   : > { %v3726_v36 = vadd.f32 %v3725_v9, %v3721_v17  ;;  %v2987_v62 = vadd.f32 %v2986_v59, %v6669_v21  ;;  %v3751_v18 = vmul.f32 %v6874_v52, %v2992_v38  ;;  %v3165_v0 = vadd.f32 %v3164_v24, %v6669_v21 }
 0x4f9   : > { %v3567_v41 = vrot.slane %v3566_v6, 4  ;;  %v3743_v26 = vadd.f32 %v3742_v45, %v3738_v57  ;;  %v3584_v31 = vrot.slane %v3583_v43, 4  ;;  %v3288_v58 = vmul.f32 %v3170_v33, %v6720_v14 }
 0x4fa   : > { %v3727_v37 = vrot.slane %v3726_v36, 4  ;;  %v3448_v47 = vmul.f32 %v3170_v33, %v6723_v16  ;;  %v3270_v29 = vmul.f32 %v2987_v62, %v6707_v28  ;;  %v3430_v10 = vmul.f32 %v2987_v62, %v6710_v5  ;;  %v5430_v16 = vpop.f32.mrf.mxu1 }
 0x4fb   : > { %v3568_v55 = vadd.f32 %v3567_v41, %v3566_v6  ;;  %v3744_v22 = vrot.slane %v3743_v26, 4  ;;  %v3585_v12 = vadd.f32 %v3584_v31, %v3583_v43  ;;  %v3608_v19 = vmul.f32 %v3170_v33, %v6870_v40 }
 0x4fc   : > { %v3728_v13 = vadd.f32 %v3727_v37, %v3726_v36  ;;  %v3768_v38 = vmul.f32 %v3170_v33, %v6874_v52  ;;  %v3590_v48 = vmul.f32 %v2987_v62, %v6877_v23  ;;  %v3750_v14 = vmul.f32 %v6894_v35, %v2987_v62  ;;  %v2996_v62 = vpop.f32.mrf.mxu0  ;;  %v3174_v41 = vpop.f32.mrf.mxu1 }
 0x4fd   : > { %v3569_v54 = vrot.slane %v3568_v55, 2  ;;  %v3745_v21 = vadd.f32 %v3744_v22, %v3743_v26  ;;  %v3586_v17 = vrot.slane %v3585_v12, 2  ;;  %v3276_v30 = vadd.f32 %v3271_v3, %v3270_v29 }
 0x4fe   : > { %v3729_v27 = vrot.slane %v3728_v13, 2  ;;  %v3436_v20 = vadd.f32 %v3431_v32, %v3430_v10  ;;  %v3287_v61 = vmul.f32 %v3165_v0, %v6707_v28  ;;  %v3447_v40 = vmul.f32 %v3165_v0, %v6710_v5 }
 0x4ff   : > { %v3570_v59 = vadd.f32 %v3569_v54, %v3568_v55  ;;  %v3746_v57 = vrot.slane %v3745_v21, 2  ;;  %v3587_v9 = vadd.f32 %v3586_v17, %v3585_v12  ;;  %v3607_v24 = vmul.f32 %v3165_v0, %v6877_v23  ;;  %v7701_v55 = vld [vmem:[#allocation25_spill] sm:$0xff]  ;;  %v7704_v17 = vld [vmem:[#allocation27_spill] sm:$0xff] }
 0x500   : > { %v3730_v52 = vadd.f32 %v3729_v27, %v3728_v13  ;;  %v3767_v6 = vmul.f32 %v3165_v0, %v6894_v35  ;;  %v3596_v43 = vadd.f32 %v3591_v51, %v3590_v48  ;;  %v3756_v36 = vadd.f32 %v3751_v18, %v3750_v14  ;;  %v7702_v35 = vld [vmem:[#allocation24_spill] sm:$0xff] }
 0x501   : > { %v3571_v45 = vrot.slane %v3570_v59, 1  ;;  %v3747_v33 = vadd.f32 %v3746_v57, %v3745_v21  ;;  %v3588_v3 = vrot.slane %v3587_v9, 1  ;;  %v3293_v26 = vadd.f32 %v3288_v58, %v3287_v61 }
 0x502   : > { %v3731_v32 = vrot.slane %v3730_v52, 1  ;;  %v3453_v31 = vadd.f32 %v3448_v47, %v3447_v40  ;;  %v3613_v28 = vadd.f32 %v3608_v19, %v3607_v24  ;;  %v3002_v5 = vadd.f32 %v5391_v25, %v7701_v55  ;;  %v5394_v47 = vpop.f32.mrf.mxu0  ;;  %v7703_v25 = vld [vmem:[#allocation26_spill] sm:$0xff] }
 0x503   : > { %v3748_v37 = vrot.slane %v3747_v33, 1  ;;  %v3180_v22 = vadd.f32 %v5430_v16, %v7701_v55  ;;  %v6986_v29 = vadd.f32 %v3571_v45, %v3570_v59  ;;  %v3773_v23 = vadd.f32 %v3768_v38, %v3767_v6 }
 0x504   : > { %v2997_v0 = vadd.f32 %v2996_v62, %v7702_v35  ;;  %v3175_v51 = vadd.f32 %v3174_v41, %v7702_v35  ;;  %v6990_v18 = vadd.f32 %v3588_v3, %v3587_v9  ;;  %v6992_v10 = vadd.f32 %v3731_v32, %v3730_v52  ;;  %v5433_v9 = vpop.f32.mrf.mxu1 }
 0x505   : > { %v6994_v12 = vadd.f32 %v3748_v37, %v3747_v33  ;;  %v3273_v58 = vmul.f32 %v3002_v5, %v6734_v44  ;;  %v3433_v13 = vmul.f32 %v3002_v5, %v6737_v11  ;;  %v3593_v19 = vmul.f32 %v3002_v5, %v6897_v4 }
 0x506   : > { %v3753_v54 = vmul.f32 %v6909_v39, %v3002_v5  ;;  %v3290_v38 = vmul.f32 %v3180_v22, %v6734_v44  ;;  %v3450_v21 = vmul.f32 %v3180_v22, %v6737_v11  ;;  %v3610_v48 = vmul.f32 %v3180_v22, %v6897_v4  ;;  %v7705_v5 = vld [vmem:[#allocation30_spill] sm:$0xff] }
 0x507   : > { %v7004_v14 = vmul.f32 %v3180_v22, %v6909_v39  ;;  %v3272_v16 = vmul.f32 %v2997_v0, %v7703_v25  ;;  %v3432_v27 = vmul.f32 %v2997_v0, %v7704_v17  ;;  %v3592_v59 = vmul.f32 %v2997_v0, %v6912_v46  ;;  %v3006_v39 = vpop.f32.mrf.mxu0 }
 0x508   : > { %v3752_v57 = vmul.f32 %v6921_v49, %v2997_v0  ;;  %v3289_v61 = vmul.f32 %v3175_v51, %v7703_v25  ;;  %v3449_v44 = vmul.f32 %v3175_v51, %v7704_v17  ;;  %v3609_v11 = vmul.f32 %v3175_v51, %v6912_v46 }
 0x509   : > { %v3277_v40 = vadd.f32 %v3276_v30, %v3272_v16  ;;  %v3769_v4 = vmul.f32 %v3175_v51, %v6921_v49  ;;  %v3437_v52 = vadd.f32 %v3436_v20, %v3432_v27  ;;  %v3597_v24 = vadd.f32 %v3596_v43, %v3592_v59 }
 0x50a   : > { %v3757_v6 = vadd.f32 %v3756_v36, %v3752_v57  ;;  %v3294_v45 = vadd.f32 %v3293_v26, %v3289_v61  ;;  %v3454_v33 = vadd.f32 %v3453_v31, %v3449_v44  ;;  %v3614_v62 = vadd.f32 %v3613_v28, %v3609_v11  ;;  %v3184_v36 = vpop.f32.mrf.mxu1 }
 0x50b   : > { %v3774_v41 = vadd.f32 %v3773_v23, %v3769_v4  ;;  %v3012_v3 = vadd.f32 %v5394_v47, %v6788_v63  ;;  %v3190_v32 = vadd.f32 %v5433_v9, %v6788_v63  ;;  %v3007_v30 = vadd.f32 %v3006_v39, %v6731_v50  ;;  %v7706_v23 = vld [vmem:[#allocation31_spill] sm:$0xff] }
 0x50c   : > { %v3278_v37 = vadd.f32 %v3277_v40, %v3273_v58  ;;  %v3438_v55 = vadd.f32 %v3437_v52, %v3433_v13  ;;  %v3598_v51 = vadd.f32 %v3597_v24, %v3593_v19  ;;  %v3758_v47 = vadd.f32 %v3757_v6, %v3753_v54 }
 0x50d   : > { %v3275_v46 = vmul.f32 %v3012_v3, %v6760_v15  ;;  %v3435_v49 = vmul.f32 %v3012_v3, %v6768_v42  ;;  %v3595_v20 = vmul.f32 %v3012_v3, %v6929_v56  ;;  %v3755_v43 = vmul.f32 %v6940_v60, %v3012_v3 }
 0x50e   : > { %v3292_v26 = vmul.f32 %v3190_v32, %v6760_v15  ;;  %v3452_v31 = vmul.f32 %v3190_v32, %v6768_v42  ;;  %v3612_v28 = vmul.f32 %v3190_v32, %v6929_v56  ;;  %v3772_v63 = vmul.f32 %v3190_v32, %v6940_v60 }
 0x50f   : > { %v3274_v22 = vmul.f32 %v3007_v30, %v7705_v5  ;;  %v3434_v35 = vmul.f32 %v3007_v30, %v7706_v23  ;;  %v3594_v0 = vmul.f32 %v3007_v30, %v6943_v53  ;;  %v3754_v58 = vmul.f32 %v6946_v34, %v3007_v30 }
 0x510   : > { %v3185_v13 = vadd.f32 %v3184_v36, %v6731_v50  ;;  %v3295_v25 = vadd.f32 %v3294_v45, %v3290_v38  ;;  %v3455_v17 = vadd.f32 %v3454_v33, %v3450_v21  ;;  %v3615_v40 = vadd.f32 %v3614_v62, %v3610_v48 }
 0x511   : > { %v3279_v15 = vadd.f32 %v3278_v37, %v3274_v22  ;;  %v3439_v16 = vadd.f32 %v3438_v55, %v3434_v35  ;;  %v3599_v42 = vadd.f32 %v3598_v51, %v3594_v0  ;;  %v3759_v56 = vadd.f32 %v3758_v47, %v3754_v58 }
 0x512   : > { %v3291_v60 = vmul.f32 %v3185_v13, %v7705_v5  ;;  %v3451_v27 = vmul.f32 %v3185_v13, %v7706_v23  ;;  %v3611_v59 = vmul.f32 %v3185_v13, %v6943_v53  ;;  %v3771_v50 = vmul.f32 %v3185_v13, %v6946_v34 }
 0x513   : > { %v3280_v57 = vadd.f32 %v3279_v15, %v3275_v46  ;;  %v3440_v61 = vadd.f32 %v3439_v16, %v3435_v49  ;;  %v3600_v19 = vadd.f32 %v3599_v42, %v3595_v20  ;;  %v3760_v44 = vadd.f32 %v3759_v56, %v3755_v43 }
 0x514   : > { %v3296_v54 = vadd.f32 %v3295_v25, %v3291_v60  ;;  %v3456_v11 = vadd.f32 %v3455_v17, %v3451_v27  ;;  %v3616_v21 = vadd.f32 %v3615_v40, %v3611_v59  ;;  %v3775_v6 = vadd.f32 %v3774_v41, %v7004_v14 }
 0x515   : > { %v3281_v38 = vrot.slane %v3280_v57, 4  ;;  %v3441_v4 = vrot.slane %v3440_v61, 4  ;;  %v3601_v9 = vrot.slane %v3600_v19, 4  ;;  %v3761_v39 = vrot.slane %v3760_v44, 4 }
 0x516   : > { %v3297_v52 = vadd.f32 %v3296_v54, %v3292_v26  ;;  %v3457_v24 = vadd.f32 %v3456_v11, %v3452_v31  ;;  %v3617_v3 = vadd.f32 %v3616_v21, %v3612_v28  ;;  %v3776_v30 = vadd.f32 %v3775_v6, %v3771_v50 }
 0x517   : > { %v3282_v45 = vadd.f32 %v3281_v38, %v3280_v57  ;;  %v3442_v53 = vadd.f32 %v3441_v4, %v3440_v61  ;;  %v3602_v33 = vadd.f32 %v3601_v9, %v3600_v19  ;;  %v3762_v32 = vadd.f32 %v3761_v39, %v3760_v44 }
 0x518   : > { %v3298_v48 = vrot.slane %v3297_v52, 4  ;;  %v3458_v62 = vrot.slane %v3457_v24, 4  ;;  %v3618_v46 = vrot.slane %v3617_v3, 4  ;;  %v3777_v36 = vadd.f32 %v3776_v30, %v3772_v63 }
 0x519   : > { %v3283_v37 = vrot.slane %v3282_v45, 2  ;;  %v3443_v55 = vrot.slane %v3442_v53, 2  ;;  %v3603_v34 = vrot.slane %v3602_v33, 2  ;;  %v3763_v49 = vrot.slane %v3762_v32, 2 }
 0x51a   : > { %v3299_v20 = vadd.f32 %v3298_v48, %v3297_v52  ;;  %v3459_v43 = vadd.f32 %v3458_v62, %v3457_v24  ;;  %v3619_v14 = vadd.f32 %v3618_v46, %v3617_v3  ;;  %v3778_v28 = vrot.slane %v3777_v36, 4 }
 0x51b   : > { %v3284_v26 = vadd.f32 %v3283_v37, %v3282_v45  ;;  %v3444_v31 = vadd.f32 %v3443_v55, %v3442_v53  ;;  %v3604_v5 = vadd.f32 %v3603_v34, %v3602_v33  ;;  %v3764_v41 = vadd.f32 %v3763_v49, %v3762_v32 }
 0x51c   : > { %v3300_v22 = vrot.slane %v3299_v20, 2  ;;  %v3460_v23 = vrot.slane %v3459_v43, 2  ;;  %v3620_v58 = vrot.slane %v3619_v14, 2  ;;  %v3779_v15 = vadd.f32 %v3778_v28, %v3777_v36 }
 0x51d   : > { %v3285_v35 = vrot.slane %v3284_v26, 1  ;;  %v3445_v0 = vrot.slane %v3444_v31, 1  ;;  %v3605_v51 = vrot.slane %v3604_v5, 1  ;;  %v3765_v47 = vrot.slane %v3764_v41, 1 }
 0x51e   : > { %v3301_v13 = vadd.f32 %v3300_v22, %v3299_v20  ;;  %v3461_v25 = vadd.f32 %v3460_v23, %v3459_v43  ;;  %v3621_v63 = vadd.f32 %v3620_v58, %v3619_v14  ;;  %v3624_v56 = vsel %vm940_vm4, %v6986_v29, %v6990_v18 }
 0x51f   : > { %v3286_v16 = vadd.f32 %v3285_v35, %v3284_v26  ;;  %v3446_v42 = vadd.f32 %v3445_v0, %v3444_v31  ;;  %v3606_v17 = vadd.f32 %v3605_v51, %v3604_v5  ;;  %v3780_v59 = vrot.slane %v3779_v15, 2 }
 0x520   : > { %v3302_v60 = vrot.slane %v3301_v13, 1  ;;  %v3462_v27 = vrot.slane %v3461_v25, 1  ;;  %v3766_v19 = vadd.f32 %v3765_v47, %v3764_v41  ;;  %v3622_v40 = vrot.slane %v3621_v63, 1 }
 0x521   : > { %v3305_v57 = vsel %vm942_vm5, %v6915_v7, %v3286_v16  ;;  %v3465_v61 = vsel %vm942_vm5, %v6918_v8, %v3446_v42  ;;  %v3625_v44 = vsel %vm942_vm5, %v3624_v56, %v3606_v17  ;;  %v3781_v50 = vadd.f32 %v3780_v59, %v3779_v15  ;;  %v7055_v15 = vpop.permute.xlu0 %2467  ;;  %v7057_v16 = vpop.permute.xlu1 %2462 }
 0x522   : > { %v3303_v54 = vadd.f32 %v3302_v60, %v3301_v13  ;;  %v3463_v11 = vadd.f32 %v3462_v27, %v3461_v25  ;;  %v3623_v38 = vadd.f32 %v3622_v40, %v3621_v63  ;;  %v3784_v29 = vsel %vm940_vm4, %v6992_v10, %v6994_v12 }
 0x523   : > { %v3782_v7 = vrot.slane %v3781_v50, 1  ;;  %v3785_v9 = vsel %vm942_vm5, %v3784_v29, %v3766_v19 }
 0x524   : > { %v3306_v18 = vsel %vm944_vm6, %v3305_v57, %v3303_v54  ;;  %v3466_v4 = vsel %vm944_vm6, %v3465_v61, %v3463_v11  ;;  %v3626_v39 = vsel %vm944_vm6, %v3625_v44, %v3623_v38 }
 0x525   : > { %v3307_v8 = vsel %vm561_vm1, %v3306_v18, -inf  ;;  %v3467_v21 = vsel %vm561_vm1, %v3466_v4, -inf  ;;  %v3627_v6 = vsel %vm561_vm1, %v3626_v39, -inf  ;;  %v3783_v45 = vadd.f32 %v3782_v7, %v3781_v50  ;;  %v7059_v42 = vpop.permute.xlu0 %2457  ;;  %v7061_v17 = vpop.permute.xlu1 %2452 }
 0x526   : > { %v3308_v52 = vrot.slane %v3307_v8, 4  ;;  %v3468_v24 = vrot.slane %v3467_v21, 4  ;;  %v3628_v53 = vrot.slane %v3627_v6, 4  ;;  %v7083_v7 = vpop.f32.mrf.mxu0 }
 0x527   : > { %v3786_v33 = vsel %vm944_vm6, %v3785_v9, %v3783_v45  ;;  %v5436_v45 = vpop.f32.mrf.mxu1 }
 0x528   : > { %v3309_v10 = vmax.f32 %v3307_v8, %v3308_v52  ;;  %v3469_v12 = vmax.f32 %v3467_v21, %v3468_v24  ;;  %v3629_v3 = vmax.f32 %v3627_v6, %v3628_v53  ;;  %v3787_v32 = vsel %vm561_vm1, %v3786_v33, -inf }
 0x529   : > { %v3788_v30 = vrot.slane %v3787_v32, 4  ;;  %v7071_v59 = vpop.permute.xlu0 %2447  ;;  %v7079_v54 = vpop.permute.xlu1 %2442 }
 0x52a   : > { %v3310_v48 = vrot.slane %v3309_v10, 2  ;;  %v3470_v62 = vrot.slane %v3469_v12, 2  ;;  %v3630_v37 = vrot.slane %v3629_v3, 2 }
 0x52b   : > { %v3789_v46 = vmax.f32 %v3787_v32, %v3788_v30  ;;  %v7707_v32 = vld [vmem:[#allocation17_spill] sm:$0xff] }
 0x52c   : > { %v3311_v55 = vmax.f32 %v3309_v10, %v3310_v48  ;;  %v3471_v34 = vmax.f32 %v3469_v12, %v3470_v62  ;;  %v3631_v49 = vmax.f32 %v3629_v3, %v3630_v37  ;;  %v7085_v10 = vpop.f32.mrf.mxu0  ;;  %v7708_v62 = vld [vmem:[#allocation16_spill] sm:$0xff] }
 0x52d   : > { %v3790_v36 = vrot.slane %v3789_v46, 2  ;;  %v2701_v9 = vpop.xlane.xlu0 %2700  ;;  %v2879_v24 = vpop.xlane.xlu1 %2878 }
 0x52e   : > { %v3312_v20 = vrot.slane %v3311_v55, 1  ;;  %v3472_v43 = vrot.slane %v3471_v34, 1  ;;  %v3632_v26 = vrot.slane %v3631_v49, 1  ;;  %v3881_v48 = vmul.f32 %v7707_v32, %v2701_v9 }
 0x52f   : > { %v3791_v14 = vmax.f32 %v3789_v46, %v3790_v36  ;;  %v3893_v30 = vmul.f32 %v7708_v62, %v2879_v24  ;;  %v7089_v46 = vpop.f32.mrf.mxu1  ;;  %v7128_v24 = vadd.f32 %v6851_v2, %v7059_v42 }
 0x530   : > { %v3313_v31 = vmax.f32 %v3311_v55, %v3312_v20  ;;  %v3473_v5 = vmax.f32 %v3471_v34, %v3472_v43  ;;  %v3633_v41 = vmax.f32 %v3631_v49, %v3632_v26  ;;  %v5400_v20 = vpop.f32.mrf.mxu0 }
 0x531   : > { %v3792_v28 = vrot.slane %v3791_v14, 1  ;;  %v2876_v12 = vpop.xlane.xlu0 %2875  ;;  %v2698_v34 = vpop.xlane.xlu1 %2697  ;;  %v3899_v26 = vadd.f32 %v3893_v30, %v3881_v48  ;;  %7719 = vst [vmem:[#allocation27_spill] sm:$0xff] %v7128_v24  ;;  %v7721_v48 = vld [vmem:[#allocation36_spill] sm:$0xff] }
 0x532   : > { %v3314_v22 = vsub.f32 %v3306_v18, %v3313_v31  ;;  %v3474_v23 = vsub.f32 %v3466_v4, %v3473_v5  ;;  %v3634_v35 = vsub.f32 %v3626_v39, %v3633_v41  ;;  %v7709_v41 = vld [vmem:[#allocation18_spill] sm:$0xff]  ;;  %v7141_v30 = vadd.f32 %v7721_v48, %v7055_v15 }
 0x533   : > { %v3793_v58 = vmax.f32 %v3791_v14, %v3792_v28  ;;  %v5439_v14 = vpop.f32.mrf.mxu1  ;;  %v3892_v28 = vmul.f32 %v7708_v62, %v2876_v12  ;;  %v7133_v12 = vadd.f32 %v6854_v1, %v7061_v17  ;;  %v7724_v1 = vld [vmem:[#allocation39_spill] sm:$0xff] }
 0x534   : > { %v3315_v0 = vmul.f32 1.442695, %v3314_v22  ;;  %v3475_v51 = vmul.f32 1.442695, %v3474_v23  ;;  %v3635_v47 = vmul.f32 1.442695, %v3634_v35  ;;  %v7094_v23 = vpop.f32.mrf.mxu0 }
 0x535   : > { %v3794_v13 = vsub.f32 %v3786_v33, %v3793_v58  ;;  %v7091_v43 = vpop.xlane.xlu0 %2873  ;;  %v3057_v5 = vpop.xlane.xlu1 %3056 }
 0x536   : > { %5597 = vpow2.f32 %v3315_v0  ;;  %v3905_v22 = vmul.f32 %v7709_v41, %v3057_v5 }
 0x537   : > { %5599 = vpow2.f32 %v3475_v51  ;;  %v3795_v25 = vmul.f32 1.442695, %v3794_v13  ;;  %v3880_v51 = vmul.f32 %v7707_v32, %v2698_v34 }
 0x538   : > { %5601 = vpow2.f32 %v3635_v47  ;;  %v3911_v58 = vadd.f32 %v3905_v22, %v3899_v26  ;;  %v7710_v47 = vld [vmem:[#allocation19_spill] sm:$0xff]  ;;  %v7154_v26 = vadd.f32 %v7724_v1, %v7057_v16 }
 0x539   : > { %5603 = vpow2.f32 %v3795_v25  ;;  %v3235_v35 = vpop.xlane.xlu0 %3234  ;;  %v3898_v9 = vadd.f32 %v3892_v28, %v3880_v51 }
 0x53a   : > { %v3917_v13 = vmul.f32 %v7710_v47, %v3235_v35  ;;  %v7161_v35 = vadd.f32 %v5436_v45, %v7071_v59 }
 0x53c   : > { %7725 = vst [vmem:[#allocation30_spill] sm:$0xff] %v7161_v35 }
 0x543   : > { %v7063_v63 = vpop.eup %5597 }
 0x544   : > { %v7065_v56 = vpop.eup %5599  ;;  %v3317_v60 = vsel %vm561_vm1, %v7063_v63, 0.0 }
 0x545   : > { %v7069_v27 = vpop.eup %5601  ;;  %v3318_v57 = vrot.slane %v3317_v60, 4  ;;  %v3477_v61 = vsel %vm561_vm1, %v7065_v56, 0.0 }
 0x546   : > { %v3478_v19 = vrot.slane %v3477_v61, 4  ;;  %v3637_v40 = vsel %vm561_vm1, %v7069_v27, 0.0  ;;  %v7077_v44 = vpop.eup %5603 }
 0x547   : > { %v3319_v11 = vadd.f32 %v3318_v57, %v3317_v60  ;;  %v3638_v50 = vrot.slane %v3637_v40, 4  ;;  %v3797_v29 = vsel %vm561_vm1, %v7077_v44, 0.0  ;;  %v7099_v60 = vpop.xlane.xlu1 %2695  ;;  %v7101_v57 = vpop.f32.mrf.mxu1 }
 0x548   : > { %v3479_v38 = vadd.f32 %v3478_v19, %v3477_v61  ;;  %v3798_v52 = vrot.slane %v3797_v29, 4  ;;  %v3923_v61 = vadd.f32 %v3917_v13, %v3911_v58  ;;  %v7711_v19 = vld [vmem:[#allocation28_spill] sm:$0xff] }
 0x549   : > { %v3320_v18 = vrot.slane %v3319_v11, 2  ;;  %v3639_v4 = vadd.f32 %v3638_v50, %v3637_v40  ;;  %v7105_v40 = vadd.f32 %v7711_v19, %v7071_v59  ;;  %v7107_v50 = vpop.xlane.xlu0 %2871 }
 0x54a   : > { %v3480_v8 = vrot.slane %v3479_v38, 2  ;;  %v3799_v37 = vadd.f32 %v3798_v52, %v3797_v29  ;;  %7712 = vst [vmem:[#allocation25_spill] sm:$0xff] %v7107_v50  ;;  %5461 = vmatprep.subr.msk.mxu1 %vm940_vm4, %v3923_v61  ;;  %v7242_v50 = vadd.f32 %v7094_v23, %v7061_v17 }
 0x54b   : > { %v3321_v21 = vadd.f32 %v3320_v18, %v3319_v11  ;;  %v3640_v39 = vrot.slane %v3639_v4, 2  ;;  %v5403_v11 = vpop.f32.mrf.mxu0  ;;  %v7714_v18 = vld [vmem:[#allocation32_spill] sm:$0xff]  ;;  %5462 = vmatpush3.msk.msra.mxu1 %vm940_vm4, %v3923_v61  ;;  %v7168_v61 = vadd.f32 %v5439_v14, %v7059_v42 }
 0x54c   : > { %v3481_v6 = vadd.f32 %v3480_v8, %v3479_v38  ;;  %v3800_v31 = vrot.slane %v3799_v37, 2  ;;  %v7713_v38 = vld [vmem:[#allocation29_spill] sm:$0xff]  ;;  %v7171_v19 = vadd.f32 %v5403_v11, %v7055_v15  ;;  %v7729_v11 = vld [vmem:[#allocation14_spill] sm:$0xff] }
 0x54d   : > { %v3322_v53 = vrot.slane %v3321_v21, 1  ;;  %v3641_v3 = vadd.f32 %v3640_v39, %v3639_v4  ;;  %v7111_v29 = vadd.f32 %v7713_v38, %v7071_v59  ;;  %v7115_v4 = vadd.f32 %v7714_v18, %v7079_v54  ;;  %v7715_v8 = vld [vmem:[#allocation33_spill] sm:$0xff]  ;;  %v7717_v39 = vld [vmem:[#allocation34_spill] sm:$0xff]  ;;  %v3036_v5 = vpop.f32.mrf.mxu0  ;;  %v3232_v22 = vpop.xlane.xlu0 %3231 }
 0x54e   : > { %v3482_v33 = vrot.slane %v3481_v6, 1  ;;  %v3801_v25 = vadd.f32 %v3800_v31, %v3799_v37  ;;  %v7124_v52 = vadd.f32 %v7717_v39, %v7059_v42  ;;  %v5442_v37 = vpop.f32.mrf.mxu1  ;;  %v7158_v31 = vadd.f32 %v7083_v7, %v7071_v59 }
 0x54f   : > { %v3323_v55 = vadd.f32 %v3322_v53, %v3321_v21  ;;  %v3642_v36 = vrot.slane %v3641_v3, 1  ;;  %v7120_v21 = vadd.f32 %v7715_v8, %v7079_v54  ;;  %v3054_v53 = vpop.xlane.xlu1 %3053  ;;  %v3916_v58 = vmul.f32 %v7710_v47, %v3232_v22  ;;  %v7727_v8 = vld [vmem:[#allocation12_spill] sm:$0xff] }
 0x550   : > { %v3483_v49 = vadd.f32 %v3482_v33, %v3481_v6  ;;  %7718 = vst [vmem:[#allocation26_spill] sm:$0xff] %v7124_v52  ;;  %v3802_v6 = vrot.slane %v3801_v25, 1  ;;  %v7720_v33 = vld [vmem:[#allocation35_spill] sm:$0xff]  ;;  %v3904_v2 = vmul.f32 %v7709_v41, %v3054_v53  ;;  %v7175_v18 = vadd.f32 %v5442_v37, %v7055_v15  ;;  %v3214_v45 = vpop.f32.mrf.mxu1 }
 0x551   : > { %5605 = vrcp.f32 %v3323_v55  ;;  %v3643_v0 = vadd.f32 %v3642_v36, %v3641_v3  ;;  %7716 = vst [vmem:[#allocation24_spill] sm:$0xff] %v7120_v21  ;;  %v7137_v3 = vadd.f32 %v7720_v33, %v7061_v17  ;;  %v7722_v55 = vld [vmem:[#allocation37_spill] sm:$0xff]  ;;  %v7178_v59 = vadd.f32 %v3036_v5, %v7057_v16 }
 0x552   : > { %5607 = vrcp.f32 %v3483_v49  ;;  %v7146_v34 = vadd.f32 %v7722_v55, %v7055_v15  ;;  %v7723_v49 = vld [vmem:[#allocation38_spill] sm:$0xff]  ;;  %v3910_v51 = vadd.f32 %v3904_v2, %v3898_v9  ;;  %v3803_v38 = vadd.f32 %v3802_v6, %v3801_v25 }
 0x553   : > { %5609 = vrcp.f32 %v3643_v0  ;;  %v7150_v36 = vadd.f32 %v7723_v49, %v7057_v16  ;;  %v7164_v0 = vadd.f32 %v5400_v20, %v7059_v42  ;;  %7726 = vst [vmem:[#allocation31_spill] sm:$0xff] %v7178_v59  ;;  %v7728_v42 = vld [vmem:[#allocation13_spill] sm:$0xff]  ;;  %v7206_v48 = vadd.f32 %v3214_v45, %v7057_v16 }
 0x554   : > { %v3922_v9 = vadd.f32 %v3916_v58, %v3910_v51  ;;  %5611 = vrcp.f32 %v3803_v38 }
 0x555   : > { %7731 = vst [vmem:[#allocation17_spill] sm:$0xff] %v7206_v48 }
 0x556   : > { %5463 = vmatprep.subr.mxu1 %v3922_v9 }
 0x557   : > { %5464 = vmatpush3.msra.mxu1 %v3922_v9 }
 0x55e   : > { %v5606_v28 = vpop.eup %5605 }
 0x55f   : > { %v5608_v13 = vpop.eup %5607  ;;  %v3325_v7 = vmul.f32 %v5606_v28, %v7063_v63  ;;  %v7730_v63 = vld [vmem:[#allocation15_spill] sm:$0xff] }
 0x560   : > { %v3485_v20 = vmul.f32 %v5608_v13, %v7065_v56  ;;  %v5610_v45 = vpop.eup %5609 }
 0x561   : > { %v7182_v39 = vrot.slane %v3325_v7, %v7727_v8  ;;  %v7185_v14 = vrot.slane %v3325_v7, %v7728_v42  ;;  %v7188_v53 = vrot.slane %v3325_v7, %v7729_v11  ;;  %v7191_v25 = vrot.slane %v3325_v7, %v7730_v63 }
 0x562   : > { %v7194_v15 = vrot.slane %v3485_v20, %v7727_v8  ;;  %v7197_v6 = vrot.slane %v3485_v20, %v7728_v42  ;;  %v7200_v56 = vrot.slane %v3485_v20, %v7729_v11  ;;  %v7203_v33 = vrot.slane %v3485_v20, %v7730_v63 }
 0x563   : > { %v3335_v37 = vmul.f32 %v7182_v39, %v7141_v30  ;;  %v3345_v2 = vmul.f32 %v7185_v14, %v7146_v34  ;;  %v3361_v55 = vmul.f32 %v7188_v53, %v7171_v19  ;;  %v3377_v49 = vmul.f32 %v7191_v25, %v7175_v18 }
 0x564   : > { %v3494_v1 = vmul.f32 %v7194_v15, %v7150_v36  ;;  %v3504_v16 = vmul.f32 %v7197_v6, %v7154_v26  ;;  %v3520_v22 = vmul.f32 %v7200_v56, %v7178_v59  ;;  %v3495_v28 = vmul.f32 %v7194_v15, %v7141_v30 }
 0x565   : > { %v3351_v5 = vadd.f32 %v3345_v2, %v3335_v37  ;;  %v3505_v51 = vmul.f32 %v7197_v6, %v7146_v34  ;;  %v3536_v13 = vmul.f32 %v7203_v33, %v7206_v48  ;;  %v3333_v7 = vmul.f32 %v7182_v39, %v7124_v52 }
 0x566   : > { %v3510_v58 = vadd.f32 %v3504_v16, %v3494_v1  ;;  %v3343_v38 = vmul.f32 %v7185_v14, %v7128_v24  ;;  %v3521_v37 = vmul.f32 %v7200_v56, %v7171_v19  ;;  %v3359_v2 = vmul.f32 %v7188_v53, %v7164_v0 }
 0x567   : > { %v3367_v20 = vadd.f32 %v3361_v55, %v3351_v5  ;;  %v3511_v9 = vadd.f32 %v3505_v51, %v3495_v28  ;;  %v3334_v16 = vmul.f32 %v7182_v39, %v7150_v36  ;;  %v3344_v41 = vmul.f32 %v7185_v14, %v7154_v26 }
 0x568   : > { %v3526_v47 = vadd.f32 %v3520_v22, %v3510_v58  ;;  %v3349_v1 = vadd.f32 %v3343_v38, %v3333_v7  ;;  %v3360_v28 = vmul.f32 %v7188_v53, %v7178_v59  ;;  %v3645_v22 = vmul.f32 %v5610_v45, %v7069_v27 }
 0x569   : > { %v3383_v55 = vadd.f32 %v3377_v49, %v3367_v20  ;;  %v3527_v5 = vadd.f32 %v3521_v37, %v3511_v9  ;;  %v3350_v35 = vadd.f32 %v3344_v41, %v3334_v16  ;;  %v3537_v58 = vmul.f32 %v7203_v33, %v7175_v18 }
 0x56a   : > { %v3542_v51 = vadd.f32 %v3536_v13, %v3526_v47  ;;  %v3365_v21 = vadd.f32 %v3359_v2, %v3349_v1  ;;  %v3375_v7 = vmul.f32 %v7191_v25, %v7168_v61  ;;  %v3332_v23 = vmul.f32 %v7182_v39, %v7133_v12 }
 0x56b   : > { %3394 = vadd.xlane.f32.xlu0 %v3383_v55  ;;  %v3342_v49 = vmul.f32 %v7185_v14, %v7137_v3  ;;  %v3366_v38 = vadd.f32 %v3360_v28, %v3350_v35  ;;  %v3376_v41 = vmul.f32 %v7191_v25, %v7206_v48  ;;  %v7258_v27 = vrot.slane %v3645_v22, %v7727_v8  ;;  %v5612_v28 = vpop.eup %5611 }
 0x56c   : > { %3552 = vadd.xlane.f32.xlu1 %v3542_v51  ;;  %v7261_v47 = vrot.slane %v3645_v22, %v7728_v42  ;;  %v3543_v13 = vadd.f32 %v3537_v58, %v3527_v5  ;;  %v7264_v45 = vrot.slane %v3645_v22, %v7729_v11  ;;  %v7267_v20 = vrot.slane %v3645_v22, %v7730_v63 }
 0x56d   : > { %v3348_v9 = vadd.f32 %v3342_v49, %v3332_v23  ;;  %v3381_v37 = vadd.f32 %v3375_v7, %v3365_v21  ;;  %v3654_v35 = vmul.f32 %v7258_v27, %v7150_v36  ;;  %v3655_v1 = vmul.f32 %v7258_v27, %v7141_v30 }
 0x56e   : > { %v3664_v2 = vmul.f32 %v7261_v47, %v7154_v26  ;;  %v7277_v16 = vadd.f32 %v7085_v10, %v7079_v54  ;;  %v7281_v55 = vadd.f32 %v7101_v57, %v7061_v17  ;;  %v3665_v21 = vmul.f32 %v7261_v47, %v7146_v34 }
 0x56f   : > { %3554 = vadd.xlane.f32.xlu0 %v3543_v13  ;;  %v3358_v5 = vmul.f32 %v7188_v53, %v7242_v50  ;;  %v3382_v51 = vadd.f32 %v3376_v41, %v3366_v38  ;;  %v3680_v58 = vmul.f32 %v7264_v45, %v7178_v59  ;;  %v3653_v10 = vmul.f32 %v7258_v27, %v7124_v52 }
 0x570   : > { %3390 = vadd.xlane.f32.xlu1 %v3381_v37  ;;  %v3670_v22 = vadd.f32 %v3664_v2, %v3654_v35  ;;  %v3696_v17 = vmul.f32 %v7267_v20, %v7206_v48  ;;  %v3671_v57 = vadd.f32 %v3665_v21, %v3655_v1  ;;  %v3681_v7 = vmul.f32 %v7264_v45, %v7171_v19  ;;  %v7303_v37 = vpop.xlane.xlu1 %2693 }
 0x571   : > { %v3663_v23 = vmul.f32 %v7261_v47, %v7128_v24  ;;  %v3697_v38 = vmul.f32 %v7267_v20, %v7175_v18  ;;  %v3493_v41 = vmul.f32 %v7194_v15, %v7124_v52  ;;  %v3503_v13 = vmul.f32 %v7197_v6, %v7128_v24 }
 0x572   : > { %v3686_v49 = vadd.f32 %v3680_v58, %v3670_v22  ;;  %v3687_v35 = vadd.f32 %v3681_v7, %v3671_v57  ;;  %v3364_v2 = vadd.f32 %v3358_v5, %v3348_v9  ;;  %v3519_v21 = vmul.f32 %v7200_v56, %v7164_v0 }
 0x573   : > { %3392 = vadd.xlane.f32.xlu0 %v3382_v51  ;;  %v3669_v1 = vadd.f32 %v3663_v23, %v3653_v10  ;;  %v3509_v22 = vadd.f32 %v3503_v13, %v3493_v41  ;;  %v3331_v58 = vmul.f32 %v7182_v39, %v7105_v40  ;;  %v3341_v52 = vmul.f32 %v7185_v14, %v7111_v29 }
 0x574   : > { %v3702_v48 = vadd.f32 %v3696_v17, %v3686_v49  ;;  %v3703_v59 = vadd.f32 %v3697_v38, %v3687_v35  ;;  %v3374_v24 = vmul.f32 %v7191_v25, %v7281_v55  ;;  %v3679_v51 = vmul.f32 %v7264_v45, %v7164_v0 }
 0x575   : > { %v3535_v9 = vmul.f32 %v7203_v33, %v7168_v61  ;;  %v3525_v5 = vadd.f32 %v3519_v21, %v3509_v22  ;;  %v3347_v10 = vadd.f32 %v3341_v52, %v3331_v58  ;;  %v3805_v17 = vmul.f32 %v5612_v28, %v7077_v44  ;;  %v7332_v28 = vpop.xlane.xlu1 %3051 }
 0x576   : > { %3712 = vadd.xlane.f32.xlu1 %v3702_v48  ;;  %v3652_v57 = vmul.f32 %v7258_v27, %v7133_v12  ;;  %v3380_v7 = vadd.f32 %v3374_v24, %v3364_v2  ;;  %v3685_v23 = vadd.f32 %v3679_v51, %v3669_v1  ;;  %v3695_v49 = vmul.f32 %v7267_v20, %v7168_v61  ;;  %v7732_v51 = vld [vmem:[#allocation30_spill] sm:$0xff] }
 0x577   : > { %3714 = vadd.xlane.f32.xlu0 %v3703_v59  ;;  %v3662_v38 = vmul.f32 %v7261_v47, %v7137_v3  ;;  %v3541_v41 = vadd.f32 %v3535_v9, %v3525_v5  ;;  %v3357_v48 = vmul.f32 %v7188_v53, %v7158_v31  ;;  %v7327_v52 = vrot.slane %v3805_v17, %v7727_v8  ;;  %v7733_v5 = vld [vmem:[#allocation24_spill] sm:$0xff] }
 0x578   : > { %v7330_v44 = vrot.slane %v3805_v17, %v7728_v42  ;;  %v7335_v24 = vrot.slane %v3805_v17, %v7729_v11  ;;  %v7338_v59 = vrot.slane %v3805_v17, %v7730_v63  ;;  %v3492_v35 = vmul.f32 %v7194_v15, %v7133_v12 }
 0x579   : > { %v3668_v13 = vadd.f32 %v3662_v38, %v3652_v57  ;;  %v7344_v2 = vadd.f32 %v7089_v46, %v7079_v54  ;;  %v3815_v8 = vmul.f32 %v7327_v52, %v7141_v30  ;;  %v3502_v11 = vmul.f32 %v7197_v6, %v7137_v3  ;;  %v7360_v46 = vpop.xlane.xlu0 %2869 }
 0x57a   : > { %3388 = vadd.xlane.f32.xlu1 %v3380_v7  ;;  %v3825_v42 = vmul.f32 %v7330_v44, %v7146_v34  ;;  %v3701_v63 = vadd.f32 %v3695_v49, %v3685_v23  ;;  %v3363_v1 = vadd.f32 %v3357_v48, %v3347_v10  ;;  %v7354_v21 = vmul.f32 %v7708_v62, %v7091_v43  ;;  %v7380_v7 = vpop.xlane.xlu1 %2691 }
 0x57b   : > { %3550 = vadd.xlane.f32.xlu0 %v3541_v41  ;;  %v7358_v54 = vmul.f32 %v7707_v32, %v7099_v60  ;;  %v3841_v34 = vmul.f32 %v7335_v24, %v7171_v19  ;;  %v3508_v22 = vadd.f32 %v3502_v11, %v3492_v35  ;;  %v3330_v58 = vmul.f32 %v7182_v39, %v7115_v4 }
 0x57c   : > { %v3831_v30 = vadd.f32 %v3825_v42, %v3815_v8  ;;  %v3373_v9 = vmul.f32 %v7191_v25, %v7732_v51  ;;  %v3857_v43 = vmul.f32 %v7338_v59, %v7175_v18  ;;  %v3678_v60 = vmul.f32 %v7264_v45, %v7242_v50  ;;  %v7734_v8 = vld [vmem:[#allocation31_spill] sm:$0xff] }
 0x57d   : > { %v3340_v10 = vmul.f32 %v7185_v14, %v7733_v5  ;;  %v3518_v19 = vmul.f32 %v7200_v56, %v7242_v50  ;;  %v3814_v39 = vmul.f32 %v7327_v52, %v7150_v36  ;;  %v3824_v57 = vmul.f32 %v7330_v44, %v7154_v26  ;;  %v7394_v11 = vpop.xlane.xlu0 %3229 }
 0x57e   : > { %3710 = vadd.xlane.f32.xlu1 %v3701_v63  ;;  %v3847_v17 = vadd.f32 %v3841_v34, %v3831_v30  ;;  %v3379_v18 = vadd.f32 %v3373_v9, %v3363_v1  ;;  %v3684_v23 = vadd.f32 %v3678_v60, %v3668_v13  ;;  %v3651_v38 = vmul.f32 %v7258_v27, %v7105_v40 }
 0x57f   : > { %v3346_v49 = vadd.f32 %v3340_v10, %v3330_v58  ;;  %v3524_v41 = vadd.f32 %v3518_v19, %v3508_v22  ;;  %v3830_v48 = vadd.f32 %v3824_v57, %v3814_v39  ;;  %v3661_v35 = vmul.f32 %v7261_v47, %v7111_v29  ;;  %v7735_v58 = vld [vmem:[#allocation25_spill] sm:$0xff]  ;;  %v3050_v19 = vpop.xlane.xlu1 %3049 }
 0x580   : > { %v3863_v14 = vadd.f32 %v3857_v43, %v3847_v17  ;;  %v3694_v36 = vmul.f32 %v7267_v20, %v7281_v55  ;;  %v3356_v26 = vmul.f32 %v7188_v53, %v7277_v16  ;;  %v3840_v42 = vmul.f32 %v7335_v24, %v7734_v8  ;;  %v7736_v57 = vld [vmem:[#allocation17_spill] sm:$0xff] }
 0x581   : > { %v3491_v13 = vmul.f32 %v7194_v15, %v7105_v40  ;;  %v3534_v63 = vmul.f32 %v7203_v33, %v7281_v55  ;;  %v3667_v1 = vadd.f32 %v3661_v35, %v3651_v38  ;;  %v3501_v30 = vmul.f32 %v7197_v6, %v7111_v29 }
 0x582   : > { %3386 = vadd.xlane.f32.xlu1 %v3379_v18  ;;  %3874 = vadd.xlane.f32.xlu0 %v3863_v14  ;;  %v3362_v34 = vadd.f32 %v3356_v26, %v3346_v49  ;;  %v3846_v22 = vadd.f32 %v3840_v42, %v3830_v48  ;;  %v3650_v53 = vmul.f32 %v7258_v27, %v7115_v4  ;;  %v7737_v49 = vld [vmem:[#allocation26_spill] sm:$0xff]  ;;  %v7738_v27 = vld [vmem:[#allocation27_spill] sm:$0xff]  ;;  %v2868_v26 = vpop.xlane.xlu0 %2867 }
 0x583   : > { %v3890_v9 = vmul.f32 %v7708_v62, %v7735_v58  ;;  %v3700_v43 = vadd.f32 %v3694_v36, %v3684_v23  ;;  %v3540_v60 = vadd.f32 %v3534_v63, %v3524_v41  ;;  %v3507_v10 = vadd.f32 %v3501_v30, %v3491_v13 }
 0x584   : > { %v3660_v17 = vmul.f32 %v7261_v47, %v7733_v5  ;;  %v3372_v39 = vmul.f32 %v7191_v25, %v7344_v2  ;;  %v3856_v18 = vmul.f32 %v7338_v59, %v7736_v57  ;;  %v3813_v38 = vmul.f32 %v7327_v52, %v7737_v49 }
 0x585   : > { %v3823_v14 = vmul.f32 %v7330_v44, %v7738_v27  ;;  %v3677_v23 = vmul.f32 %v7264_v45, %v7158_v31  ;;  %v3517_v47 = vmul.f32 %v7200_v56, %v7158_v31  ;;  %v3490_v36 = vmul.f32 %v7194_v15, %v7115_v4 }
 0x586   : > { %3708 = vadd.xlane.f32.xlu1 %v3700_v43  ;;  %3548 = vadd.xlane.f32.xlu0 %v3540_v60  ;;  %v3666_v41 = vadd.f32 %v3660_v17, %v3650_v53  ;;  %v3378_v48 = vadd.f32 %v3372_v39, %v3362_v34  ;;  %v3862_v25 = vadd.f32 %v3856_v18, %v3846_v22  ;;  %v3228_v18 = vpop.xlane.xlu0 %3227 }
 0x587   : > { %v3829_v35 = vadd.f32 %v3823_v14, %v3813_v38  ;;  %v3683_v8 = vadd.f32 %v3677_v23, %v3667_v1  ;;  %v3523_v42 = vadd.f32 %v3517_v47, %v3507_v10  ;;  %v3676_v13 = vmul.f32 %v7264_v45, %v7277_v16 }
 0x588   : > { %v3500_v63 = vmul.f32 %v7197_v6, %v7733_v5  ;;  %v3693_v30 = vmul.f32 %v7267_v20, %v7732_v51  ;;  %v3839_v34 = vmul.f32 %v7335_v24, %v7164_v0  ;;  %v3812_v22 = vmul.f32 %v7327_v52, %v7133_v12  ;;  %v2690_v6 = vpop.xlane.xlu1 %2689 }
 0x589   : > { %v3822_v15 = vmul.f32 %v7330_v44, %v7137_v3  ;;  %v3533_v45 = vmul.f32 %v7203_v33, %v7732_v51  ;;  %v3682_v1 = vadd.f32 %v3676_v13, %v3666_v41  ;;  %v3811_v60 = vmul.f32 %v7327_v52, %v7105_v40 }
 0x58a   : > { %3384 = vadd.xlane.f32.xlu1 %v3378_v48  ;;  %3872 = vadd.xlane.f32.xlu0 %v3862_v25  ;;  %v3506_v53 = vadd.f32 %v3500_v63, %v3490_v36  ;;  %v3845_v58 = vadd.f32 %v3839_v34, %v3829_v35  ;;  %v3878_v0 = vmul.f32 %v7707_v32, %v7303_v37  ;;  %v3226_v41 = vpop.xlane.xlu0 %3225  ;;  %v5613_v63 = vld [vmem:[%s5854_s15 + $0x90] sm:$0xff]  ;;  %s4971_s15 = sld [smem:[#allocation6 + $0x2]] (!%p4966_p6) }
 0x58b   : > { %v3828_v43 = vadd.f32 %v3822_v15, %v3812_v22  ;;  %v3699_v12 = vadd.f32 %v3693_v30, %v3683_v8  ;;  %v3539_v10 = vadd.f32 %v3533_v45, %v3523_v42  ;;  %v3692_v3 = vmul.f32 %v7267_v20, %v7344_v2 }
 0x58c   : > { %v3821_v17 = vmul.f32 %v7330_v44, %v7111_v29  ;;  %v3855_v39 = vmul.f32 %v7338_v59, %v7168_v61  ;;  %v3810_v57 = vmul.f32 %v7327_v52, %v7115_v4  ;;  %v3820_v40 = vmul.f32 %v7330_v44, %v7733_v5  ;;  %v7739_v44 = vld [vmem:[#allocation18_spill] sm:$0xff]  ;;  %v3048_v23 = vpop.xlane.xlu1 %3047 }
 0x58d   : > { %v3897_v37 = vadd.f32 %v7354_v21, %v7358_v54  ;;  %v3698_v49 = vadd.f32 %v3692_v3, %v3682_v1  ;;  %v3516_v20 = vmul.f32 %v7200_v56, %v7277_v16  ;;  %v3896_v61 = vadd.f32 %v3890_v9, %v3878_v0  ;;  %v7740_v21 = vld [vmem:[#allocation19_spill] sm:$0xff] }
 0x58e   : > { %3706 = vadd.xlane.f32.xlu1 %v3699_v12  ;;  %3546 = vadd.xlane.f32.xlu0 %v3539_v10  ;;  %v3827_v29 = vadd.f32 %v3821_v17, %v3811_v60  ;;  %v3861_v38 = vadd.f32 %v3855_v39, %v3845_v58  ;;  %v3826_v27 = vadd.f32 %v3820_v40, %v3810_v57  ;;  %v3976_v58 = vld [vmem:[%s7631_s3 + $0x220] sm:$0xff] }
 0x58f   : > { %v3889_v4 = vmul.f32 %v7708_v62, %v7360_v46  ;;  %v3522_v52 = vadd.f32 %v3516_v20, %v3506_v53  ;;  %v3903_v5 = vmul.f32 %v7739_v44, %v7332_v28  ;;  %v3915_v54 = vmul.f32 %v7740_v21, %v7394_v11  ;;  %5455 = vmatprep.mubr.msk.f32.mxu0 %vm3980_vm14, %v3976_v58 }
 0x590   : > { %v3877_v14 = vmul.f32 %v7707_v32, %v7380_v7  ;;  %v3532_v56 = vmul.f32 %v7203_v33, %v7344_v2  ;;  %v3888_v47 = vmul.f32 %v7708_v62, %v2868_v26  ;;  %v3902_v9 = vmul.f32 %v7739_v44, %v3050_v19 }
 0x591   : > { %v3914_v46 = vmul.f32 %v7740_v21, %v3228_v18  ;;  %v3838_v28 = vmul.f32 %v7335_v24, %v7242_v50  ;;  %v3909_v11 = vadd.f32 %v3903_v5, %v3897_v37  ;;  %v3876_v25 = vmul.f32 %v7707_v32, %v2690_v6 }
 0x592   : > { %3704 = vadd.xlane.f32.xlu1 %v3698_v49  ;;  %3870 = vadd.xlane.f32.xlu0 %v3861_v38  ;;  %v3895_v48 = vadd.f32 %v3889_v4, %v3877_v14  ;;  %v3908_v7 = vadd.f32 %v3902_v9, %v3896_v61  ;;  %v3901_v33 = vmul.f32 %v7739_v44, %v3048_v23 }
 0x593   : > { %v3538_v35 = vadd.f32 %v3532_v56, %v3522_v52  ;;  %v3844_v36 = vadd.f32 %v3838_v28, %v3828_v43  ;;  %v3921_v26 = vadd.f32 %v3915_v54, %v3909_v11  ;;  %v3913_v19 = vmul.f32 %v7740_v21, %v3226_v41 }
 0x594   : > { %v3920_v8 = vadd.f32 %v3914_v46, %v3908_v7  ;;  %v7470_v42 = vadd.f32 %v3888_v47, %v3876_v25  ;;  %v3907_v13 = vadd.f32 %v3901_v33, %v3895_v48  ;;  %v3854_v50 = vmul.f32 %v7338_v59, %v7281_v55 }
 0x595   : > { %v3837_v30 = vmul.f32 %v7335_v24, %v7158_v31  ;;  %5465 = vmatprep.subr.mxu1 %v3921_v26  ;;  %v3853_v45 = vmul.f32 %v7338_v59, %v7732_v51  ;;  %v3836_v1 = vmul.f32 %v7335_v24, %v7277_v16  ;;  %v3852_v31 = vmul.f32 %v7338_v59, %v7344_v2  ;;  %v3972_v16 = vld [vmem:[%s7631_s3 + $0x200] sm:$0xff]  ;;  %v3046_v24 = vpop.xlane.xlu1 %3045 }
 0x596   : > { %3223 = vadd.xlane.f32.xlu1 %v5613_v63  ;;  %3544 = vadd.xlane.f32.xlu0 %v3538_v35  ;;  %v3919_v34 = vadd.f32 %v3913_v19, %v3907_v13  ;;  %v3860_v22 = vadd.f32 %v3854_v50, %v3844_v36  ;;  %v3900_v35 = vmul.f32 %v7739_v44, %v3046_v24  ;;  %v3974_v24 = vld [vmem:[%s7631_s3 + $0x210] sm:$0xff] }
 0x597   : > { %v3843_v15 = vadd.f32 %v3837_v30, %v3827_v29  ;;  %5466 = vmatpush3.msra.mxu1 %v3921_v26  ;;  %v3842_v55 = vadd.f32 %v3836_v1, %v3826_v27  ;;  %5473 = vmatprep.mubr.msk.f32.mxu1 %vm2476_vm13, %v3972_v16 }
 0x598   : > { %5467 = vmatprep.subr.mxu1 %v3920_v8  ;;  %v3906_v30 = vadd.f32 %v3900_v35, %v7470_v42  ;;  %v7744_v35 = vld [vmem:[#allocation23_spill] sm:$0xff] }
 0x599   : > { %5468 = vmatpush3.msra.mxu1 %v3920_v8  ;;  %v3859_v53 = vadd.f32 %v3853_v45, %v3843_v15  ;;  %v3858_v6 = vadd.f32 %v3852_v31, %v3842_v55  ;;  %v3973_v31 = vld [vmem:[%s7631_s3 + $0x208] sm:$0xff] }
 0x59a   : > { %3868 = vadd.xlane.f32.xlu0 %v3860_v22  ;;  %5469 = vmatprep.subr.mxu1 %v3919_v34 }
 0x59b   : > { %5470 = vmatpush3.msra.mxu1 %v3919_v34 }
 0x59e   : > { %3866 = vadd.xlane.f32.xlu0 %v3859_v53 }
 0x5a2   : > { %3864 = vadd.xlane.f32.xlu0 %v3858_v6 }
 0x5f4   : > { %v3395_v51 = vpop.xlane.xlu0 %3394 }
 0x5f5   : > { %v3553_v43 = vpop.xlane.xlu1 %3552  ;;  %v3929_v57 = vmul.f32 %v7707_v32, %v3395_v51 }
 0x5f6   : > { %v3940_v27 = vmul.f32 %v7708_v62, %v3553_v43 }
 0x5f8   : > { %v3555_v60 = vpop.xlane.xlu0 %3554 }
 0x5f9   : > { %v3391_v59 = vpop.xlane.xlu1 %3390  ;;  %v3941_v17 = vmul.f32 %v7708_v62, %v3555_v60 }
 0x5fa   : > { %v3927_v46 = vmul.f32 %v7707_v32, %v3391_v59 }
 0x5fb   : > { %v3947_v37 = vadd.f32 %v3941_v17, %v3929_v57 }
 0x5fc   : > { %v3393_v2 = vpop.xlane.xlu0 %3392 }
 0x5fd   : > { %v3928_v20 = vmul.f32 %v7707_v32, %v3393_v2 }
 0x5ff   : > { %v3713_v0 = vpop.xlane.xlu1 %3712  ;;  %v3946_v5 = vadd.f32 %v3940_v27, %v3928_v20 }
 0x600   : > { %v3715_v12 = vpop.xlane.xlu0 %3714  ;;  %v3952_v54 = vmul.f32 %v7739_v44, %v3713_v0 }
 0x601   : > { %v3953_v40 = vmul.f32 %v7739_v44, %v3715_v12 }
 0x602   : > { %v3958_v56 = vadd.f32 %v3952_v54, %v3946_v5  ;;  %v525_v5 = vld [vmem:[#allocation2] sm:$0xff] }
 0x603   : > { %v3389_v10 = vpop.xlane.xlu1 %3388  ;;  %v3959_v29 = vadd.f32 %v3953_v40, %v3947_v37  ;;  %v3977_v40 = vld [vmem:[%s7631_s3 + $0x228] sm:$0xff]  ;;  %v3978_v37 = vld [vmem:[%s7631_s3 + $0x230] sm:$0xff] }
 0x604   : > { %v3551_v3 = vpop.xlane.xlu0 %3550  ;;  %v3926_v8 = vmul.f32 %v7707_v32, %v3389_v10 }
 0x605   : > { %v3939_v47 = vmul.f32 %v7708_v62, %v3551_v3 }
 0x607   : > { %v3711_v39 = vpop.xlane.xlu1 %3710  ;;  %v3945_v48 = vadd.f32 %v3939_v47, %v3927_v46 }
 0x608   : > { %v3951_v7 = vmul.f32 %v7739_v44, %v3711_v39 }
 0x60a   : > { %v3957_v26 = vadd.f32 %v3951_v7, %v3945_v48 }
 0x60b   : > { %v3387_v18 = vpop.xlane.xlu1 %3386  ;;  %v3875_v49 = vpop.xlane.xlu0 %3874 }
 0x60c   : > { %v3965_v38 = vmul.f32 %v7740_v21, %v3875_v49  ;;  %v3925_v45 = vmul.f32 %v7707_v32, %v3387_v18 }
 0x60e   : > { %v3971_v61 = vadd.f32 %v3965_v38, %v3959_v29  ;;  %v526_v29 = vld [vmem:[#allocation2 + $0x8] sm:$0xff] }
 0x60f   : > { %v3709_v4 = vpop.xlane.xlu1 %3708  ;;  %v3549_v52 = vpop.xlane.xlu0 %3548 }
 0x610   : > { %5443 = vmatprep.subr.mxu0 %v3971_v61  ;;  %v3938_v36 = vmul.f32 %v7708_v62, %v3549_v52  ;;  %v3950_v1 = vmul.f32 %v7739_v44, %v3709_v4 }
 0x611   : > { %5444 = vmatpush3.msra.mxu0 %v3971_v61  ;;  %v7741_v61 = vld [vmem:[#allocation20_spill] sm:$0xff] }
 0x612   : > { %v3944_v34 = vadd.f32 %v3938_v36, %v3926_v8 }
 0x613   : > { %v3385_v14 = vpop.xlane.xlu1 %3384  ;;  %v3873_v23 = vpop.xlane.xlu0 %3872 }
 0x614   : > { %v3964_v9 = vmul.f32 %v7740_v21, %v3873_v23  ;;  %v3956_v58 = vadd.f32 %v3950_v1, %v3944_v34  ;;  %v3924_v51 = vmul.f32 %v7707_v32, %v3385_v14  ;;  %v7742_v23 = vld [vmem:[#allocation21_spill] sm:$0xff] }
 0x616   : > { %v3970_v41 = vadd.f32 %v3964_v9, %v3958_v56  ;;  %v528_v9 = vld [vmem:[#allocation2 + $0x18] sm:$0xff] }
 0x617   : > { %v3707_v28 = vpop.xlane.xlu1 %3706  ;;  %v3547_v11 = vpop.xlane.xlu0 %3546 }
 0x618   : > { %5445 = vmatprep.subr.mxu0 %v3970_v41  ;;  %v3937_v22 = vmul.f32 %v7708_v62, %v3547_v11  ;;  %v3949_v43 = vmul.f32 %v7739_v44, %v3707_v28  ;;  %v7743_v11 = vld [vmem:[#allocation22_spill] sm:$0xff] }
 0x619   : > { %5446 = vmatpush3.msra.mxu0 %v3970_v41 }
 0x61a   : > { %v3943_v6 = vadd.f32 %v3937_v22, %v3925_v45 }
 0x61b   : > { %v3705_v25 = vpop.xlane.xlu1 %3704  ;;  %v3871_v33 = vpop.xlane.xlu0 %3870 }
 0x61c   : > { %v3963_v19 = vmul.f32 %v7740_v21, %v3871_v33  ;;  %v3955_v0 = vadd.f32 %v3949_v43, %v3943_v6  ;;  %v3948_v32 = vmul.f32 %v7739_v44, %v3705_v25  ;;  %v3979_v44 = vld [vmem:[%s7631_s3 + $0x238] sm:$0xff]  ;;  %v527_v25 = vld [vmem:[#allocation2 + $0x10] sm:$0xff] }
 0x61e   : > { %v3969_v13 = vadd.f32 %v3963_v19, %v3957_v26 }
 0x61f   : > { %v3224_v63 = vpop.xlane.xlu1 %3223  ;;  %v3545_v50 = vpop.xlane.xlu0 %3544 }
 0x620   : > { %v3912_v15 = vmul.f32 %v7740_v21, %v3224_v63  ;;  %5447 = vmatprep.subr.mxu0 %v3969_v13  ;;  %v3936_v42 = vmul.f32 %v7708_v62, %v3545_v50  ;;  %v3975_v62 = vld [vmem:[%s7631_s3 + $0x218] sm:$0xff] }
 0x621   : > { %5448 = vmatpush3.msra.mxu0 %v3969_v13 }
 0x622   : > { %v3918_v53 = vadd.f32 %v3912_v15, %v3906_v30  ;;  %v3942_v2 = vadd.f32 %v3936_v42, %v3924_v51 }
 0x623   : > { %v3869_v55 = vpop.xlane.xlu0 %3868 }
 0x624   : > { %v3962_v16 = vmul.f32 %v7740_v21, %v3869_v55  ;;  %5471 = vmatprep.subr.mxu1 %v3918_v53  ;;  %v3954_v17 = vadd.f32 %v3948_v32, %v3942_v2 }
 0x625   : > { %5472 = vmatpush3.msra.mxu1 %v3918_v53 }
 0x626   : > { %v3968_v60 = vadd.f32 %v3962_v16, %v3956_v58  ;;  %5474 = vmatmul.mubr.msk.f32.vlgmr.msra.gmra.mxu1 %vm2476_vm13, %v3973_v31 }
 0x627   : > { %v3867_v59 = vpop.xlane.xlu0 %3866  ;;  %5476 = vmatprep.mubr.msk.f32.mxu1 %vm2476_vm13, %v3974_v24 }
 0x628   : > { %v3961_v12 = vmul.f32 %v7740_v21, %v3867_v59  ;;  %5449 = vmatprep.subr.mxu0 %v3968_v60 }
 0x629   : > { %5450 = vmatpush3.msra.mxu0 %v3968_v60 }
 0x62a   : > { %v3967_v10 = vadd.f32 %v3961_v12, %v3955_v0  ;;  %5477 = vmatmul.mubr.msk.f32.gmra.mxu1 %vm2476_vm13, %v3975_v62 }
 0x62b   : > { %v3865_v3 = vpop.xlane.xlu0 %3864 }
 0x62c   : > { %v3960_v39 = vmul.f32 %v7740_v21, %v3865_v3  ;;  %5451 = vmatprep.subr.mxu0 %v3967_v10 }
 0x62d   : > { %5452 = vmatpush3.msra.mxu0 %v3967_v10 }
 0x62e   : > { %v3966_v57 = vadd.f32 %v3960_v39, %v3954_v17 }
 0x630   : > { %5453 = vmatprep.subr.mxu0 %v3966_v57 }
 0x631   : > { %5454 = vmatpush3.msra.mxu0 %v3966_v57 }
 0x632   : > { %5456 = vmatmul.mubr.msk.f32.vlgmr.msra.gmra.mxu0 %vm3980_vm14, %v3977_v40 }
 0x633   : > { %5458 = vmatprep.mubr.msk.f32.mxu0 %vm3980_vm14, %v3978_v37 }
 0x636   : > { %5459 = vmatmul.mubr.msk.f32.gmra.mxu0 %vm3980_vm14, %v3979_v44 }
 0x6e6   : > { %v5475_v21 = vpop.f32.mrf.mxu1 }
 0x6e8   : > { %v4159_v18 = vpop.f32.mrf.mxu1 }
 0x6ea   : > { %v5478_v27 = vpop.f32.mrf.mxu1 }
 0x6ec   : > { %v4169_v41 = vpop.f32.mrf.mxu1 }
 0x6f2   : > { %v5457_v49 = vpop.f32.mrf.mxu0 }
 0x6f3   : > { %v4165_v20 = vadd.f32 %v5475_v21, %v5457_v49 }
 0x6f4   : > { %v4059_v38 = vpop.f32.mrf.mxu0 }
 0x6f5   : > { %v4179_v4 = vadd.f32 %v4165_v20, %v7741_v61  ;;  %v4160_v52 = vadd.f32 %v4159_v18, %v4059_v38 }
 0x6f6   : > { %v5460_v54 = vpop.f32.mrf.mxu0 }
 0x6f7   : > { %v4183_v14 = vadd.f32 %v4179_v4, %v526_v29  ;;  %v4178_v56 = vadd.f32 %v4160_v52, %v7742_v23  ;;  %v4175_v47 = vadd.f32 %v5478_v27, %v5460_v54 }
 0x6f8   : > { %v4069_v46 = vpop.f32.mrf.mxu0 }
 0x6f9   : > { %4187 = vst.msk [vmem:[#allocation2 + $0x8] sm:$0xff] %vm551_vm2, %v4183_v14  ;;  %v4182_v28 = vadd.f32 %v4178_v56, %v525_v5  ;;  %v4181_v48 = vadd.f32 %v4175_v47, %v7743_v11  ;;  %v4170_v7 = vadd.f32 %v4169_v41, %v4069_v46 }
 0x6fb   : > { %4186 = vst.msk [vmem:[#allocation2] sm:$0xff] %vm551_vm2, %v4182_v28  ;;  %v4185_v33 = vadd.f32 %v4181_v48, %v528_v9  ;;  %v4180_v36 = vadd.f32 %v4170_v7, %v7744_v35  ;;  %4193 = sbr.rel (%p4966_p6) target bundleno = 2927 (0xb6f), region = 172 }
 0x6fd   : > { %4189 = vst.msk [vmem:[#allocation2 + $0x18] sm:$0xff] %vm551_vm2, %v4185_v33  ;;  %v4184_v26 = vadd.f32 %v4180_v36, %v527_v25 }
 0x6ff   : > { %4188 = vst.msk [vmem:[#allocation2 + $0x10] sm:$0xff] %vm551_vm2, %v4184_v26 }
 0x700   : > { %v4205_v19 = vld [vmem:[%s7631_s3 + $0x258] sm:$0xff]  ;;  %v4203_v8 = vld [vmem:[%s7631_s3 + $0x248] sm:$0xff]  ;;  %v5692_v13 = vmov 0   ;;  %v4204_v63 = vld [vmem:[%s7631_s3 + $0x250] sm:$0xff]  ;;  %vm4258_vm15 = vcmask 261120   ;;  %v4235_v24 = vstv %s4234_s17  ;;  %v5693_v18 = vmov 0.0  }
 0x701   : > { %5615 = vset.pattern.permute.xlu1 %v5692_v13  ;;  %5614 = vset.pattern.permute.xlu0 %v5692_v13  ;;  %v4202_v50 = vld [vmem:[%s7631_s3 + $0x240] sm:$0xff]  ;;  %v4247_v30 = vld [vmem:[%s7631_s3 + $0x278] sm:$0xff]  ;;  %v4246_v34 = vld [vmem:[%s7631_s3 + $0x270] sm:$0xff]  ;;  %vm5694_vm8 = vmmov 0   ;;  %v4343_v29 = vstv %s4969_s28  ;;  %vm4355_vm11 = vcmask 130048   ;;  %vm4610_vm14 = vcmask 15360  }
 0x702   : > { %4223 = vperm.xlu0 %5614, %v4205_v19   ;;  %4213 = vperm.xlu1 %5615, %v4203_v8   ;;  %v4349_v22 = vld [vmem:[%s7631_s3 + $0x288] sm:$0xff]  ;;  %v4435_v15 = vld [vmem:[%s7631_s3 + $0x298] sm:$0xf]  ;;  %v4244_v45 = vld [vmem:[%s7631_s3 + $0x260] sm:$0xff]  ;;  %v4431_v9 = vstv %s4971_s15 }
 0x703   : > { %5487 = vmatprep.mubr.msk.f32.mxu0 %vm4258_vm15, %v4244_v45  ;;  %v4520_v1 = vld [vmem:[%s7631_s3 + $0x2a8] sm:$0x3]  ;;  %v4194_v42 = vld [vmem:[#allocation2] sm:$0xff]  ;;  %5490 = vmatprep.subr.mxu1 %v5693_v18  ;;  %v4434_v11 = vld [vmem:[%s7631_s3 + $0x290] sm:$0xf]  ;;  %v4516_v33 = vstv %s4973_s8 }
 0x704   : > { %v4197_v53 = vld [vmem:[#allocation2 + $0x18] sm:$0xff]  ;;  %v4195_v55 = vld [vmem:[#allocation2 + $0x8] sm:$0xff]  ;;  %v4198_v59 = vmul.f32 0.00390625, %v4194_v42  ;;  %5494 = vmatprep.mubr.msk.f32.mxu1 %vm5694_vm8, %v5693_v18  ;;  %v4348_v14 = vld [vmem:[%s7631_s3 + $0x280] sm:$0xff] }
 0x705   : > { %v4201_v31 = vmul.f32 0.00390625, %v4197_v53  ;;  %v4199_v58 = vmul.f32 0.00390625, %v4195_v55  ;;  %v4245_v21 = vld [vmem:[%s7631_s3 + $0x268] sm:$0xff]  ;;  %v4519_v19 = vld [vmem:[%s7631_s3 + $0x2a0] sm:$0x3] }
 0x706   : > { %4218 = vperm.xlu0 %5614, %v4204_v63   ;;  %4208 = vperm.xlu1 %5615, %v4202_v50   ;;  %v4196_v6 = vld [vmem:[#allocation2 + $0x10] sm:$0xff]  ;;  %v4604_v50 = vstv %s4976_s20 }
 0x707   : > { %v4200_v60 = vmul.f32 0.00390625, %v4196_v6 }
 0x70a   : > { %4255 = vperm.xlu0 %5614, %v4247_v30   ;;  %4250 = vperm.xlu1 %5615, %v4246_v34  }
 0x70e   : > { %4352 = vperm.xlu0 %5614, %v4349_v22   ;;  %4438 = vperm.xlu1 %5615, %v4435_v15   ;;  %v4607_v15 = vld [vmem:[%s7631_s3 + $0x2b0] sm:$0x1] }
 0x712   : > { %4523 = vperm.xlu0 %5614, %v4520_v1   ;;  %v4609_v1 = vstv %s4977_s12 }
 0x77d   : > { %v4224_v16 = vpop.permute.xlu0 %4223  ;;  %v4214_v51 = vpop.permute.xlu1 %4213 }
 0x77e   : > { %v4229_v43 = vadd.f32 %v4224_v16, %v4201_v31  ;;  %v4227_v62 = vadd.f32 %v4214_v51, %v4199_v58 }
 0x780   : > { %vm4233_vm0 = vcmp.ge.f32.partialorder %v4229_v43, 0.0  ;;  %v4239_v2 = vmul.f32 %v4235_v24, %v4229_v43  ;;  %v4237_v17 = vmul.f32 %v4235_v24, %v4227_v62  ;;  %vm4231_vm4 = vcmp.ge.f32.partialorder %v4227_v62, 0.0 }
 0x781   : > { %v4219_v0 = vpop.permute.xlu0 %4218  ;;  %v4209_v12 = vpop.permute.xlu1 %4208 }
 0x782   : > { %v4228_v32 = vadd.f32 %v4219_v0, %v4200_v60  ;;  %v4226_v10 = vadd.f32 %v4209_v12, %v4198_v59  ;;  %v4243_v3 = vsel %vm4233_vm0, %v4229_v43, %v4239_v2  ;;  %v4241_v37 = vsel %vm4231_vm4, %v4227_v62, %v4237_v17 }
 0x783   : > { %5479 = vmatprep.subr.mxu0 %v4243_v3 }
 0x784   : > { %v4238_v39 = vmul.f32 %v4235_v24, %v4228_v32  ;;  %5480 = vmatpush3.msra.mxu0 %v4243_v3  ;;  %vm4232_vm3 = vcmp.ge.f32.partialorder %v4228_v32, 0.0  ;;  %v4236_v57 = vmul.f32 %v4235_v24, %v4226_v10  ;;  %vm4230_vm6 = vcmp.ge.f32.partialorder %v4226_v10, 0.0 }
 0x785   : > { %v4256_v49 = vpop.permute.xlu0 %4255  ;;  %v4251_v27 = vpop.permute.xlu1 %4250 }
 0x786   : > { %v4242_v40 = vsel %vm4232_vm3, %v4228_v32, %v4238_v39  ;;  %v4240_v44 = vsel %vm4230_vm6, %v4226_v10, %v4236_v57 }
 0x787   : > { %5481 = vmatprep.subr.mxu0 %v4242_v40 }
 0x788   : > { %5482 = vmatpush3.msra.mxu0 %v4242_v40 }
 0x789   : > { %5483 = vmatprep.subr.mxu0 %v4241_v37  ;;  %v4353_v56 = vpop.permute.xlu0 %4352  ;;  %v4439_v7 = vpop.permute.xlu1 %4438 }
 0x78a   : > { %5484 = vmatpush3.msra.mxu0 %v4241_v37 }
 0x78b   : > { %5485 = vmatprep.subr.mxu0 %v4240_v44 }
 0x78c   : > { %5486 = vmatpush3.msra.mxu0 %v4240_v44 }
 0x78d   : > { %5488 = vmatmul.mubr.msk.f32.vlgmr.msra.gmra.mxu0 %vm4258_vm15, %v4245_v21  ;;  %5502 = vmatprep.subr.mxu0 %v5693_v18  ;;  %v4524_v13 = vpop.permute.xlu0 %4523 }
 0x78e   : > { %5504 = vmatprep.mubr.msk.f32.mxu0 %vm5694_vm8, %v5693_v18 }
 0x84d   : > { %v5489_v20 = vpop.f32.mrf.mxu0 }
 0x84e   : > { %v4337_v38 = vadd.f32 %v5489_v20, %v4256_v49 }
 0x84f   : > { %v4331_v61 = vpop.f32.mrf.mxu0 }
 0x850   : > { %v4332_v4 = vadd.f32 %v4331_v61, %v4251_v27  ;;  %vm4341_vm9 = vcmp.ge.f32.partialorder %v4337_v38, 0.0  ;;  %v4345_v52 = vmul.f32 %v4343_v29, %v4337_v38 }
 0x852   : > { %v4344_v5 = vmul.f32 %v4343_v29, %v4332_v4  ;;  %v4347_v54 = vsel %vm4341_vm9, %v4337_v38, %v4345_v52  ;;  %vm4340_vm10 = vcmp.ge.f32.partialorder %v4332_v4, 0.0 }
 0x853   : > { %5491 = vmatpush3.msra.mxu1 %v4347_v54 }
 0x854   : > { %5492 = vmatprep.subr.mxu1 %v5693_v18  ;;  %v4346_v23 = vsel %vm4340_vm10, %v4332_v4, %v4344_v5 }
 0x855   : > { %5493 = vmatpush3.msra.mxu1 %v4346_v23 }
 0x856   : > { %5495 = vmatmul.mubr.msk.f32.vlgmr.msra.gmra.mxu1 %vm4355_vm11, %v4348_v14  ;;  %5497 = vmatprep.subr.mxu1 %v5693_v18 }
 0x857   : > { %5499 = vmatprep.mubr.msk.f32.mxu1 %vm5694_vm8, %v5693_v18 }
 0x916   : > { %v4425_v47 = vpop.f32.mrf.mxu1 }
 0x917   : > { %v4426_v46 = vadd.f32 %v4425_v47, %v4353_v56 }
 0x918   : > { %v5496_v41 = vpop.f32.mrf.mxu1 }
 0x919   : > { %vm4429_vm12 = vcmp.ge.f32.partialorder %v4426_v46, 0.0  ;;  %v4432_v28 = vmul.f32 %v4431_v9, %v4426_v46 }
 0x91b   : > { %v4433_v48 = vsel %vm4429_vm12, %v4426_v46, %v4432_v28 }
 0x91c   : > { %5498 = vmatpush3.msra.mxu1 %v4433_v48 }
 0x91d   : > { %5500 = vmatmul.mubr.msk.f32.vlgmr.msra.gmra.mxu1 %vm1239_vm7, %v4434_v11  ;;  %5507 = vmatprep.subr.mxu1 %v5693_v18 }
 0x91e   : > { %5509 = vmatprep.mubr.msk.f32.mxu1 %vm5694_vm8, %v5693_v18 }
 0x9dd   : > { %v4510_v25 = vpop.f32.mrf.mxu1 }
 0x9de   : > { %v4511_v35 = vadd.f32 %v4510_v25, %v4439_v7 }
 0x9df   : > { %v5501_v36 = vpop.f32.mrf.mxu1 }
 0x9e0   : > { %vm4514_vm13 = vcmp.ge.f32.partialorder %v4511_v35, 0.0  ;;  %v4517_v26 = vmul.f32 %v4516_v33, %v4511_v35 }
 0x9e2   : > { %v4518_v8 = vsel %vm4514_vm13, %v4511_v35, %v4517_v26 }
 0x9e3   : > { %5503 = vmatpush3.msk.msra.mxu0 %vm561_vm1, %v4518_v8  ;;  %vm4687_vm1 = vcmask 24576  }
 0x9e4   : > { %5505 = vmatmul.mubr.msk.f32.vlgmr.msra.gmra.mxu0 %vm551_vm2, %v4519_v19 }
 0xaa4   : > { %v4598_v63 = vpop.f32.mrf.mxu0 }
 0xaa5   : > { %v4599_v30 = vadd.f32 %v4598_v63, %v4524_v13 }
 0xaa6   : > { %v5506_v34 = vpop.f32.mrf.mxu0 }
 0xaa7   : > { %vm4602_vm7 = vcmp.ge.f32.partialorder %v4599_v30, 0.0  ;;  %v4605_v22 = vmul.f32 %v4604_v50, %v4599_v30 }
 0xaa9   : > { %v4606_v45 = vsel %vm4602_vm7, %v4599_v30, %v4605_v22 }
 0xaaa   : > { %5508 = vmatpush3.msk.msra.mxu1 %vm942_vm5, %v4606_v45 }
 0xaab   : > { %5510 = vmatmul.mubr.msk.f32.vlgmr.msra.gmra.mxu1 %vm4610_vm14, %v4607_v15 }
 0xb6b   : > { %v4683_v53 = vpop.f32.mrf.mxu1 }
 0xb6c   : > { %v4684_v55 = vadd.f32 %v4683_v53, %v4609_v1 }
 0xb6d   : > { %v5511_v31 = vpop.f32.mrf.mxu1 }
 0xb6e   : > { %4688 = vst.msk [vmem:[#allocation9] sm:$0x1] %vm4687_vm1, %v4684_v55 }
 0xb6f PF: > { %p5528_p7 = scmp.eq.s32.totalorder %s5742_s21, 1  ;;  %s5695_s13 = smov [#allocation9]  }
 0xb70   : > { %s4696_s14 = sshll.u32 %s5695_s13, 4  ;;  %s4697_s14 = int_to_ptr.vmem [resolvable:$true] %s4696_s14 }
 0xb71   : > { %s5631_s18 = scalar_lea.vmem %s4697_s14, 16  ;;  %s5637_s27 = scalar_lea.vmem %s4697_s14, 32 }
 0xb72   : > { %p5632_p8 = scmp.ne.s32.totalorder %s4697_s14, %s5631_s18  ;;  %p5638_p11 = scmp.lt.s32.totalorder %s4697_s14, %s4697_s14 }
 0xb73   : > { %p5639_p12 = scmp.lt.s32.totalorder %s5637_s27, %s5631_s18 }
 0xb74   : > { %p5633_p9 = pnand %p5632_p8, %p5528_p7 }
 0xb75   : > { %p5640_p13 = por %p5639_p12, %p5638_p11 }
 0xb76   : > { %p5634_p10 = pneg %p5633_p9 }
 0xb78   : > { %p5641_p0 = pnand %p5640_p13, %p5634_p10 }
 0xb7a   : > { %5644 = shalt.err (!%p5641_p0)
}
 0xb7b   : > { %5519 = dma.vmem_to_hbm [thread:$0]  (%p5528_p7), %s4697_s14, 16, %s7633_s5, [#allocation7]  }
 0xb7c   : > { %5672 = dma.done.wait (%p5528_p7), [#allocation7], 16  }
 0xb7d   : > { %5674 = vsyncadd (%p5528_p7), [#allocation7], 4294967280 }
 0xb7e PF: > { %p14_p1 = scmp.ge.s32.totalorder %s5745_s22, 4   ;;  %s7745_s18 = smov %s5681_s19 }
 0xb7f   : > { %s7746_s19 = smov %s5755_s25  ;;  %s7747_s20 = smov %s5745_s22 }
 0xb80   :  { %16 = sbr.rel (!%p14_p1) target bundleno = 3 (0x3), region = 230 }
 0xb85   :  { %4709 = vsyncpa [#allocation7], 1 }
 0xb86   :  { %4711 = vsyncpa [#allocation7 + $0x1], 1 }
 0xb87   :  { %4712 = vsyncpa [#allocation8], 1 }
 0xb88   :  { %4714 = vsyncpa [#allocation8 + $0x1], 1 }

</bundles_post_ra>
